<compile_context>
chip_gen: v7x
topology: tpu7x:2x2x1
jax: 0.10.0
libtpu: 0.0.40
codegen_flags: <defaults>
</compile_context>

<pallas_src>
import functools

import jax
import jax.numpy as jnp
from jax.experimental import pallas as pl
from jax.experimental.pallas import tpu as pltpu

LN_EPS = 1e-5          # PyTorch nn.LayerNorm default
_NEG_INF = -1e30       # f32 causal-mask fill (scores are kept in f32)
_VMEM_LIMIT = 48 * 1024 * 1024   # above v5e/v6e scoped defaults, < v7x 64 MiB


# --------------------------------------------------------------------------
# helpers
# --------------------------------------------------------------------------
def _layernorm(x, g, b):
    x = x.astype(jnp.float32)
    mu = jnp.mean(x, axis=-1, keepdims=True)
    var = jnp.mean((x - mu) ** 2, axis=-1, keepdims=True)
    return (x - mu) * jax.lax.rsqrt(var + LN_EPS) * g + b


# --------------------------------------------------------------------------
# Pallas kernels
# --------------------------------------------------------------------------
def _patch_embed_kernel(x_ref, w_ref, b_ref, o_ref):
    """o = x @ w + b  (conv-as-matmul patch embedding); bf16 in, f32 out."""
    o_ref[...] = (
        jnp.dot(x_ref[...], w_ref[...], preferred_element_type=jnp.float32)
        + b_ref[...]
    )


def _fused_blocks_kernel(n_heads, seq_len,
                         x_ref,
                         ln1w_ref, ln1b_ref, wqkv_ref, bqkv_ref,
                         wo_ref, bo_ref, ln2w_ref, ln2b_ref,
                         w1_ref, b1_ref, w2_ref, b2_ref,
                         lnfw_ref, lnfb_ref,
                         o_ref):
    """All transformer layers + final LN; one grid step per (batch_tile, layer).

    The activation lives in the output block ((B_tile*S, D), f32), which stays
    VMEM-resident across the inner "arbitrary" layer axis because its index
    map ignores `l`.  Per-layer bf16 weights stream through the pipeline once
    per layer regardless of batch size.
    """
    l = pl.program_id(1)
    n_layers = pl.num_programs(1)

    @pl.when(l == 0)
    def _():
        o_ref[...] = x_ref[...]

    x = o_ref[...]                      # (N, D) f32, N = B_tile * S
    N, D = x.shape
    S = seq_len
    Bt = N // S
    H = n_heads
    hd = D // H

    # ---- causal multi-head self-attention (pre-LN), fused QKV projection ----
    # 1/sqrt(hd) is already folded into the Q columns of wqkv (init time).
    xn = _layernorm(x, ln1w_ref[0], ln1b_ref[0])
    qkv = (jnp.dot(xn.astype(jnp.bfloat16), wqkv_ref[0],
                   preferred_element_type=jnp.float32)
           + bqkv_ref[0])               # (N, 3D) f32

    # (B_tile*H, S, hd) head stacks for the batched MXU score / context dots.
    # Static row slices are sublane-aligned (S % 8 == 0); the hd-wide lane
    # slices are the unavoidable layout pass for hd < 128.
    def heads(col_off):
        return jnp.stack(
            [qkv[b * S:(b + 1) * S, col_off + h * hd: col_off + (h + 1) * hd]
             for b in range(Bt) for h in range(H)],
            axis=0).astype(jnp.bfloat16)

    qh = heads(0)
    kh = heads(D)
    vh = heads(2 * D)

    s = jax.lax.dot_general(
        qh, kh, (((2,), (2,)), ((0,), (0,))),
        preferred_element_type=jnp.float32)                 # (Bt*H, S, S) f32

    row = jax.lax.broadcasted_iota(jnp.int32, (S, S), 0)
    col = jax.lax.broadcasted_iota(jnp.int32, (S, S), 1)
    s = jnp.where((row >= col)[None, :, :], s, _NEG_INF)    # padded keys masked

    m = jnp.max(s, axis=-1, keepdims=True)
    p = jnp.exp(s - m)
    denom = jnp.sum(p, axis=-1, keepdims=True)
    a = p * pl.reciprocal(denom, approx=True)               # EUP divide (~1e-3)

    ctx = jax.lax.dot_general(
        a.astype(jnp.bfloat16), vh, (((2,), (1,)), ((0,), (0,))),
        preferred_element_type=jnp.float32)                 # (Bt*H, S, hd) f32
    ctx = ctx.astype(jnp.bfloat16)

    # Lane-concat heads per batch element, row-concat batch elements
    # -> (N, D) bf16, then ONE full-depth (D) output-projection matmul.
    ctx_cat = jnp.concatenate(
        [jnp.concatenate([ctx[b * H + h] for h in range(H)], axis=1)
         for b in range(Bt)], axis=0)                       # (N, D) bf16

    attn = (jnp.dot(ctx_cat, wo_ref[0],
                    preferred_element_type=jnp.float32) + bo_ref[0])
    x = x + attn

    # ---- MLP ----
    xn2 = _layernorm(x, ln2w_ref[0], ln2b_ref[0])
    h1 = (jnp.dot(xn2.astype(jnp.bfloat16), w1_ref[0],
                  preferred_element_type=jnp.float32) + b1_ref[0])
    h1 = jax.nn.gelu(h1, approximate=True)                  # GPT-2 gelu_new
    mlp = (jnp.dot(h1.astype(jnp.bfloat16), w2_ref[0],
                   preferred_element_type=jnp.float32) + b2_ref[0])
    x = x + mlp

    @pl.when(l < n_layers - 1)
    def _():
        o_ref[...] = x

    @pl.when(l == n_layers - 1)                 # fold final LayerNorm in
    def _():
        o_ref[...] = _layernorm(x, lnfw_ref[...], lnfb_ref[...])


# --------------------------------------------------------------------------
# Pallas wrappers
# --------------------------------------------------------------------------
def patch_embed_matmul(patches2d_bf16, w_bf16, b):
    """patches2d: (N, P) bf16, w: (P, D) bf16, b: (1, D) f32 -> (N, D) f32."""
    N, P = patches2d_bf16.shape
    D = w_bf16.shape[1]
    tn = N if N <= 512 else 512            # row tile (full array for small N)
    grid = (pl.cdiv(N, tn),)
    return pl.pallas_call(
        _patch_embed_kernel,
        out_shape=jax.ShapeDtypeStruct((N, D), jnp.float32),
        grid=grid,
        in_specs=[
            pl.BlockSpec((tn, P), lambda i: (i, 0)),
            pl.BlockSpec((P, D), lambda i: (0, 0)),
            pl.BlockSpec((1, D), lambda i: (0, 0)),
        ],
        out_specs=pl.BlockSpec((tn, D), lambda i: (i, 0)),
        compiler_params=pltpu.CompilerParams(dimension_semantics=("parallel",)),
    )(patches2d_bf16, w_bf16, b)


_LAYER_PARAM_NAMES = ("ln1w", "ln1b", "wqkv", "bqkv", "wo", "bo",
                      "ln2w", "ln2b", "w1", "b1", "w2", "b2")


def transformer_stack(x, blocks, ln_f_w, ln_f_b, n_heads, num_batch_tiles=1):
    """x: (B, S, D) -> (B, S, D).  grid=(num_batch_tiles, L).

    num_batch_tiles=1 (whole batch per block) is best on v5e/v6e; on v7x use
    >=2 so both TensorCores get a 'parallel' slice of the batch.
    """
    B, S, D = x.shape
    L = blocks["wqkv"].shape[0]
    assert B % num_batch_tiles == 0
    Bt = B // num_batch_tiles
    rows = Bt * S

    x2d = x.reshape(B * S, D)            # lane-dense 2D activation layout

    def const_spec(arr):
        nd = arr.ndim
        return pl.BlockSpec(arr.shape, lambda bt, l, _nd=nd: (0,) * _nd)

    def layer_spec(arr):
        shape = (1,) + arr.shape[1:]
        nd = arr.ndim
        return pl.BlockSpec(shape,
                            lambda bt, l, _nd=nd: (l,) + (0,) * (_nd - 1))

    in_specs = [pl.BlockSpec((rows, D), lambda bt, l: (bt, 0))]
    inputs = [x2d]
    for name in _LAYER_PARAM_NAMES:
        arr = blocks[name]
        in_specs.append(layer_spec(arr))
        inputs.append(arr)
    in_specs += [const_spec(ln_f_w), const_spec(ln_f_b)]
    inputs += [ln_f_w, ln_f_b]

    out2d = pl.pallas_call(
        functools.partial(_fused_blocks_kernel, n_heads, S),
        out_shape=jax.ShapeDtypeStruct((B * S, D), jnp.float32),
        grid=(num_batch_tiles, L),
        in_specs=in_specs,
        out_specs=pl.BlockSpec((rows, D), lambda bt, l: (bt, 0)),
        input_output_aliases={0: 0},     # reuse the sequence buffer for output
        compiler_params=pltpu.CompilerParams(
            dimension_semantics=("parallel", "arbitrary"),
            vmem_limit_bytes=_VMEM_LIMIT),
    )(*inputs)
    return out2d.reshape(B, S, D)


# --------------------------------------------------------------------------
# Model: parameter init + forward (glue in plain JAX, hot paths in Pallas)
# --------------------------------------------------------------------------
def init_params(key, *, patch_size, in_chans, embed_dim, num_layers,
                num_heads, mlp_ratio, max_seqlen):
    D = embed_dim
    F = int(mlp_ratio * embed_dim)
    P = in_chans * patch_size * patch_size
    hd = D // num_heads
    assert D % num_heads == 0
    scale = 1.0 / float(hd) ** 0.5
    ki = iter(jax.random.split(key, 3 + 6 * num_layers))

    def nrm(k, shape, std=0.02):
        return (std * jax.random.normal(k, shape)).astype(jnp.float32)

    params = {
        # conv weight (D, C, kh, kw) flattened -> (C*kh*kw, D), stored bf16
        "patch_w": nrm(next(ki), (D, P)).T.astype(jnp.bfloat16),
        "patch_b": jnp.zeros((1, D), jnp.float32),
        "sos_token": jax.random.normal(next(ki), (1, 1, D), jnp.float32),
        "pos_embed": nrm(next(ki), (max_seqlen, D)),
        "ln_f_w": jnp.ones((1, D), jnp.float32),
        "ln_f_b": jnp.zeros((1, D), jnp.float32),
    }

    wqkv_l, wo_l, w1_l, w2_l = [], [], [], []
    for _ in range(num_layers):
        # fold 1/sqrt(hd) attention scale into the Q projection (host-side,
        # before the bf16 cast) -> no per-score multiply in the kernel.
        wq = nrm(next(ki), (D, D)) * scale
        wk = nrm(next(ki), (D, D))
        wv = nrm(next(ki), (D, D))
        wqkv_l.append(jnp.concatenate([wq, wk, wv], axis=1))      # (D, 3D)
        # output projection stored (D_in, D_out); D_in rows are head-major
        # (h*hd + d), matching the lane-concatenated head contexts.
        wo_l.append(nrm(next(ki), (D, D)))
        w1_l.append(nrm(next(ki), (D, F)))
        w2_l.append(nrm(next(ki), (F, D)))

    L = num_layers
    params["blocks"] = {
        "ln1w": jnp.ones((L, 1, D), jnp.float32),
        "ln1b": jnp.zeros((L, 1, D), jnp.float32),
        "wqkv": jnp.stack(wqkv_l).astype(jnp.bfloat16),           # (L, D, 3D)
        "bqkv": jnp.zeros((L, 1, 3 * D), jnp.float32),            # Q-bias scale
        #   note: bqkv is zero-init; if non-zero, its Q slice must also be
        #   multiplied by `scale` to match the folded weight scaling.
        "wo":   jnp.stack(wo_l).astype(jnp.bfloat16),             # (L, D, D)
        "bo":   jnp.zeros((L, 1, D), jnp.float32),
        "ln2w": jnp.ones((L, 1, D), jnp.float32),
        "ln2b": jnp.zeros((L, 1, D), jnp.float32),
        "w1":   jnp.stack(w1_l).astype(jnp.bfloat16),             # (L, D, F)
        "b1":   jnp.zeros((L, 1, F), jnp.float32),
        "w2":   jnp.stack(w2_l).astype(jnp.bfloat16),             # (L, F, D)
        "b2":   jnp.zeros((L, 1, D), jnp.float32),
    }
    return params


def extract_patches(x, patch_size):
    """NCHW -> (B, T, C*ps*ps), flattened in (c, kh, kw) order (conv-compatible)."""
    B, C, H, W = x.shape
    ps = patch_size
    gh, gw = H // ps, W // ps
    x = x.reshape(B, C, gh, ps, gw, ps)
    x = jnp.transpose(x, (0, 2, 4, 1, 3, 5))        # (B, gh, gw, C, ps, ps)
    return x.reshape(B, gh * gw, C * ps * ps)


def cgpt2_forward(x, params, *, patch_size, num_heads, max_seqlen,
                  num_batch_tiles=1):
    B = x.shape[0]
    D = params["patch_w"].shape[1]

    # --- patch embedding (conv-as-matmul, row-tiled Pallas, bf16 stream) ---
    patches = extract_patches(x, patch_size)         # (B, T, P)
    T = patches.shape[1]
    assert T < max_seqlen, f"seq len {T} >= block size {max_seqlen}"
    emb = patch_embed_matmul(
        patches.reshape(B * T, -1).astype(jnp.bfloat16),
        params["patch_w"], params["patch_b"]
    ).reshape(B, T, D)

    # --- prepend SOS token, add positional embedding (dropout == identity) ---
    sos = jnp.broadcast_to(params["sos_token"], (B, 1, D))
    seq = jnp.concatenate([sos, emb], axis=1)         # (B, S, D)
    S = T + 1
    seq = seq + params["pos_embed"][None, :S, :]

    # pad sequence length to a multiple of 8 sublanes; padded key positions
    # are automatically excluded by the causal mask, padded rows sliced off.
    S_pad = ((S + 7) // 8) * 8
    if S_pad != S:
        seq = jnp.pad(seq, ((0, 0), (0, S_pad - S), (0, 0)))

    # --- all transformer blocks + final LN in one fused Pallas call ---
    out = transformer_stack(seq, params["blocks"],
                            params["ln_f_w"], params["ln_f_b"], num_heads,
                            num_batch_tiles=num_batch_tiles)
    return out[:, :S, :]


# --------------------------------------------------------------------------
if __name__ == "__main__":
    # Small config: 16x16 image, 4x4 patches -> T=16, seq=17; lane-dense D=128.
    B, C, H, W = 2, 3, 16, 16
    PATCH = 4
    EMBED_DIM = 128
    NUM_HEADS = 4
    NUM_LAYERS = 2
    MLP_RATIO = 4.0
    MAX_SEQLEN = 64

    key = jax.random.PRNGKey(0)
    kx, kp = jax.random.split(key)
    x = jax.random.normal(kx, (B, C, H, W), dtype=jnp.float32)

    params = init_params(
        kp, patch_size=PATCH, in_chans=C, embed_dim=EMBED_DIM,
        num_layers=NUM_LAYERS, num_heads=NUM_HEADS, mlp_ratio=MLP_RATIO,
        max_seqlen=MAX_SEQLEN)

    # num_batch_tiles=1: whole batch per block (v5e/v6e); use >=2 on v7x.
    fwd = jax.jit(functools.partial(
        cgpt2_forward, patch_size=PATCH, num_heads=NUM_HEADS,
        max_seqlen=MAX_SEQLEN, num_batch_tiles=1))

    out = fwd(x, params)
    out = jax.block_until_ready(out)

    assert out.shape == (B, (H // PATCH) * (W // PATCH) + 1, EMBED_DIM)
    assert bool(jnp.all(jnp.isfinite(out)))
    print("KERNEL_OK")
</pallas_src>

<mosaic_0001>
module attributes {stable_mosaic.version = 11 : i64} {
  func.func @_patch_embed_kernel(%arg0: i32, %arg1: memref<32x48xbf16, #tpu.memory_space<vmem>>, %arg2: memref<48x128xbf16, #tpu.memory_space<vmem>>, %arg3: memref<1x128xf32, #tpu.memory_space<vmem>>, %arg4: memref<32x128xf32, #tpu.memory_space<vmem>>) attributes {dimension_semantics = [#tpu.dimension_semantics<parallel>], iteration_bounds = array<i64: 1>, scalar_prefetch = 0 : i64, scratch_operands = 0 : i64, tpu.core_type = #tpu.core_type<tc>, window_params = [{transform_indices = @transform_0, window_bounds = array<i64: 32, 48>}, {pipeline_mode = #tpu.pipeline_mode<synchronous>, transform_indices = @transform_1, window_bounds = array<i64: 48, 128>}, {pipeline_mode = #tpu.pipeline_mode<synchronous>, transform_indices = @transform_2, window_bounds = array<i64: 1, 128>}, {transform_indices = @transform_3, window_bounds = array<i64: 32, 128>}]} {
    %c0 = arith.constant 0 : index
    %c0_0 = arith.constant 0 : index
    %0 = vector.load %arg1[%c0, %c0_0] : memref<32x48xbf16, #tpu.memory_space<vmem>>, vector<32x48xbf16>
    %c0_1 = arith.constant 0 : index
    %c0_2 = arith.constant 0 : index
    %1 = vector.load %arg2[%c0_1, %c0_2] : memref<48x128xbf16, #tpu.memory_space<vmem>>, vector<48x128xbf16>
    %cst = arith.constant dense<0.000000e+00> : vector<32x128xf32>
    %2 = tpu.matmul %0, %1, %cst {dimension_numbers = #tpu.dot_dimension_numbers<[1], [0], [0], [1], [0, 0, 1, 1], [], []>} : vector<32x48xbf16>, vector<48x128xbf16>, vector<32x128xf32> -> vector<32x128xf32>
    %c0_3 = arith.constant 0 : index
    %c0_4 = arith.constant 0 : index
    %3 = vector.load %arg3[%c0_3, %c0_4] : memref<1x128xf32, #tpu.memory_space<vmem>>, vector<1x128xf32>
    %4 = vector.broadcast %3 : vector<1x128xf32> to vector<32x128xf32>
    %5 = arith.addf %2, %4 : vector<32x128xf32>
    %c0_5 = arith.constant 0 : index
    %c0_6 = arith.constant 0 : index
    %6 = vector.load %arg4[%c0_5, %c0_6] : memref<32x128xf32, #tpu.memory_space<vmem>>, vector<32x128xf32>
    tpu.vector_store %arg4[%c0_5, %c0_6], %5 {strides = array<i32>} : memref<32x128xf32, #tpu.memory_space<vmem>>, vector<32x128xf32>,
    return
  }
  func.func @transform_0(%arg0: i32) -> (i32, i32) {
    %c0_i32 = arith.constant 0 : i32
    %c0_i32_0 = arith.constant 0 : i32
    return %arg0, %c0_i32 : i32, i32
  }
  func.func @transform_1(%arg0: i32) -> (i32, i32) {
    %c0_i32 = arith.constant 0 : i32
    %c0_i32_0 = arith.constant 0 : i32
    %c0_i32_1 = arith.constant 0 : i32
    return %c0_i32, %c0_i32_0 : i32, i32
  }
  func.func @transform_2(%arg0: i32) -> (i32, i32) {
    %c0_i32 = arith.constant 0 : i32
    %c0_i32_0 = arith.constant 0 : i32
    %c0_i32_1 = arith.constant 0 : i32
    return %c0_i32, %c0_i32_0 : i32, i32
  }
  func.func @transform_3(%arg0: i32) -> (i32, i32) {
    %c0_i32 = arith.constant 0 : i32
    %c0_i32_0 = arith.constant 0 : i32
    return %arg0, %c0_i32 : i32, i32
  }
}

module attributes {stable_mosaic.version = 11 : i64} {
  func.func @_fused_blocks_kernel(%arg0: i32, %arg1: i32, %arg2: memref<48x128xf32, #tpu.memory_space<vmem>>, %arg3: memref<1x1x128xf32, #tpu.memory_space<vmem>>, %arg4: memref<1x1x128xf32, #tpu.memory_space<vmem>>, %arg5: memref<1x128x384xbf16, #tpu.memory_space<vmem>>, %arg6: memref<1x1x384xf32, #tpu.memory_space<vmem>>, %arg7: memref<1x128x128xbf16, #tpu.memory_space<vmem>>, %arg8: memref<1x1x128xf32, #tpu.memory_space<vmem>>, %arg9: memref<1x1x128xf32, #tpu.memory_space<vmem>>, %arg10: memref<1x1x128xf32, #tpu.memory_space<vmem>>, %arg11: memref<1x128x512xbf16, #tpu.memory_space<vmem>>, %arg12: memref<1x1x512xf32, #tpu.memory_space<vmem>>, %arg13: memref<1x512x128xbf16, #tpu.memory_space<vmem>>, %arg14: memref<1x1x128xf32, #tpu.memory_space<vmem>>, %arg15: memref<1x128xf32, #tpu.memory_space<vmem>>, %arg16: memref<1x128xf32, #tpu.memory_space<vmem>>, %arg17: memref<48x128xf32, #tpu.memory_space<vmem>>) attributes {dimension_semantics = [#tpu.dimension_semantics<parallel>, #tpu.dimension_semantics<arbitrary>], iteration_bounds = array<i64: 1, 2>, scalar_prefetch = 0 : i64, scratch_operands = 0 : i64, tpu.core_type = #tpu.core_type<tc>, window_params = [{transform_indices = @transform_0, window_bounds = array<i64: 48, 128>}, {transform_indices = @transform_1, window_bounds = array<i64: 1, 1, 128>}, {transform_indices = @transform_2, window_bounds = array<i64: 1, 1, 128>}, {transform_indices = @transform_3, window_bounds = array<i64: 1, 128, 384>}, {transform_indices = @transform_4, window_bounds = array<i64: 1, 1, 384>}, {transform_indices = @transform_5, window_bounds = array<i64: 1, 128, 128>}, {transform_indices = @transform_6, window_bounds = array<i64: 1, 1, 128>}, {transform_indices = @transform_7, window_bounds = array<i64: 1, 1, 128>}, {transform_indices = @transform_8, window_bounds = array<i64: 1, 1, 128>}, {transform_indices = @transform_9, window_bounds = array<i64: 1, 128, 512>}, {transform_indices = @transform_10, window_bounds = array<i64: 1, 1, 512>}, {transform_indices = @transform_11, window_bounds = array<i64: 1, 512, 128>}, {transform_indices = @transform_12, window_bounds = array<i64: 1, 1, 128>}, {pipeline_mode = #tpu.pipeline_mode<synchronous>, transform_indices = @transform_13, window_bounds = array<i64: 1, 128>}, {pipeline_mode = #tpu.pipeline_mode<synchronous>, transform_indices = @transform_14, window_bounds = array<i64: 1, 128>}, {transform_indices = @transform_15, window_bounds = array<i64: 48, 128>}]} {
    %c0_i32 = arith.constant 0 : i32
    %0 = arith.cmpi eq, %arg1, %c0_i32 : i32
    %1 = arith.extui %0 : i1 to i32
    %c0_i32_0 = arith.constant 0 : i32
    %2 = arith.cmpi ne, %1, %c0_i32_0 : i32
    scf.if %2 {
      %c0_63 = arith.constant 0 : index
      %c0_64 = arith.constant 0 : index
      %203 = vector.load %arg2[%c0_63, %c0_64] : memref<48x128xf32, #tpu.memory_space<vmem>>, vector<48x128xf32>
      %c0_65 = arith.constant 0 : index
      %c0_66 = arith.constant 0 : index
      %204 = vector.load %arg17[%c0_65, %c0_66] : memref<48x128xf32, #tpu.memory_space<vmem>>, vector<48x128xf32>
      tpu.vector_store %arg17[%c0_65, %c0_66], %203 {strides = array<i32>} : memref<48x128xf32, #tpu.memory_space<vmem>>, vector<48x128xf32>,
    } else {
    }
    %c0 = arith.constant 0 : index
    %c0_1 = arith.constant 0 : index
    %3 = vector.load %arg17[%c0, %c0_1] : memref<48x128xf32, #tpu.memory_space<vmem>>, vector<48x128xf32>
    %c0_2 = arith.constant 0 : index
    %c0_3 = arith.constant 0 : index
    %c0_4 = arith.constant 0 : index
    %4 = vector.load %arg3[%c0_2, %c0_3, %c0_4] : memref<1x1x128xf32, #tpu.memory_space<vmem>>, vector<1x1x128xf32>
    %5 = vector.shape_cast %4 : vector<1x1x128xf32> to vector<1x128xf32>
    %c0_5 = arith.constant 0 : index
    %c0_6 = arith.constant 0 : index
    %c0_7 = arith.constant 0 : index
    %6 = vector.load %arg4[%c0_5, %c0_6, %c0_7] : memref<1x1x128xf32, #tpu.memory_space<vmem>>, vector<1x1x128xf32>
    %7 = vector.shape_cast %6 : vector<1x1x128xf32> to vector<1x128xf32>
    %cst = arith.constant dense<0.000000e+00> : vector<48xf32>
    %8 = vector.multi_reduction <add>, %3, %cst [1] : vector<48x128xf32> to vector<48xf32>
    %9 = vector.shape_cast %8 : vector<48xf32> to vector<48x1xf32>
    %cst_8 = arith.constant 1.280000e+02 : f32
    %10 = vector.broadcast %cst_8 : f32 to vector<48x1xf32>
    %11 = arith.divf %9, %10 : vector<48x1xf32>
    %12 = vector.broadcast %11 : vector<48x1xf32> to vector<48x128xf32>
    %13 = arith.subf %3, %12 : vector<48x128xf32>
    %14 = arith.mulf %13, %13 : vector<48x128xf32>
    %cst_9 = arith.constant dense<0.000000e+00> : vector<48xf32>
    %15 = vector.multi_reduction <add>, %14, %cst_9 [1] : vector<48x128xf32> to vector<48xf32>
    %16 = vector.shape_cast %15 : vector<48xf32> to vector<48x1xf32>
    %cst_10 = arith.constant 1.280000e+02 : f32
    %17 = vector.broadcast %cst_10 : f32 to vector<48x1xf32>
    %18 = arith.divf %16, %17 : vector<48x1xf32>
    %19 = vector.broadcast %11 : vector<48x1xf32> to vector<48x128xf32>
    %20 = arith.subf %3, %19 : vector<48x128xf32>
    %cst_11 = arith.constant 9.99999974E-6 : f32
    %21 = vector.broadcast %cst_11 : f32 to vector<48x1xf32>
    %22 = arith.addf %18, %21 : vector<48x1xf32>
    %23 = math.rsqrt %22 : vector<48x1xf32>
    %24 = vector.broadcast %23 : vector<48x1xf32> to vector<48x128xf32>
    %25 = arith.mulf %20, %24 : vector<48x128xf32>
    %26 = vector.broadcast %5 : vector<1x128xf32> to vector<48x128xf32>
    %27 = arith.mulf %25, %26 : vector<48x128xf32>
    %28 = vector.broadcast %7 : vector<1x128xf32> to vector<48x128xf32>
    %29 = arith.addf %27, %28 : vector<48x128xf32>
    %30 = arith.truncf %29 : vector<48x128xf32> to vector<48x128xbf16>
    %c0_12 = arith.constant 0 : index
    %c0_13 = arith.constant 0 : index
    %c0_14 = arith.constant 0 : index
    %31 = vector.load %arg5[%c0_12, %c0_13, %c0_14] : memref<1x128x384xbf16, #tpu.memory_space<vmem>>, vector<1x128x384xbf16>
    %32 = vector.shape_cast %31 : vector<1x128x384xbf16> to vector<128x384xbf16>
    %cst_15 = arith.constant dense<0.000000e+00> : vector<48x384xf32>
    %33 = tpu.matmul %30, %32, %cst_15 {dimension_numbers = #tpu.dot_dimension_numbers<[1], [0], [0], [1], [0, 0, 1, 1], [], []>} : vector<48x128xbf16>, vector<128x384xbf16>, vector<48x384xf32> -> vector<48x384xf32>
    %c0_16 = arith.constant 0 : index
    %c0_17 = arith.constant 0 : index
    %c0_18 = arith.constant 0 : index
    %34 = vector.load %arg6[%c0_16, %c0_17, %c0_18] : memref<1x1x384xf32, #tpu.memory_space<vmem>>, vector<1x1x384xf32>
    %35 = vector.shape_cast %34 : vector<1x1x384xf32> to vector<1x384xf32>
    %36 = vector.broadcast %35 : vector<1x384xf32> to vector<48x384xf32>
    %37 = arith.addf %33, %36 : vector<48x384xf32>
    %38 = vector.extract_strided_slice %37 {offsets = [0, 0], sizes = [24, 32], strides = [1, 1]} : vector<48x384xf32> to vector<24x32xf32>
    %39 = vector.extract_strided_slice %37 {offsets = [0, 32], sizes = [24, 32], strides = [1, 1]} : vector<48x384xf32> to vector<24x32xf32>
    %40 = vector.extract_strided_slice %37 {offsets = [0, 64], sizes = [24, 32], strides = [1, 1]} : vector<48x384xf32> to vector<24x32xf32>
    %41 = vector.extract_strided_slice %37 {offsets = [0, 96], sizes = [24, 32], strides = [1, 1]} : vector<48x384xf32> to vector<24x32xf32>
    %42 = vector.extract_strided_slice %37 {offsets = [24, 0], sizes = [24, 32], strides = [1, 1]} : vector<48x384xf32> to vector<24x32xf32>
    %43 = vector.extract_strided_slice %37 {offsets = [24, 32], sizes = [24, 32], strides = [1, 1]} : vector<48x384xf32> to vector<24x32xf32>
    %44 = vector.extract_strided_slice %37 {offsets = [24, 64], sizes = [24, 32], strides = [1, 1]} : vector<48x384xf32> to vector<24x32xf32>
    %45 = vector.extract_strided_slice %37 {offsets = [24, 96], sizes = [24, 32], strides = [1, 1]} : vector<48x384xf32> to vector<24x32xf32>
    %46 = vector.shape_cast %38 : vector<24x32xf32> to vector<1x24x32xf32>
    %47 = vector.shape_cast %39 : vector<24x32xf32> to vector<1x24x32xf32>
    %48 = vector.shape_cast %40 : vector<24x32xf32> to vector<1x24x32xf32>
    %49 = vector.shape_cast %41 : vector<24x32xf32> to vector<1x24x32xf32>
    %50 = vector.shape_cast %42 : vector<24x32xf32> to vector<1x24x32xf32>
    %51 = vector.shape_cast %43 : vector<24x32xf32> to vector<1x24x32xf32>
    %52 = vector.shape_cast %44 : vector<24x32xf32> to vector<1x24x32xf32>
    %53 = vector.shape_cast %45 : vector<24x32xf32> to vector<1x24x32xf32>
    %54 = tpu.concatenate %46, %47, %48, %49, %50, %51, %52, %53 in 0 : vector<1x24x32xf32>, vector<1x24x32xf32>, vector<1x24x32xf32>, vector<1x24x32xf32>, vector<1x24x32xf32>, vector<1x24x32xf32>, vector<1x24x32xf32>, vector<1x24x32xf32> -> vector<8x24x32xf32>
    %55 = arith.truncf %54 : vector<8x24x32xf32> to vector<8x24x32xbf16>
    %56 = vector.extract_strided_slice %37 {offsets = [0, 128], sizes = [24, 32], strides = [1, 1]} : vector<48x384xf32> to vector<24x32xf32>
    %57 = vector.extract_strided_slice %37 {offsets = [0, 160], sizes = [24, 32], strides = [1, 1]} : vector<48x384xf32> to vector<24x32xf32>
    %58 = vector.extract_strided_slice %37 {offsets = [0, 192], sizes = [24, 32], strides = [1, 1]} : vector<48x384xf32> to vector<24x32xf32>
    %59 = vector.extract_strided_slice %37 {offsets = [0, 224], sizes = [24, 32], strides = [1, 1]} : vector<48x384xf32> to vector<24x32xf32>
    %60 = vector.extract_strided_slice %37 {offsets = [24, 128], sizes = [24, 32], strides = [1, 1]} : vector<48x384xf32> to vector<24x32xf32>
    %61 = vector.extract_strided_slice %37 {offsets = [24, 160], sizes = [24, 32], strides = [1, 1]} : vector<48x384xf32> to vector<24x32xf32>
    %62 = vector.extract_strided_slice %37 {offsets = [24, 192], sizes = [24, 32], strides = [1, 1]} : vector<48x384xf32> to vector<24x32xf32>
    %63 = vector.extract_strided_slice %37 {offsets = [24, 224], sizes = [24, 32], strides = [1, 1]} : vector<48x384xf32> to vector<24x32xf32>
    %64 = vector.shape_cast %56 : vector<24x32xf32> to vector<1x24x32xf32>
    %65 = vector.shape_cast %57 : vector<24x32xf32> to vector<1x24x32xf32>
    %66 = vector.shape_cast %58 : vector<24x32xf32> to vector<1x24x32xf32>
    %67 = vector.shape_cast %59 : vector<24x32xf32> to vector<1x24x32xf32>
    %68 = vector.shape_cast %60 : vector<24x32xf32> to vector<1x24x32xf32>
    %69 = vector.shape_cast %61 : vector<24x32xf32> to vector<1x24x32xf32>
    %70 = vector.shape_cast %62 : vector<24x32xf32> to vector<1x24x32xf32>
    %71 = vector.shape_cast %63 : vector<24x32xf32> to vector<1x24x32xf32>
    %72 = tpu.concatenate %64, %65, %66, %67, %68, %69, %70, %71 in 0 : vector<1x24x32xf32>, vector<1x24x32xf32>, vector<1x24x32xf32>, vector<1x24x32xf32>, vector<1x24x32xf32>, vector<1x24x32xf32>, vector<1x24x32xf32>, vector<1x24x32xf32> -> vector<8x24x32xf32>
    %73 = arith.truncf %72 : vector<8x24x32xf32> to vector<8x24x32xbf16>
    %74 = vector.extract_strided_slice %37 {offsets = [0, 256], sizes = [24, 32], strides = [1, 1]} : vector<48x384xf32> to vector<24x32xf32>
    %75 = vector.extract_strided_slice %37 {offsets = [0, 288], sizes = [24, 32], strides = [1, 1]} : vector<48x384xf32> to vector<24x32xf32>
    %76 = vector.extract_strided_slice %37 {offsets = [0, 320], sizes = [24, 32], strides = [1, 1]} : vector<48x384xf32> to vector<24x32xf32>
    %77 = vector.extract_strided_slice %37 {offsets = [0, 352], sizes = [24, 32], strides = [1, 1]} : vector<48x384xf32> to vector<24x32xf32>
    %78 = vector.extract_strided_slice %37 {offsets = [24, 256], sizes = [24, 32], strides = [1, 1]} : vector<48x384xf32> to vector<24x32xf32>
    %79 = vector.extract_strided_slice %37 {offsets = [24, 288], sizes = [24, 32], strides = [1, 1]} : vector<48x384xf32> to vector<24x32xf32>
    %80 = vector.extract_strided_slice %37 {offsets = [24, 320], sizes = [24, 32], strides = [1, 1]} : vector<48x384xf32> to vector<24x32xf32>
    %81 = vector.extract_strided_slice %37 {offsets = [24, 352], sizes = [24, 32], strides = [1, 1]} : vector<48x384xf32> to vector<24x32xf32>
    %82 = vector.shape_cast %74 : vector<24x32xf32> to vector<1x24x32xf32>
    %83 = vector.shape_cast %75 : vector<24x32xf32> to vector<1x24x32xf32>
    %84 = vector.shape_cast %76 : vector<24x32xf32> to vector<1x24x32xf32>
    %85 = vector.shape_cast %77 : vector<24x32xf32> to vector<1x24x32xf32>
    %86 = vector.shape_cast %78 : vector<24x32xf32> to vector<1x24x32xf32>
    %87 = vector.shape_cast %79 : vector<24x32xf32> to vector<1x24x32xf32>
    %88 = vector.shape_cast %80 : vector<24x32xf32> to vector<1x24x32xf32>
    %89 = vector.shape_cast %81 : vector<24x32xf32> to vector<1x24x32xf32>
    %90 = tpu.concatenate %82, %83, %84, %85, %86, %87, %88, %89 in 0 : vector<1x24x32xf32>, vector<1x24x32xf32>, vector<1x24x32xf32>, vector<1x24x32xf32>, vector<1x24x32xf32>, vector<1x24x32xf32>, vector<1x24x32xf32>, vector<1x24x32xf32> -> vector<8x24x32xf32>
    %91 = arith.truncf %90 : vector<8x24x32xf32> to vector<8x24x32xbf16>
    %cst_19 = arith.constant dense<0.000000e+00> : vector<8x24x24xf32>
    %92 = tpu.matmul %55, %73, %cst_19 {dimension_numbers = #tpu.dot_dimension_numbers<[2], [2], [1], [1], [0, 0, 0, 1, 1, 1], [0], [0]>} : vector<8x24x32xbf16>, vector<8x24x32xbf16>, vector<8x24x24xf32> -> vector<8x24x24xf32>
    %93 = tpu.iota {dimensions = array<i32: 0>} : vector<24x24xi32>
    %94 = tpu.iota {dimensions = array<i32: 1>} : vector<24x24xi32>
    %95 = arith.cmpi sge, %93, %94 : vector<24x24xi32>
    %96 = vector.shape_cast %95 : vector<24x24xi1> to vector<1x24x24xi1>
    %cst_20 = arith.constant -1.000000e+30 : f32
    %97 = vector.shape_cast %96 : vector<1x24x24xi1> to vector<1x24x24xi1>
    %98 = vector.broadcast %97 : vector<1x24x24xi1> to vector<8x24x24xi1>
    %99 = vector.broadcast %cst_20 : f32 to vector<8x24x24xf32>
    %100 = arith.select %98, %92, %99 : vector<8x24x24xi1>, vector<8x24x24xf32>
    %cst_21 = arith.constant dense<0xFF800000> : vector<8x24xf32>
    %101 = vector.multi_reduction <maximumf>, %100, %cst_21 [2] : vector<8x24x24xf32> to vector<8x24xf32>
    %102 = vector.shape_cast %101 : vector<8x24xf32> to vector<8x24x1xf32>
    %103 = vector.broadcast %102 : vector<8x24x1xf32> to vector<8x24x24xf32>
    %104 = arith.subf %100, %103 : vector<8x24x24xf32>
    %105 = math.exp %104 : vector<8x24x24xf32>
    %cst_22 = arith.constant dense<0.000000e+00> : vector<8x24xf32>
    %106 = vector.multi_reduction <add>, %105, %cst_22 [2] : vector<8x24x24xf32> to vector<8x24xf32>
    %107 = vector.shape_cast %106 : vector<8x24xf32> to vector<8x24x1xf32>
    %108 = tpu.reciprocal %107 {approx = true} : vector<8x24x1xf32> -> vector<8x24x1xf32>
    %109 = vector.broadcast %108 : vector<8x24x1xf32> to vector<8x24x24xf32>
    %110 = arith.mulf %105, %109 : vector<8x24x24xf32>
    %111 = arith.truncf %110 : vector<8x24x24xf32> to vector<8x24x24xbf16>
    %cst_23 = arith.constant dense<0.000000e+00> : vector<8x24x32xf32>
    %112 = tpu.matmul %111, %91, %cst_23 {dimension_numbers = #tpu.dot_dimension_numbers<[2], [1], [1], [2], [0, 0, 0, 1, 1, 2], [0], [0]>} : vector<8x24x24xbf16>, vector<8x24x32xbf16>, vector<8x24x32xf32> -> vector<8x24x32xf32>
    %113 = arith.truncf %112 : vector<8x24x32xf32> to vector<8x24x32xbf16>
    %114 = vector.extract_strided_slice %113 {offsets = [0, 0, 0], sizes = [1, 24, 32], strides = [1, 1, 1]} : vector<8x24x32xbf16> to vector<1x24x32xbf16>
    %115 = vector.shape_cast %114 : vector<1x24x32xbf16> to vector<24x32xbf16>
    %116 = vector.extract_strided_slice %113 {offsets = [1, 0, 0], sizes = [1, 24, 32], strides = [1, 1, 1]} : vector<8x24x32xbf16> to vector<1x24x32xbf16>
    %117 = vector.shape_cast %116 : vector<1x24x32xbf16> to vector<24x32xbf16>
    %118 = vector.extract_strided_slice %113 {offsets = [2, 0, 0], sizes = [1, 24, 32], strides = [1, 1, 1]} : vector<8x24x32xbf16> to vector<1x24x32xbf16>
    %119 = vector.shape_cast %118 : vector<1x24x32xbf16> to vector<24x32xbf16>
    %120 = vector.extract_strided_slice %113 {offsets = [3, 0, 0], sizes = [1, 24, 32], strides = [1, 1, 1]} : vector<8x24x32xbf16> to vector<1x24x32xbf16>
    %121 = vector.shape_cast %120 : vector<1x24x32xbf16> to vector<24x32xbf16>
    %122 = tpu.concatenate %115, %117, %119, %121 in 1 : vector<24x32xbf16>, vector<24x32xbf16>, vector<24x32xbf16>, vector<24x32xbf16> -> vector<24x128xbf16>
    %123 = vector.extract_strided_slice %113 {offsets = [4, 0, 0], sizes = [1, 24, 32], strides = [1, 1, 1]} : vector<8x24x32xbf16> to vector<1x24x32xbf16>
    %124 = vector.shape_cast %123 : vector<1x24x32xbf16> to vector<24x32xbf16>
    %125 = vector.extract_strided_slice %113 {offsets = [5, 0, 0], sizes = [1, 24, 32], strides = [1, 1, 1]} : vector<8x24x32xbf16> to vector<1x24x32xbf16>
    %126 = vector.shape_cast %125 : vector<1x24x32xbf16> to vector<24x32xbf16>
    %127 = vector.extract_strided_slice %113 {offsets = [6, 0, 0], sizes = [1, 24, 32], strides = [1, 1, 1]} : vector<8x24x32xbf16> to vector<1x24x32xbf16>
    %128 = vector.shape_cast %127 : vector<1x24x32xbf16> to vector<24x32xbf16>
    %129 = vector.extract_strided_slice %113 {offsets = [7, 0, 0], sizes = [1, 24, 32], strides = [1, 1, 1]} : vector<8x24x32xbf16> to vector<1x24x32xbf16>
    %130 = vector.shape_cast %129 : vector<1x24x32xbf16> to vector<24x32xbf16>
    %131 = tpu.concatenate %124, %126, %128, %130 in 1 : vector<24x32xbf16>, vector<24x32xbf16>, vector<24x32xbf16>, vector<24x32xbf16> -> vector<24x128xbf16>
    %132 = tpu.concatenate %122, %131 in 0 : vector<24x128xbf16>, vector<24x128xbf16> -> vector<48x128xbf16>
    %c0_24 = arith.constant 0 : index
    %c0_25 = arith.constant 0 : index
    %c0_26 = arith.constant 0 : index
    %133 = vector.load %arg7[%c0_24, %c0_25, %c0_26] : memref<1x128x128xbf16, #tpu.memory_space<vmem>>, vector<1x128x128xbf16>
    %134 = vector.shape_cast %133 : vector<1x128x128xbf16> to vector<128x128xbf16>
    %cst_27 = arith.constant dense<0.000000e+00> : vector<48x128xf32>
    %135 = tpu.matmul %132, %134, %cst_27 {dimension_numbers = #tpu.dot_dimension_numbers<[1], [0], [0], [1], [0, 0, 1, 1], [], []>} : vector<48x128xbf16>, vector<128x128xbf16>, vector<48x128xf32> -> vector<48x128xf32>
    %c0_28 = arith.constant 0 : index
    %c0_29 = arith.constant 0 : index
    %c0_30 = arith.constant 0 : index
    %136 = vector.load %arg8[%c0_28, %c0_29, %c0_30] : memref<1x1x128xf32, #tpu.memory_space<vmem>>, vector<1x1x128xf32>
    %137 = vector.shape_cast %136 : vector<1x1x128xf32> to vector<1x128xf32>
    %138 = vector.broadcast %137 : vector<1x128xf32> to vector<48x128xf32>
    %139 = arith.addf %135, %138 : vector<48x128xf32>
    %140 = arith.addf %3, %139 : vector<48x128xf32>
    %c0_31 = arith.constant 0 : index
    %c0_32 = arith.constant 0 : index
    %c0_33 = arith.constant 0 : index
    %141 = vector.load %arg9[%c0_31, %c0_32, %c0_33] : memref<1x1x128xf32, #tpu.memory_space<vmem>>, vector<1x1x128xf32>
    %142 = vector.shape_cast %141 : vector<1x1x128xf32> to vector<1x128xf32>
    %c0_34 = arith.constant 0 : index
    %c0_35 = arith.constant 0 : index
    %c0_36 = arith.constant 0 : index
    %143 = vector.load %arg10[%c0_34, %c0_35, %c0_36] : memref<1x1x128xf32, #tpu.memory_space<vmem>>, vector<1x1x128xf32>
    %144 = vector.shape_cast %143 : vector<1x1x128xf32> to vector<1x128xf32>
    %cst_37 = arith.constant dense<0.000000e+00> : vector<48xf32>
    %145 = vector.multi_reduction <add>, %140, %cst_37 [1] : vector<48x128xf32> to vector<48xf32>
    %146 = vector.shape_cast %145 : vector<48xf32> to vector<48x1xf32>
    %cst_38 = arith.constant 1.280000e+02 : f32
    %147 = vector.broadcast %cst_38 : f32 to vector<48x1xf32>
    %148 = arith.divf %146, %147 : vector<48x1xf32>
    %149 = vector.broadcast %148 : vector<48x1xf32> to vector<48x128xf32>
    %150 = arith.subf %140, %149 : vector<48x128xf32>
    %151 = arith.mulf %150, %150 : vector<48x128xf32>
    %cst_39 = arith.constant dense<0.000000e+00> : vector<48xf32>
    %152 = vector.multi_reduction <add>, %151, %cst_39 [1] : vector<48x128xf32> to vector<48xf32>
    %153 = vector.shape_cast %152 : vector<48xf32> to vector<48x1xf32>
    %cst_40 = arith.constant 1.280000e+02 : f32
    %154 = vector.broadcast %cst_40 : f32 to vector<48x1xf32>
    %155 = arith.divf %153, %154 : vector<48x1xf32>
    %156 = vector.broadcast %148 : vector<48x1xf32> to vector<48x128xf32>
    %157 = arith.subf %140, %156 : vector<48x128xf32>
    %cst_41 = arith.constant 9.99999974E-6 : f32
    %158 = vector.broadcast %cst_41 : f32 to vector<48x1xf32>
    %159 = arith.addf %155, %158 : vector<48x1xf32>
    %160 = math.rsqrt %159 : vector<48x1xf32>
    %161 = vector.broadcast %160 : vector<48x1xf32> to vector<48x128xf32>
    %162 = arith.mulf %157, %161 : vector<48x128xf32>
    %163 = vector.broadcast %142 : vector<1x128xf32> to vector<48x128xf32>
    %164 = arith.mulf %162, %163 : vector<48x128xf32>
    %165 = vector.broadcast %144 : vector<1x128xf32> to vector<48x128xf32>
    %166 = arith.addf %164, %165 : vector<48x128xf32>
    %167 = arith.truncf %166 : vector<48x128xf32> to vector<48x128xbf16>
    %c0_42 = arith.constant 0 : index
    %c0_43 = arith.constant 0 : index
    %c0_44 = arith.constant 0 : index
    %168 = vector.load %arg11[%c0_42, %c0_43, %c0_44] : memref<1x128x512xbf16, #tpu.memory_space<vmem>>, vector<1x128x512xbf16>
    %169 = vector.shape_cast %168 : vector<1x128x512xbf16> to vector<128x512xbf16>
    %cst_45 = arith.constant dense<0.000000e+00> : vector<48x512xf32>
    %170 = tpu.matmul %167, %169, %cst_45 {dimension_numbers = #tpu.dot_dimension_numbers<[1], [0], [0], [1], [0, 0, 1, 1], [], []>} : vector<48x128xbf16>, vector<128x512xbf16>, vector<48x512xf32> -> vector<48x512xf32>
    %c0_46 = arith.constant 0 : index
    %c0_47 = arith.constant 0 : index
    %c0_48 = arith.constant 0 : index
    %171 = vector.load %arg12[%c0_46, %c0_47, %c0_48] : memref<1x1x512xf32, #tpu.memory_space<vmem>>, vector<1x1x512xf32>
    %172 = vector.shape_cast %171 : vector<1x1x512xf32> to vector<1x512xf32>
    %173 = vector.broadcast %172 : vector<1x512xf32> to vector<48x512xf32>
    %174 = arith.addf %170, %173 : vector<48x512xf32>
    %175 = arith.mulf %174, %174 : vector<48x512xf32>
    %176 = arith.mulf %174, %175 : vector<48x512xf32>
    %cst_49 = arith.constant 4.471500e-02 : f32
    %177 = vector.broadcast %cst_49 : f32 to vector<48x512xf32>
    %178 = arith.mulf %177, %176 : vector<48x512xf32>
    %179 = arith.addf %174, %178 : vector<48x512xf32>
    %cst_50 = arith.constant 0.797884583 : f32
    %180 = vector.broadcast %cst_50 : f32 to vector<48x512xf32>
    %181 = arith.mulf %180, %179 : vector<48x512xf32>
    %182 = math.tanh %181 : vector<48x512xf32>
    %cst_51 = arith.constant 1.000000e+00 : f32
    %183 = vector.broadcast %cst_51 : f32 to vector<48x512xf32>
    %184 = arith.addf %183, %182 : vector<48x512xf32>
    %cst_52 = arith.constant 5.000000e-01 : f32
    %185 = vector.broadcast %cst_52 : f32 to vector<48x512xf32>
    %186 = arith.mulf %185, %184 : vector<48x512xf32>
    %187 = arith.mulf %174, %186 : vector<48x512xf32>
    %188 = arith.truncf %187 : vector<48x512xf32> to vector<48x512xbf16>
    %c0_53 = arith.constant 0 : index
    %c0_54 = arith.constant 0 : index
    %c0_55 = arith.constant 0 : index
    %189 = vector.load %arg13[%c0_53, %c0_54, %c0_55] : memref<1x512x128xbf16, #tpu.memory_space<vmem>>, vector<1x512x128xbf16>
    %190 = vector.shape_cast %189 : vector<1x512x128xbf16> to vector<512x128xbf16>
    %cst_56 = arith.constant dense<0.000000e+00> : vector<48x128xf32>
    %191 = tpu.matmul %188, %190, %cst_56 {dimension_numbers = #tpu.dot_dimension_numbers<[1], [0], [0], [1], [0, 0, 1, 1], [], []>} : vector<48x512xbf16>, vector<512x128xbf16>, vector<48x128xf32> -> vector<48x128xf32>
    %c0_57 = arith.constant 0 : index
    %c0_58 = arith.constant 0 : index
    %c0_59 = arith.constant 0 : index
    %192 = vector.load %arg14[%c0_57, %c0_58, %c0_59] : memref<1x1x128xf32, #tpu.memory_space<vmem>>, vector<1x1x128xf32>
    %193 = vector.shape_cast %192 : vector<1x1x128xf32> to vector<1x128xf32>
    %194 = vector.broadcast %193 : vector<1x128xf32> to vector<48x128xf32>
    %195 = arith.addf %191, %194 : vector<48x128xf32>
    %196 = arith.addf %140, %195 : vector<48x128xf32>
    %c1_i32 = arith.constant 1 : i32
    %197 = arith.cmpi slt, %arg1, %c1_i32 : i32
    %198 = arith.extui %197 : i1 to i32
    %c0_i32_60 = arith.constant 0 : i32
    %199 = arith.cmpi ne, %198, %c0_i32_60 : i32
    scf.if %199 {
      %c0_63 = arith.constant 0 : index
      %c0_64 = arith.constant 0 : index
      %203 = vector.load %arg17[%c0_63, %c0_64] : memref<48x128xf32, #tpu.memory_space<vmem>>, vector<48x128xf32>
      tpu.vector_store %arg17[%c0_63, %c0_64], %196 {strides = array<i32>} : memref<48x128xf32, #tpu.memory_space<vmem>>, vector<48x128xf32>,
    } else {
    }
    %c1_i32_61 = arith.constant 1 : i32
    %200 = arith.cmpi eq, %arg1, %c1_i32_61 : i32
    %201 = arith.extui %200 : i1 to i32
    %c0_i32_62 = arith.constant 0 : i32
    %202 = arith.cmpi ne, %201, %c0_i32_62 : i32
    scf.if %202 {
      %c0_63 = arith.constant 0 : index
      %c0_64 = arith.constant 0 : index
      %203 = vector.load %arg15[%c0_63, %c0_64] : memref<1x128xf32, #tpu.memory_space<vmem>>, vector<1x128xf32>
      %c0_65 = arith.constant 0 : index
      %c0_66 = arith.constant 0 : index
      %204 = vector.load %arg16[%c0_65, %c0_66] : memref<1x128xf32, #tpu.memory_space<vmem>>, vector<1x128xf32>
      %cst_67 = arith.constant dense<0.000000e+00> : vector<48xf32>
      %205 = vector.multi_reduction <add>, %196, %cst_67 [1] : vector<48x128xf32> to vector<48xf32>
      %206 = vector.shape_cast %205 : vector<48xf32> to vector<48x1xf32>
      %cst_68 = arith.constant 1.280000e+02 : f32
      %207 = vector.broadcast %cst_68 : f32 to vector<48x1xf32>
      %208 = arith.divf %206, %207 : vector<48x1xf32>
      %209 = vector.broadcast %208 : vector<48x1xf32> to vector<48x128xf32>
      %210 = arith.subf %196, %209 : vector<48x128xf32>
      %211 = arith.mulf %210, %210 : vector<48x128xf32>
      %cst_69 = arith.constant dense<0.000000e+00> : vector<48xf32>
      %212 = vector.multi_reduction <add>, %211, %cst_69 [1] : vector<48x128xf32> to vector<48xf32>
      %213 = vector.shape_cast %212 : vector<48xf32> to vector<48x1xf32>
      %cst_70 = arith.constant 1.280000e+02 : f32
      %214 = vector.broadcast %cst_70 : f32 to vector<48x1xf32>
      %215 = arith.divf %213, %214 : vector<48x1xf32>
      %216 = vector.broadcast %208 : vector<48x1xf32> to vector<48x128xf32>
      %217 = arith.subf %196, %216 : vector<48x128xf32>
      %cst_71 = arith.constant 9.99999974E-6 : f32
      %218 = vector.broadcast %cst_71 : f32 to vector<48x1xf32>
      %219 = arith.addf %215, %218 : vector<48x1xf32>
      %220 = math.rsqrt %219 : vector<48x1xf32>
      %221 = vector.broadcast %220 : vector<48x1xf32> to vector<48x128xf32>
      %222 = arith.mulf %217, %221 : vector<48x128xf32>
      %223 = vector.broadcast %203 : vector<1x128xf32> to vector<48x128xf32>
      %224 = arith.mulf %222, %223 : vector<48x128xf32>
      %225 = vector.broadcast %204 : vector<1x128xf32> to vector<48x128xf32>
      %226 = arith.addf %224, %225 : vector<48x128xf32>
      %c0_72 = arith.constant 0 : index
      %c0_73 = arith.constant 0 : index
      %227 = vector.load %arg17[%c0_72, %c0_73] : memref<48x128xf32, #tpu.memory_space<vmem>>, vector<48x128xf32>
      tpu.vector_store %arg17[%c0_72, %c0_73], %226 {strides = array<i32>} : memref<48x128xf32, #tpu.memory_space<vmem>>, vector<48x128xf32>,
    } else {
    }
    return
  }
  func.func @transform_0(%arg0: i32, %arg1: i32) -> (i32, i32) {
    %c0_i32 = arith.constant 0 : i32
    %c0_i32_0 = arith.constant 0 : i32
    return %arg0, %c0_i32 : i32, i32
  }
  func.func @transform_1(%arg0: i32, %arg1: i32) -> (i32, i32, i32) {
    %c0_i32 = arith.constant 0 : i32
    %c0_i32_0 = arith.constant 0 : i32
    %c0_i32_1 = arith.constant 0 : i32
    return %arg1, %c0_i32, %c0_i32_0 : i32, i32, i32
  }
  func.func @transform_2(%arg0: i32, %arg1: i32) -> (i32, i32, i32) {
    %c0_i32 = arith.constant 0 : i32
    %c0_i32_0 = arith.constant 0 : i32
    %c0_i32_1 = arith.constant 0 : i32
    return %arg1, %c0_i32, %c0_i32_0 : i32, i32, i32
  }
  func.func @transform_3(%arg0: i32, %arg1: i32) -> (i32, i32, i32) {
    %c0_i32 = arith.constant 0 : i32
    %c0_i32_0 = arith.constant 0 : i32
    %c0_i32_1 = arith.constant 0 : i32
    return %arg1, %c0_i32, %c0_i32_0 : i32, i32, i32
  }
  func.func @transform_4(%arg0: i32, %arg1: i32) -> (i32, i32, i32) {
    %c0_i32 = arith.constant 0 : i32
    %c0_i32_0 = arith.constant 0 : i32
    %c0_i32_1 = arith.constant 0 : i32
    return %arg1, %c0_i32, %c0_i32_0 : i32, i32, i32
  }
  func.func @transform_5(%arg0: i32, %arg1: i32) -> (i32, i32, i32) {
    %c0_i32 = arith.constant 0 : i32
    %c0_i32_0 = arith.constant 0 : i32
    %c0_i32_1 = arith.constant 0 : i32
    return %arg1, %c0_i32, %c0_i32_0 : i32, i32, i32
  }
  func.func @transform_6(%arg0: i32, %arg1: i32) -> (i32, i32, i32) {
    %c0_i32 = arith.constant 0 : i32
    %c0_i32_0 = arith.constant 0 : i32
    %c0_i32_1 = arith.constant 0 : i32
    return %arg1, %c0_i32, %c0_i32_0 : i32, i32, i32
  }
  func.func @transform_7(%arg0: i32, %arg1: i32) -> (i32, i32, i32) {
    %c0_i32 = arith.constant 0 : i32
    %c0_i32_0 = arith.constant 0 : i32
    %c0_i32_1 = arith.constant 0 : i32
    return %arg1, %c0_i32, %c0_i32_0 : i32, i32, i32
  }
  func.func @transform_8(%arg0: i32, %arg1: i32) -> (i32, i32, i32) {
    %c0_i32 = arith.constant 0 : i32
    %c0_i32_0 = arith.constant 0 : i32
    %c0_i32_1 = arith.constant 0 : i32
    return %arg1, %c0_i32, %c0_i32_0 : i32, i32, i32
  }
  func.func @transform_9(%arg0: i32, %arg1: i32) -> (i32, i32, i32) {
    %c0_i32 = arith.constant 0 : i32
    %c0_i32_0 = arith.constant 0 : i32
    %c0_i32_1 = arith.constant 0 : i32
    return %arg1, %c0_i32, %c0_i32_0 : i32, i32, i32
  }
  func.func @transform_10(%arg0: i32, %arg1: i32) -> (i32, i32, i32) {
    %c0_i32 = arith.constant 0 : i32
    %c0_i32_0 = arith.constant 0 : i32
    %c0_i32_1 = arith.constant 0 : i32
    return %arg1, %c0_i32, %c0_i32_0 : i32, i32, i32
  }
  func.func @transform_11(%arg0: i32, %arg1: i32) -> (i32, i32, i32) {
    %c0_i32 = arith.constant 0 : i32
    %c0_i32_0 = arith.constant 0 : i32
    %c0_i32_1 = arith.constant 0 : i32
    return %arg1, %c0_i32, %c0_i32_0 : i32, i32, i32
  }
  func.func @transform_12(%arg0: i32, %arg1: i32) -> (i32, i32, i32) {
    %c0_i32 = arith.constant 0 : i32
    %c0_i32_0 = arith.constant 0 : i32
    %c0_i32_1 = arith.constant 0 : i32
    return %arg1, %c0_i32, %c0_i32_0 : i32, i32, i32
  }
  func.func @transform_13(%arg0: i32, %arg1: i32) -> (i32, i32) {
    %c0_i32 = arith.constant 0 : i32
    %c0_i32_0 = arith.constant 0 : i32
    %c0_i32_1 = arith.constant 0 : i32
    return %c0_i32, %c0_i32_0 : i32, i32
  }
  func.func @transform_14(%arg0: i32, %arg1: i32) -> (i32, i32) {
    %c0_i32 = arith.constant 0 : i32
    %c0_i32_0 = arith.constant 0 : i32
    %c0_i32_1 = arith.constant 0 : i32
    return %c0_i32, %c0_i32_0 : i32, i32
  }
  func.func @transform_15(%arg0: i32, %arg1: i32) -> (i32, i32) {
    %c0_i32 = arith.constant 0 : i32
    %c0_i32_0 = arith.constant 0 : i32
    return %arg0, %c0_i32 : i32, i32
  }
}

</mosaic_0001>

<bundles_post_ra>
// kernel: cgpt2_forward.2
= control target key start
LH: loop header
LB: loop body
LE: loop exit
PB: predicated region body
PF: predicated region fallthrough
CT: control target
= control target key end

     0   :  { %vm60_vm0 = vcmask 392192   ;;  %s202_s1 = inlined_call_operand.vmem [shape: bf16[48,128], index: 1, kind: input, shape index: {}]   ;;  %s203_s0 = inlined_call_operand.vmem [shape: bf16[32,48], index: 0, kind: input, shape index: {}]   ;;  %s204_s2 = inlined_call_operand.vmem [shape: f32[1,128], index: 2, kind: input, shape index: {}]   ;;  %s205_s3 = inlined_call_operand.vmem [shape: f32[32,128], index: 3, kind: output, shape index: {}]  }
   0x1   :  { %v147_v0 = vld [vmem:[%s202_s1] sm:$0xff]   ;;  %v148_v1 = vld [vmem:[%s202_s1 + $0x8] sm:$0xff]   ;;  %v149_v3 = vld [vmem:[%s202_s1 + $0x10] sm:$0xff]  }
   0x2   :  { %137 = vmatprep.subr.bf16.mxu0 %v147_v0  ;;  %v150_v2 = vld [vmem:[%s203_s0] sm:$0xff]   ;;  %v151_v4 = vld [vmem:[%s203_s0 + $0x8] sm:$0xff]  }
   0x3   :  { %138 = vmatpush3.bf16.msra.mxu0 %v147_v0  ;;  %143 = vmatprep.mubr.msk.bf16.mxu0 %vm60_vm0, %v150_v2  ;;  %v124_v5 = vld [vmem:[%s204_s2] ss:$0 sm:$0xff] }
   0x4   :  { %139 = vmatprep.subr.bf16.mxu0 %v148_v1 }
   0x7   :  { %140 = vmatpush3.bf16.msra.mxu0 %v148_v1 }
   0x8   :  { %141 = vmatprep.subr.bf16.mxu0 %v149_v3 }
   0xb   :  { %142 = vmatpush3.bf16.msra.mxu0 %v149_v3 }
   0xe   :  { %144 = vmatmul.mubr.msk.bf16.vlgmr.msra.gmra.mrb[0].mxu0 %vm60_vm0, %v151_v4 }
  0xe1   :  { %v145_v6 = vpop.f32.mrb[0].mxu0 }
  0xe2   :  { %v110_v7 = vadd.f32 %v145_v6, %v124_v5  ;;  %v101_v8 = vpop.f32.mrb[1].mxu0 }
  0xe3   :  { %v102_v9 = vadd.f32 %v124_v5, %v101_v8  ;;  %v146_v10 = vpop.f32.mrb[2].mxu0 }
  0xe4   :  { %118 = vst [vmem:[%s205_s3 + $0x10] sm:$0xff] %v110_v7  ;;  %v113_v11 = vadd.f32 %v146_v10, %v124_v5  ;;  %v104_v12 = vpop.f32.mrb[3].mxu0 }
  0xe5   :  { %116 = vst [vmem:[%s205_s3] sm:$0xff] %v102_v9  ;;  %v105_v13 = vadd.f32 %v124_v5, %v104_v12 }
  0xe6   :  { %119 = vst [vmem:[%s205_s3 + $0x18] sm:$0xff] %v113_v11 }
  0xe7   :  { %117 = vst [vmem:[%s205_s3 + $0x8] sm:$0xff] %v105_v13 }

// kernel: cgpt2_forward.3
= control target key start
LH: loop header
LB: loop body
LE: loop exit
PB: predicated region body
PF: predicated region fallthrough
CT: control target
= control target key end

     0   :  { %s6726_s0 = inlined_call_operand.vmem [shape: f32[48,128], index: 0, kind: input, shape index: {}, may-alias: {0,15}]   ;;  %s6727_s1 = inlined_call_operand.vmem [shape: f32[2,1,128], index: 1, kind: input, shape index: {}]   ;;  %s6728_s2 = inlined_call_operand.vmem [shape: f32[2,1,128], index: 2, kind: input, shape index: {}]   ;;  %s6729_s3 = inlined_call_operand.hbm [shape: bf16[2,128,384], index: 3, kind: input, shape index: {}]   ;;  %s6730_s4 = inlined_call_operand.vmem [shape: f32[2,1,384], index: 4, kind: input, shape index: {}]   ;;  %s6731_s5 = inlined_call_operand.vmem [shape: bf16[2,128,128], index: 5, kind: input, shape index: {}]   ;;  %s6732_s6 = inlined_call_operand.vmem [shape: f32[2,1,128], index: 6, kind: input, shape index: {}]   ;;  %s6733_s7 = inlined_call_operand.vmem [shape: f32[2,1,128], index: 7, kind: input, shape index: {}]   ;;  %s6734_s8 = inlined_call_operand.vmem [shape: f32[2,1,128], index: 8, kind: input, shape index: {}]   ;;  %s6735_s9 = inlined_call_operand.vmem [shape: bf16[2,128,512], index: 9, kind: input, shape index: {}]   ;;  %s6736_s10 = inlined_call_operand.vmem [shape: f32[2,1,512], index: 10, kind: input, shape index: {}]   ;;  %s6737_s11 = inlined_call_operand.vmem [shape: bf16[2,512,128], index: 11, kind: input, shape index: {}]   ;;  %s6738_s12 = inlined_call_operand.vmem [shape: f32[2,1,128], index: 12, kind: input, shape index: {}]   ;;  %s6739_s13 = inlined_call_operand.vmem [shape: f32[1,128], index: 13, kind: input, shape index: {}]   ;;  %s6740_s14 = inlined_call_operand.vmem [shape: f32[1,128], index: 14, kind: input, shape index: {}]   ;;  %s6741_s15 = inlined_call_operand.vmem [shape: f32[48,128], index: 15, kind: output, shape index: {}, may-alias: {0,15}]  }
   0x1   :  { %6751 = sst [smem:[#allocation11_spill]] %s6728_s2 }
   0x2   :  { %6752 = sst [smem:[#allocation12_spill]] %s6729_s3 }
   0x3   :  { %6753 = sst [smem:[#allocation13_spill]] %s6731_s5 }
   0x4   :  { %6754 = sst [smem:[#allocation14_spill]] %s6739_s13 }
   0x5   :  { %6755 = sst [smem:[#allocation15_spill]] %s6740_s14 }
   0x6   :  { %6756 = sst [smem:[#allocation16_spill]] %s6741_s15 }
   0x7   :  { %20 = vsyncpa [#allocation3], 0 }
   0x8   :  { %22 = vsyncpa [#allocation3 + $0x1], 0  ;;  %s5397_s18 = smov 0   ;;  %s5399_s19 = smov 0  }
   0x9   :  { %s5401_s20 = smov 0   ;;  %s5403_s21 = smov 0  }
   0xa   :  { %s5405_s22 = smov 0   ;;  %s5407_s23 = smov 0  }
   0xb LB: > { %6757 = sst [smem:[#allocation5_spill]] %s5290_s19  ;;  %s4217_s24 = sadd.s32 4294967295, %s5306_s23   ;;  %s5306_s23 = sphi %s5407_s23, %s28_s23   ;;  %s5302_s22 = sphi %s5405_s22, %s6792_s22   ;;  %s5298_s21 = sphi %s5403_s21, %s6791_s21   ;;  %s5294_s20 = sphi %s5401_s20, %s6790_s20   ;;  %s5290_s19 = sphi %s5399_s19, %s6789_s19   ;;  %s5286_s18 = sphi %s5397_s18, %s6788_s18  }
   0xc   : > { %6758 = sst [smem:[#allocation6_spill]] %s5294_s20  ;;  %s37_s25 = sadd.s32 1, %s5302_s22 }
   0xd   : > { %6759 = sst [smem:[#allocation7_spill]] %s5302_s22  ;;  %p38_p0 = scmp.ge.s32.totalorder %s37_s25, 2 }
   0xe   : > { %6760 = sst [smem:[#allocation8_spill]] %s5306_s23  ;;  %s125_s26 = sadd.s32 1, %s5294_s20 }
   0xf   : > { %p132_p1 = scmp.ne.s32.totalorder %s5294_s20, %s5290_s19  ;;  %p133_p2 = scmp.eq.s32.totalorder %s5306_s23, 0 }
  0x10   : > { %s6794_s25 = smov (%p38_p0, %s37_s25), 0  ;;  %p138_p4 = scmp.ne.s32.totalorder %s5290_s19, %s5286_s18 }
  0x11   : > { %6761 = sst [smem:[#allocation9_spill]] %s6794_s25  ;;  %p134_p3 = por %p133_p2, %p132_p1 }
  0x12   : > { %s122_s27 = ssub.s32 %s5302_s22, %s6794_s25  ;;  %p139_p5 = scmp.eq.s32.totalorder %s4217_s24, 0 }
  0x13   : > { %p123_p6 = scmp.eq.s32.totalorder %s122_s27, 0  ;;  %p4748_p8 = scmp.lt.s32.totalorder %s5306_s23, 2 }
  0x14   : > { %p5436_p7 = por %p139_p5, %p138_p4  ;;  %s491_s30 = sand.u32 1, %s5294_s20  }
  0x15   : > { %s5442_s29 = scalar_select %p123_p6, %s5294_s20, %s125_s26  }
  0x16   : > { %s4739_s16 = smul.u32 3072, %s5302_s22  ;;  %s6764_s3 = sld [smem:[#allocation12_spill]] }
  0x17   : > { %6763 = sst [smem:[#allocation10_spill]] %s5442_s29  ;;  %s4738_s17 = smul.u32 192, %s491_s30 }
  0x18   : > { %p5451_p9 = pnand %p4748_p8, %p134_p3  ;;  %s5457_s27 = scalar_lea.sflag [#allocation3], %s491_s30 }
  0x19   : > { %s495_s24 = scalar_lea.vmem [#allocation2], %s4738_s17 }
  0x1a   : > { %s502_s26 = sshll.u32 %s495_s24, 4  ;;  %p5228_p11 = pneg %p5451_p9  ;;  %s5455_s26 = int_to_ptr.vmem [resolvable:$true] %s502_s26 }
  0x1c   : > { %s5449_s15 = scalar_lea.hbm %s6764_s3, %s4739_s16  ;;  %s5231_s16 = scalar_lea.hbm %s6764_s3, 6144 }
  0x1d   : > { %s5226_s25 = scalar_lea.hbm %s5449_s15, 3072  ;;  %p5232_p0 = scmp.lt.u32.totalorder %s5449_s15, %s6764_s3 }
  0x1e   : > { %p5227_p10 = scmp.ne.s32.totalorder %s5449_s15, %s5226_s25  ;;  %p5233_p1 = scmp.lt.u32.totalorder %s5231_s16, %s5226_s25 }
  0x1f   : > { %p5235_p3 = scmp.lt.u32.totalorder %s5226_s25, %s5449_s15 }
  0x20   : > { %p5229_p12 = pnand %p5228_p11, %p5227_p10  ;;  %p5234_p2 = por %p5233_p1, %p5232_p0 }
  0x22   : > { %p5230_p13 = pneg %p5229_p12  ;;  %p5236_p4 = por %p5235_p3, %p5234_p2 }
  0x24   : > { %p5237_p5 = pnand %p5236_p4, %p5230_p13 }
  0x26   : > { %5240 = shalt.err (!%p5237_p5)
}
  0x27   : > { %s5241_s30 = scalar_lea.vmem %s5455_s26, 3072  ;;  %s5308_s17 = smov [#allocation2]  }
  0x28   : > { %p5242_p6 = scmp.ne.s32.totalorder %s5455_s26, %s5241_s30  ;;  %s5246_s24 = sshll.u32 %s5308_s17, 4  ;;  %s5247_s24 = int_to_ptr.vmem [resolvable:$false] %s5246_s24 }
  0x29   : > { %s5248_s22 = scalar_lea.vmem %s5247_s24, 6144  ;;  %p5249_p12 = scmp.lt.s32.totalorder %s5455_s26, %s5247_s24 }
  0x2a   : > { %p5244_p8 = pnand %p5242_p6, %p5228_p11  ;;  %p5250_p0 = scmp.lt.s32.totalorder %s5248_s22, %s5241_s30 }
  0x2c   : > { %p5245_p10 = pneg %p5244_p8  ;;  %p5251_p1 = por %p5250_p0, %p5249_p12 }
  0x2e   : > { %p5252_p2 = pnand %p5251_p1, %p5245_p10 }
  0x30   : > { %5255 = shalt.err (!%p5252_p2)
}
  0x31   : > { %s5309_s25 = smov 192   ;;  %s5310_s29 = smov 12  }
  0x32   : > { %4747 = dma.hbm_to_vmem [thread:$0]  (!%p5451_p9), %s5449_s15, 3072, %s5455_s26, %s5457_s27, %s5309_s25, %s5309_s25, %s5310_s29  }
  0x33   : > { %p4222_p11 = scmp.ge.s32.totalorder %s5306_s23, 1  ;;  %p572_p13 = scmp.lt.s32.totalorder %s5306_s23, 3 }
  0x35   : > { %p573_p3 = pnand %p4222_p11, %p572_p13 }
  0x36   : > { %s578_s13 = sand.u32 (!%p573_p3), 1, %s5290_s19  }
  0x37   : > { %576 = sbr.rel (%p573_p3) target bundleno = 3042 (0xbe2), region = 80  ;;  %s579_s16 = scalar_lea.sflag (!%p573_p3), [#allocation3], %s578_s13 }
  0x38   : > { %s4740_s14 = smul.u32 (!%p573_p3), 192, %s578_s13 }
  0x3a   : > { %s5488_s30 = scalar_lea.vmem (!%p573_p3), [#allocation2], %s4740_s14 }
  0x3e   : > { %5281 = dma.done.wait (%p5436_p7), %s579_s16, 3072  }
  0x3f   : > { %5283 = vsyncadd (%p5436_p7), %s579_s16, 4294964224  ;;  %p681_p4 = scmp.lt.s32.totalorder %s5298_s21, 1  ;;  %s6767_s5 = sld [smem:[#allocation13_spill]] }
  0x40   : > { %p4230_p7 = scmp.ne.s32.totalorder %s5298_s21, 0 }
  0x41   : > { %s5496_s15 = scalar_select %p681_p4, %s5298_s21, 1 }
  0x42   : > { %732 = sbr.rel (%p4230_p7) target bundleno = 88 (0x58), region = 88  ;;  %v733_v0 = vld [vmem:[%s6726_s0] sm:$0xff] (!%p4230_p7)  ;;  %v734_v1 = vld [vmem:[%s6726_s0 + $0x8] sm:$0xff] (!%p4230_p7)  ;;  %v735_v2 = vld [vmem:[%s6726_s0 + $0x10] sm:$0xff] (!%p4230_p7) }
  0x43   : > { %s4741_s22 = smul.u32 3, %s5496_s15  ;;  %s4373_s25 = sshll.u32 %s5496_s15, 6 }
  0x44   : > { %s4374_s29 = sshll.u32 %s5496_s15, 8  ;;  %s4227_s16 = sshll.u32 %s5496_s15, 2 }
  0x45   : > { %s5511_s14 = scalar_lea.vmem %s6767_s5, %s4373_s25  ;;  %s5520_s19 = scalar_lea.vmem %s6730_s4, %s4741_s22 }
  0x46   : > { %s5534_s5 = scalar_lea.vmem %s6735_s9, %s4374_s29  ;;  %s5540_s3 = scalar_lea.vmem %s6736_s10, %s4227_s16 }
  0x47   : > { %s5545_s23 = scalar_lea.vmem %s6737_s11, %s4374_s29  ;;  %s6768_s22 = sld [smem:[#allocation16_spill]] (!%p4230_p7) }
  0x4d   : > { %739 = vst [vmem:[%s6768_s22] sm:$0xff] %v733_v0  ;;  %740 = vst [vmem:[%s6768_s22 + $0x8] sm:$0xff] %v734_v1 }
  0x4e   : > { %741 = vst [vmem:[%s6768_s22 + $0x10] sm:$0xff] %v735_v2 }
  0x55   : > { %v736_v3 = vld [vmem:[%s6726_s0 + $0x18] sm:$0xff]  ;;  %v737_v4 = vld [vmem:[%s6726_s0 + $0x20] sm:$0xff]  ;;  %v738_v5 = vld [vmem:[%s6726_s0 + $0x28] sm:$0xff] }
  0x56   : > { %742 = vst [vmem:[%s6768_s22 + $0x18] sm:$0xff] %v736_v3  ;;  %743 = vst [vmem:[%s6768_s22 + $0x20] sm:$0xff] %v737_v4 }
  0x57   : > { %744 = vst [vmem:[%s6768_s22 + $0x28] sm:$0xff] %v738_v5 }
  0x58 PF: > { %s6769_s2 = sld [smem:[#allocation16_spill]]  ;;  %v4920_v12 = vld [vmem:[%s5488_s30 + $0x4] ss:$12 sps:$4 sm:$0xff]   ;;  %v4922_v13 = vld [vmem:[%s5488_s30] ss:$12 sps:$4 sm:$0xff]   ;;  %v5311_v14 = vmov 0.0   ;;  %s6770_s13 = scalar_lea.vmem %s6727_s1, %s5496_s15 }
  0x59   : > { %4530 = vmatprep.subr.bf16.mxu1 %v5311_v14  ;;  %v4923_v15 = vld [vmem:[%s5488_s30 + $0x8] ss:$12 sps:$4 sm:$0xff]   ;;  %1024 = vmatprep.subr.bf16.mxu0 %v4920_v12  ;;  %v4926_v41 = vld [vmem:[%s5488_s30 + $0x18] ss:$12 sps:$4 sm:$0xff]   ;;  %v4927_v42 = vld [vmem:[%s5488_s30 + $0x20] ss:$12 sps:$4 sm:$0xff]   ;;  %s6779_s24 = scalar_lea.vmem %s6732_s6, %s5496_s15  ;;  %s6781_s27 = scalar_lea.vmem %s6734_s8, %s5496_s15 }
  0x5a   : > { %v4924_v16 = vld [vmem:[%s5488_s30 + $0x1c] ss:$12 sps:$4 sm:$0xff]   ;;  %1025 = vmatpush1.bf16.msra.mxu0 %v4922_v13  ;;  %4531 = vmatpush3.bf16.msra.mxu1 %v4923_v15  ;;  %v4928_v43 = vld [vmem:[%s5488_s30 + $0x34] ss:$12 sps:$4 sm:$0xff]   ;;  %v4931_v45 = vld [vmem:[%s5488_s30 + $0x38] ss:$12 sps:$4 sm:$0xff]   ;;  %s6782_s17 = scalar_lea.vmem %s6738_s12, %s5496_s15 }
  0x5b   : > { %1026 = vmatprep.subr.bf16.mxu0 %v4924_v16  ;;  %4532 = vmatprep.subr.bf16.mxu1 %v5311_v14  ;;  %v4930_v44 = vld [vmem:[%s5488_s30 + $0x30] ss:$12 sps:$4 sm:$0xff]   ;;  %v4932_v46 = vld [vmem:[%s5488_s30 + $0x4c] ss:$12 sps:$4 sm:$0xff]   ;;  %v4934_v47 = vld [vmem:[%s5488_s30 + $0x48] ss:$12 sps:$4 sm:$0xff]  }
  0x5c   : > { %v4935_v48 = vld [vmem:[%s5488_s30 + $0x50] ss:$12 sps:$4 sm:$0xff]   ;;  %v4938_v50 = vld [vmem:[%s5488_s30 + $0x60] ss:$12 sps:$4 sm:$0xff]   ;;  %v4939_v51 = vld [vmem:[%s5488_s30 + $0x68] ss:$12 sps:$4 sm:$0xff]  }
  0x5d   : > { %v4936_v49 = vld [vmem:[%s5488_s30 + $0x64] ss:$12 sps:$4 sm:$0xff]   ;;  %v4940_v52 = vld [vmem:[%s5488_s30 + $0x7c] ss:$12 sps:$4 sm:$0xff]   ;;  %v4943_v54 = vld [vmem:[%s5488_s30 + $0x80] ss:$12 sps:$4 sm:$0xff]  }
  0x5e   : > { %v745_v6 = vld [vmem:[%s6769_s2] sm:$0xff]  ;;  %v747_v7 = vld [vmem:[%s6769_s2 + $0x10] sm:$0xff]  ;;  %v746_v8 = vld [vmem:[%s6769_s2 + $0x8] sm:$0xff]  ;;  %1027 = vmatpush1.bf16.msra.mxu0 %v4926_v41  ;;  %4533 = vmatpush3.bf16.msra.mxu1 %v4927_v42  ;;  %v5312_v59 = vmov 0   ;;  %vm5313_vm0 = vmmov 0   ;;  %s6771_s18 = sld [smem:[#allocation11_spill]] }
  0x5f   : > { %753 = vadd.xlane.f32.xlu0 %v745_v6  ;;  %757 = vadd.xlane.f32.xlu1 %v747_v7  ;;  %v748_v9 = vld [vmem:[%s6769_s2 + $0x18] sm:$0xff]  ;;  %v749_v10 = vld [vmem:[%s6769_s2 + $0x20] sm:$0xff]  ;;  %v750_v11 = vld [vmem:[%s6769_s2 + $0x28] sm:$0xff]  ;;  %vm1372_vm1 = vcmask 261120   ;;  %s5315_s22 = smov 32   ;;  %s5316_s20 = smov 64  }
  0x60   : > { %4534 = vmatprep.subr.bf16.mxu1 %v5311_v14  ;;  %1028 = vmatprep.subr.bf16.mxu0 %v4928_v43  ;;  %v4942_v53 = vld [vmem:[%s5488_s30 + $0x78] ss:$12 sps:$4 sm:$0xff]   ;;  %v4944_v55 = vld [vmem:[%s5488_s30 + $0x94] ss:$12 sps:$4 sm:$0xff]   ;;  %v4946_v56 = vld [vmem:[%s5488_s30 + $0x90] ss:$12 sps:$4 sm:$0xff]  }
  0x61   : > { %v4947_v57 = vld [vmem:[%s5488_s30 + $0x98] ss:$12 sps:$4 sm:$0xff]   ;;  %1056 = vmatprep.mubr.bf16.mxu0 %v5312_v59  ;;  %4546 = vmatprep.mubr.msk.bf16.mxu1 %vm5313_vm0, %v5311_v14  ;;  %v4950_v60 = vld [vmem:[%s5488_s30 + $0xa8] ss:$12 sps:$4 sm:$0xff]   ;;  %v4951_v61 = vld [vmem:[%s5488_s30 + $0xb0] ss:$12 sps:$4 sm:$0xff]  }
  0x62   : > { %1029 = vmatpush1.bf16.msra.mxu0 %v4930_v44  ;;  %4535 = vmatpush3.bf16.msra.mxu1 %v4931_v45  ;;  %v4948_v58 = vld [vmem:[%s5488_s30 + $0xac] ss:$12 sps:$4 sm:$0xff]   ;;  %vm2179_vm2 = vcmask 1043456   ;;  %vm1892_vm5 = vcmask 195584   ;;  %vm2670_vm7 = vcmask 523264   ;;  %vm2675_vm8 = vcmask 785408  }
  0x63   : > { %755 = vadd.xlane.f32.xlu0 %v746_v8  ;;  %759 = vadd.xlane.f32.xlu1 %v748_v9  ;;  %p4365_p9 = scmp.ge.s32.totalorder %s5298_s21, 1 }
  0x64   : > { %4536 = vmatprep.subr.bf16.mxu1 %v5311_v14  ;;  %1030 = vmatprep.subr.bf16.mxu0 %v4932_v46  ;;  %s6772_s29 = scalar_lea.vmem %s6771_s18, %s5496_s15  ;;  %s6783_s25 = sld [smem:[#allocation16_spill]] (!%p4365_p9) }
  0x66   : > { %1031 = vmatpush1.bf16.msra.mxu0 %v4934_v47  ;;  %4537 = vmatpush3.bf16.msra.mxu1 %v4935_v48 }
  0x67   : > { %761 = vadd.xlane.f32.xlu0 %v749_v10  ;;  %763 = vadd.xlane.f32.xlu1 %v750_v11 }
  0x68   : > { %4538 = vmatprep.subr.bf16.mxu1 %v5311_v14  ;;  %1032 = vmatprep.subr.bf16.mxu0 %v4936_v49 }
  0x6a   : > { %1033 = vmatpush1.bf16.msra.mxu0 %v4938_v50  ;;  %4539 = vmatpush3.bf16.msra.mxu1 %v4939_v51  ;;  %v879_v50 = vld [vmem:[%s5520_s19] sm:$0x7]  ;;  %s5314_s19 = smov 96  }
  0x6b   : > { %4540 = vmatprep.subr.bf16.mxu1 %v5311_v14  ;;  %1034 = vmatprep.subr.bf16.mxu0 %v4940_v52 }
  0x6e   : > { %1035 = vmatpush1.bf16.msra.mxu0 %v4942_v53  ;;  %4541 = vmatpush3.bf16.msra.mxu1 %v4943_v54 }
  0x6f   : > { %1036 = vmatprep.subr.bf16.mxu0 %v4944_v55  ;;  %4542 = vmatprep.subr.bf16.mxu1 %v5311_v14 }
  0x72   : > { %1037 = vmatpush1.bf16.msra.mxu0 %v4946_v56  ;;  %4543 = vmatpush3.bf16.msra.mxu1 %v4947_v57 }
  0x73   : > { %1038 = vmatprep.subr.bf16.mxu0 %v4948_v58  ;;  %4544 = vmatprep.subr.bf16.mxu1 %v5311_v14 }
  0x76   : > { %1039 = vmatpush1.bf16.msra.mxu0 %v4950_v60  ;;  %4545 = vmatpush3.bf16.msra.mxu1 %v4951_v61 }
  0xec   : > { %v754_v17 = vpop.xlane.xlu0 %753  ;;  %v758_v18 = vpop.xlane.xlu1 %757 }
  0xed   : > { %v766_v19 = vmul.f32 0.0078125, %v754_v17  ;;  %v768_v20 = vmul.f32 0.0078125, %v758_v18 }
  0xef   : > { %v5612_v21 = vsub.f32 %v745_v6, %v766_v19  ;;  %v5614_v22 = vsub.f32 %v747_v7, %v768_v20  ;;  %v4231_v19 = vld [vmem:[%s6770_s13] ss:$0 sm:$0xff] }
  0xf0   : > { %v756_v23 = vpop.xlane.xlu0 %755  ;;  %v760_v24 = vpop.xlane.xlu1 %759 }
  0xf1   : > { %v767_v25 = vmul.f32 0.0078125, %v756_v23  ;;  %v778_v26 = vmul.f32 %v5612_v21, %v5612_v21  ;;  %v769_v27 = vmul.f32 0.0078125, %v760_v24  ;;  %v780_v28 = vmul.f32 %v5614_v22, %v5614_v22 }
  0xf3   : > { %784 = vadd.xlane.f32.xlu0 %v778_v26  ;;  %v5620_v29 = vsub.f32 %v746_v8, %v767_v25  ;;  %v5622_v30 = vsub.f32 %v748_v9, %v769_v27  ;;  %v4232_v26 = vld [vmem:[%s6772_s29] ss:$0 sm:$0xff] }
  0xf4   : > { %v762_v31 = vpop.xlane.xlu0 %761  ;;  %v764_v32 = vpop.xlane.xlu1 %763 }
  0xf5   : > { %v770_v33 = vmul.f32 0.0078125, %v762_v31  ;;  %v779_v34 = vmul.f32 %v5620_v29, %v5620_v29  ;;  %v771_v35 = vmul.f32 0.0078125, %v764_v32  ;;  %v781_v36 = vmul.f32 %v5622_v30, %v5622_v30 }
  0xf7   : > { %788 = vadd.xlane.f32.xlu0 %v780_v28  ;;  %786 = vadd.xlane.f32.xlu1 %v779_v34  ;;  %v5628_v37 = vsub.f32 %v749_v10, %v770_v33  ;;  %v5630_v38 = vsub.f32 %v750_v11, %v771_v35 }
  0xf9   : > { %v782_v39 = vmul.f32 %v5628_v37, %v5628_v37  ;;  %v783_v40 = vmul.f32 %v5630_v38, %v5630_v38 }
  0xfb   : > { %790 = vadd.xlane.f32.xlu1 %v781_v36  ;;  %792 = vadd.xlane.f32.xlu0 %v782_v39 }
  0xff   : > { %794 = vadd.xlane.f32.xlu1 %v783_v40 }
 0x180   : > { %v785_v62 = vpop.xlane.xlu0 %784 }
 0x181   : > { %v796_v63 = vmul.f32 0.0078125, %v785_v62 }
 0x183   : > { %v802_v0 = vadd.f32 1e-05, %v796_v63 }
 0x184   : > { %v787_v1 = vpop.xlane.xlu1 %786  ;;  %v789_v2 = vpop.xlane.xlu0 %788 }
 0x185   : > { %5040 = vrsqrt.f32 %v802_v0  ;;  %v797_v3 = vmul.f32 0.0078125, %v787_v1  ;;  %v798_v4 = vmul.f32 0.0078125, %v789_v2 }
 0x187   : > { %v803_v5 = vadd.f32 1e-05, %v797_v3  ;;  %v804_v6 = vadd.f32 1e-05, %v798_v4 }
 0x188   : > { %v791_v7 = vpop.xlane.xlu1 %790  ;;  %v793_v8 = vpop.xlane.xlu0 %792 }
 0x189   : > { %5042 = vrsqrt.f32 %v803_v5  ;;  %v799_v9 = vmul.f32 0.0078125, %v791_v7  ;;  %v800_v11 = vmul.f32 0.0078125, %v793_v8 }
 0x18a   : > { %5044 = vrsqrt.f32 %v804_v6 }
 0x18b   : > { %v805_v10 = vadd.f32 1e-05, %v799_v9  ;;  %v806_v16 = vadd.f32 1e-05, %v800_v11 }
 0x18c   : > { %v795_v12 = vpop.xlane.xlu1 %794 }
 0x18d   : > { %5046 = vrsqrt.f32 %v805_v10  ;;  %v801_v13 = vmul.f32 0.0078125, %v795_v12 }
 0x18f   : > { %v5041_v15 = vpop.eup %5040  ;;  %v807_v17 = vadd.f32 1e-05, %v801_v13 }
 0x190   : > { %v814_v18 = vmul.f32 %v5041_v15, %v5612_v21 }
 0x191   : > { %5048 = vrsqrt.f32 %v807_v17 }
 0x192   : > { %5050 = vrsqrt.f32 %v806_v16  ;;  %v826_v24 = vmul.f32 %v4231_v19, %v814_v18 }
 0x193   : > { %v5043_v20 = vpop.eup %5042 }
 0x194   : > { %v815_v23 = vmul.f32 %v5043_v20, %v5620_v29  ;;  %v5045_v25 = vpop.eup %5044  ;;  %v838_v21 = vadd.f32 %v4232_v26, %v826_v24 }
 0x195   : > { %v816_v32 = vmul.f32 %v5045_v25, %v5614_v22 }
 0x196   : > { %v827_v27 = vmul.f32 %v4231_v19, %v815_v23 }
 0x197   : > { %v5047_v28 = vpop.eup %5046  ;;  %v828_v29 = vmul.f32 %v4231_v19, %v816_v32 }
 0x198   : > { %v839_v31 = vadd.f32 %v4232_v26, %v827_v27  ;;  %v817_v33 = vmul.f32 %v5047_v28, %v5622_v30 }
 0x199   : > { %v840_v42 = vadd.f32 %v4232_v26, %v828_v29 }
 0x19a   : > { %v844_v34 = vpack.c.bf16 %v839_v31, %v838_v21  ;;  %v829_v35 = vmul.f32 %v4231_v19, %v817_v33 }
 0x19b   : > { %v5049_v36 = vpop.eup %5048 }
 0x19c   : > { %1057 = vmatmul.mubr.bf16.vlgmr.msra.gmra.mrb[0].mxu0 %v844_v34  ;;  %4547 = vmatmul.mubr.bf16.vlgmr.msra.gmra.mrb[0].mxu1 %v844_v34  ;;  %v5051_v39 = vpop.eup %5050  ;;  %v841_v40 = vadd.f32 %v4232_v26, %v829_v35  ;;  %v819_v41 = vmul.f32 %v5049_v36, %v5630_v38  ;;  %v881_v38 = vlaneseq }
 0x19d   : > { %1066 = vmatprep.mubr.bf16.mxu0 %v5312_v59  ;;  %4550 = vmatprep.mubr.msk.bf16.mxu1 %vm5313_vm0, %v5311_v14  ;;  %v818_v22 = vmul.f32 %v5051_v39, %v5628_v37 }
 0x19e   : > { %v845_v43 = vpack.c.bf16 %v841_v40, %v840_v42  ;;  %v831_v30 = vmul.f32 %v4231_v19, %v819_v41  ;;  %v5688_v48 = vshrl.u32 %v881_v38, 7 }
 0x19f   : > { %v830_v44 = vmul.f32 %v4231_v19, %v818_v22 }
 0x1a0   : > { %v843_v45 = vadd.f32 %v4232_v26, %v831_v30  ;;  %v883_v37 = vsub.s32 0, %v5688_v48  ;;  %v891_v49 = vsub.s32 2, %v5688_v48  ;;  %v887_v51 = vsub.s32 1, %v5688_v48 }
 0x1a1   : > { %v842_v46 = vadd.f32 %v4232_v26, %v830_v44 }
 0x1a2   : > { %v5696_v52 = vrot.slane %v879_v50, %v883_v37  ;;  %v5700_v53 = vrot.slane %v879_v50, %v891_v49  ;;  %v5704_v56 = vrot.slane %v879_v50, %v887_v51 }
 0x1a3   : > { %v846_v47 = vpack.c.bf16 %v843_v45, %v842_v46 }
 0x1a4   : > { %1067 = vmatmul.mubr.bf16.gmra.mrb[4].mxu0 %v845_v43  ;;  %4551 = vmatmul.mubr.bf16.gmra.mrb[4].mxu1 %v845_v43 }
 0x1a5   : > { %1076 = vmatprep.mubr.bf16.mxu0 %v5312_v59  ;;  %4554 = vmatprep.mubr.msk.bf16.mxu1 %vm5313_vm0, %v5311_v14 }
 0x1ac   : > { %1077 = vmatmul.mubr.bf16.gmra.mrb[8].mxu0 %v846_v47  ;;  %4555 = vmatmul.mubr.bf16.gmra.mrb[8].mxu1 %v846_v47 }
 0x26f   : > { %v1058_v54 = vpop.f32.mrb[0].mxu0  ;;  %v1121_v55 = vpop.f32.mrb[0].mxu1 }
 0x270   : > { %v1060_v57 = vpop.f32.mrb[1].mxu0  ;;  %v4548_v58 = vpop.f32.mrb[1].mxu1  ;;  %v1059_v62 = vadd.f32 %v1058_v54, %v5696_v52  ;;  %v1122_v63 = vadd.f32 %v1121_v55, %v5700_v53 }
 0x271   : > { %v1062_v60 = vpop.f32.mrb[2].mxu0  ;;  %v1124_v61 = vpop.f32.mrb[2].mxu1  ;;  %v1061_v4 = vadd.f32 %v1060_v57, %v5704_v56 }
 0x272   : > { %v1063_v0 = vadd.f32 %v1062_v60, %v5696_v52  ;;  %v1125_v1 = vadd.f32 %v1124_v61, %v5700_v53  ;;  %v1064_v2 = vpop.f32.mrb[3].mxu0  ;;  %v4549_v3 = vpop.f32.mrb[3].mxu1 }
 0x273   : > { %v1065_v5 = vadd.f32 %v1064_v2, %v5704_v56 }
 0x274   : > { %v1204_v6 = vpack.c.bf16 %v1063_v0, %v1059_v62  ;;  %v5712_v7 = vpack.i.bf16 %v1125_v1, %v1122_v63  ;;  %v5715_v10 = vpack.c.bf16 %v1125_v1, %v1122_v63 }
 0x275   : > { %v4805_v8 = vpack.i.bf16 %v1065_v5, %v1061_v4  ;;  %v1280_v9 = vpack.c.bf16 %v1065_v5, %v1061_v4 }
 0x276   : > { %4562 = vmatprep.mubr.msk.bf16.mxu1 %vm1372_vm1, %v1204_v6 }
 0x277   : > { %4806 = vrot.lane.b32.xlu0 %v4805_v8, %s5314_s19  ;;  %v1068_v11 = vpop.f32.mrb[4].mxu0  ;;  %v1129_v12 = vpop.f32.mrb[4].mxu1  ;;  %4714 = vmatprep.subr.msk.bf16.mxu1 %vm1372_vm1, %v1280_v9  ;;  %v1380_v13 = vsel %vm1372_vm1, %v1280_v9, 0 }
 0x278   : > { %v1069_v15 = vadd.f32 %v1068_v11, %v5696_v52  ;;  %v1070_v16 = vpop.f32.mrb[5].mxu0  ;;  %v4552_v17 = vpop.f32.mrb[5].mxu1  ;;  %4559 = vmatpush3.bf16.xpose.msra.mxu1 %v1380_v13 }
 0x279   : > { %v1071_v18 = vadd.f32 %v1070_v16, %v5704_v56  ;;  %v1072_v19 = vpop.f32.mrb[6].mxu0  ;;  %v1132_v20 = vpop.f32.mrb[6].mxu1 }
 0x27a   : > { %v1074_v23 = vpop.f32.mrb[7].mxu0  ;;  %v4553_v24 = vpop.f32.mrb[7].mxu1  ;;  %v4845_v25 = vpack.i.bf16 %v1069_v15, %v1063_v0  ;;  %v5728_v32 = vadd.f32 %v1072_v19, %v5696_v52  ;;  %v1133_v33 = vadd.f32 %v1132_v20, %v5700_v53 }
 0x27b   : > { %4826 = vrot.lane.b32.xlu0 %v4805_v8, %s5315_s22  ;;  %v4810_v26 = vpack.i.bf16 %v1059_v62, %v1071_v18  ;;  %v1281_v27 = vpack.c.bf16 %v1071_v18, %v1071_v18  ;;  %v1075_v39 = vadd.f32 %v1074_v23, %v5704_v56 }
 0x27d   : > { %4811 = vrot.lane.b32.xlu1 %v4810_v26, %s5314_s19  ;;  %4715 = vmatprep.subr.msk.bf16.mxu1 %vm1372_vm1, %v1281_v27  ;;  %v1383_v31 = vsel %vm1372_vm1, %v1281_v27, 0 }
 0x27f   : > { %4836 = vrot.lane.b32.xlu0 %v4810_v26, %s5315_s22  ;;  %v1078_v28 = vpop.f32.mrb[8].mxu0  ;;  %v1137_v21 = vpop.f32.mrb[8].mxu1 }
 0x280   : > { %v5732_v34 = vadd.f32 %v1078_v28, %v5696_v52  ;;  %v1138_v35 = vadd.f32 %v1137_v21, %v5700_v53  ;;  %v1080_v36 = vpop.f32.mrb[9].mxu0  ;;  %v4556_v29 = vpop.f32.mrb[9].mxu1  ;;  %4561 = vmatpush3.bf16.xpose.msra.mxu1 %v1383_v31 }
 0x281   : > { %v1081_v40 = vadd.f32 %v1080_v36, %v5704_v56  ;;  %4816 = vrot.lane.b32.xlu1 %v4805_v8, %s5316_s20  ;;  %v1082_v41 = vpop.f32.mrb[10].mxu0  ;;  %v1140_v42 = vpop.f32.mrb[10].mxu1 }
 0x282   : > { %v5739_v22 = vadd.f32 %v1082_v41, %v5696_v52  ;;  %v1084_v43 = vpop.f32.mrb[11].mxu0  ;;  %v4557_v30 = vpop.f32.mrb[11].mxu1  ;;  %v4885_v44 = vpack.i.bf16 %v5732_v34, %v5728_v32  ;;  %v5743_v45 = vpack.i.bf16 %v1138_v35, %v1133_v33  ;;  %v1205_v52 = vpack.c.bf16 %v1069_v15, %v1069_v15 }
 0x283   : > { %v5746_v46 = vadd.f32 %v1084_v43, %v5704_v56  ;;  %4846 = vrot.lane.b32.xlu0 %v4845_v25, %s5315_s22  ;;  %v4850_v47 = vpack.i.bf16 %v1081_v40, %v1075_v39  ;;  %v5751_v54 = vpack.c.bf16 %v1081_v40, %v1075_v39  ;;  %v1212_v57 = vpack.c.bf16 %v5732_v34, %v5728_v32 }
 0x284   : > { %v4865_v50 = vpack.i.bf16 %v5739_v22, %v5732_v34  ;;  %v5758_v58 = vpack.c.bf16 %v1138_v35, %v1133_v33  ;;  %v5772_v56 = vadd.f32 %v1129_v12, %v5700_v53  ;;  %v5782_v60 = vadd.f32 %v1140_v42, %v5700_v53 }
 0x285   : > { %4821 = vrot.lane.b32.xlu1 %v4845_v25, %s5314_s19  ;;  %v4855_v55 = vpack.i.bf16 %v5728_v32, %v5746_v46 }
 0x287   : > { %4563 = vmatmul.mubr.msk.bf16.vlgmr.msra.gmra.mrb[12].mxu1 %vm1372_vm1, %v1205_v52  ;;  %4856 = vrot.lane.b32.xlu0 %v4855_v55, %s5314_s19 }
 0x289   : > { %4831 = vrot.lane.b32.xlu1 %v4810_v26, %s5316_s20 }
 0x28b   : > { %4866 = vrot.lane.b32.xlu0 %v4865_v50, %s5314_s19 }
 0x28d   : > { %4841 = vrot.lane.b32.xlu1 %v4845_v25, %s5316_s20 }
 0x28f   : > { %4876 = vrot.lane.b32.xlu0 %v4855_v55, %s5316_s20 }
 0x291   : > { %4851 = vrot.lane.b32.xlu1 %v4850_v47, %s5314_s19 }
 0x293   : > { %4881 = vrot.lane.b32.xlu0 %v4865_v50, %s5316_s20 }
 0x295   : > { %4861 = vrot.lane.b32.xlu1 %v4850_v47, %s5316_s20 }
 0x297   : > { %1199 = vrot.lane.b32.xlu0 %v5739_v22, %s5315_s22 }
 0x299   : > { %4871 = vrot.lane.b32.xlu1 %v4850_v47, %s5315_s22 }
 0x29b   : > { %1303 = vrot.lane.b32.xlu0 %v5772_v56, %s5314_s19 }
 0x29d   : > { %1275 = vrot.lane.b32.xlu1 %v5746_v46, %s5315_s22 }
 0x29f   : > { %4901 = vrot.lane.b32.xlu0 %v5712_v7, %s5315_s22 }
 0x2a1   : > { %4886 = vrot.lane.b32.xlu1 %v4885_v44, %s5315_s22 }
 0x2a3   : > { %1333 = vrot.lane.b32.xlu0 %v5782_v60, %s5314_s19 }
 0x2a5   : > { %4891 = vrot.lane.b32.xlu1 %v5712_v7, %s5314_s19 }
 0x2a9   : > { %4896 = vrot.lane.b32.xlu1 %v5712_v7, %s5316_s20 }
 0x2ad   : > { %1312 = vrot.lane.b32.xlu1 %v5772_v56, %s5316_s20 }
 0x2b1   : > { %1321 = vrot.lane.b32.xlu1 %v5772_v56, %s5315_s22 }
 0x2b5   : > { %4906 = vrot.lane.b32.xlu1 %v5743_v45, %s5314_s19 }
 0x2e9   : > { %v4807_v53 = vpop.permute.xlu0 %4806 }
 0x2ea   : > { %v4809_v61 = vunpack.i.h.bf16 %v4807_v53  ;;  %v4808_v62 = vunpack.i.l.bf16 %v4807_v53 }
 0x2ec   : > { %v1282_v63 = vpack.c.bf16 %v4809_v61, %v4808_v62 }
 0x2ed   : > { %v4827_v0 = vpop.permute.xlu0 %4826 }
 0x2ee   : > { %4716 = vmatprep.subr.msk.bf16.mxu1 %vm1372_vm1, %v1282_v63  ;;  %v1440_v1 = vsel %vm1372_vm1, %v1282_v63, 0  ;;  %v4829_v5 = vunpack.i.h.bf16 %v4827_v0  ;;  %v4828_v6 = vunpack.i.l.bf16 %v4827_v0 }
 0x2ef   : > { %v4812_v2 = vpop.permute.xlu1 %4811  ;;  %4567 = vmatpush3.bf16.xpose.msra.mxu1 %v1440_v1 }
 0x2f0   : > { %v4813_v3 = vunpack.i.l.bf16 %v4812_v2  ;;  %v1286_v12 = vpack.c.bf16 %v4829_v5, %v4828_v6  ;;  %v4814_v18 = vunpack.i.h.bf16 %v4812_v2  ;;  %v1620_v2 = vsel %vm1372_vm1, %v5751_v54, 0 }
 0x2f1   : > { %v4837_v4 = vpop.permute.xlu0 %4836 }
 0x2f2   : > { %v1283_v7 = vpack.c.bf16 %v4813_v3, %v4813_v3  ;;  %v4838_v25 = vunpack.i.l.bf16 %v4837_v4  ;;  %v4839_v27 = vunpack.i.h.bf16 %v4837_v4  ;;  %v1560_v29 = vsel %vm1372_vm1, %v1286_v12, 0 }
 0x2f3   : > { %v4817_v8 = vpop.permute.xlu1 %4816  ;;  %v1289_v3 = vpack.c.bf16 %v5746_v46, %v5746_v46 }
 0x2f4   : > { %v4819_v9 = vunpack.i.h.bf16 %v4817_v8  ;;  %v4818_v11 = vunpack.i.l.bf16 %v4817_v8  ;;  %4717 = vmatprep.subr.msk.bf16.mxu1 %vm1372_vm1, %v1283_v7  ;;  %v1443_v16 = vsel %vm1372_vm1, %v1283_v7, 0  ;;  %v1287_v35 = vpack.c.bf16 %v4838_v25, %v4838_v25 }
 0x2f5   : > { %v4847_v15 = vpop.permute.xlu0 %4846  ;;  %v1213_v25 = vpack.c.bf16 %v5739_v22, %v5739_v22 }
 0x2f6   : > { %v1284_v13 = vpack.c.bf16 %v4819_v9, %v4818_v11  ;;  %v4848_v23 = vunpack.i.l.bf16 %v4847_v15  ;;  %v1563_v61 = vsel %vm1372_vm1, %v1287_v35, 0  ;;  %v4849_v0 = vunpack.i.h.bf16 %v4847_v15 }
 0x2f7   : > { %v4822_v17 = vpop.permute.xlu1 %4821  ;;  %4569 = vmatpush3.bf16.xpose.msra.mxu1 %v1443_v16 }
 0x2f8   : > { %v4824_v19 = vunpack.i.h.bf16 %v4822_v17  ;;  %v4823_v20 = vunpack.i.l.bf16 %v4822_v17  ;;  %4718 = vmatprep.subr.msk.bf16.mxu0 %vm1372_vm1, %v1284_v13  ;;  %4720 = vmatprep.subr.msk.bf16.mxu1 %vm1372_vm1, %v1286_v12  ;;  %v1500_v24 = vsel %vm1372_vm1, %v1284_v13, 0  ;;  %v1210_v33 = vpack.c.bf16 %v4848_v23, %v4839_v27 }
 0x2f9   : > { %4575 = vmatpush3.bf16.xpose.msra.mxu0 %v1500_v24  ;;  %v4857_v39 = vpop.permute.xlu0 %4856  ;;  %v1211_v8 = vpack.c.bf16 %v4849_v0, %v4849_v0  ;;  %v1623_v13 = vsel %vm1372_vm1, %v1289_v3, 0 }
 0x2fa   : > { %v1206_v26 = vpack.c.bf16 %v4823_v20, %v4814_v18  ;;  %v1207_v21 = vpack.c.bf16 %v4824_v19, %v4824_v19  ;;  %v4858_v4 = vunpack.i.l.bf16 %v4857_v39  ;;  %v4859_v5 = vunpack.i.h.bf16 %v4857_v39 }
 0x2fb   : > { %v4832_v28 = vpop.permute.xlu1 %4831 }
 0x2fc   : > { %v4833_v31 = vunpack.i.l.bf16 %v4832_v28  ;;  %4570 = vmatprep.mubr.msk.bf16.mxu1 %vm1372_vm1, %v1206_v26  ;;  %v4834_v41 = vunpack.i.h.bf16 %v4832_v28 }
 0x2fd   : > { %v4867_v55 = vpop.permute.xlu0 %4866 }
 0x2fe   : > { %v1285_v36 = vpack.c.bf16 %v4833_v31, %v4833_v31  ;;  %4571 = vmatmul.mubr.msk.bf16.vlgmr.msra.gmra.mrb[16].mxu1 %vm1372_vm1, %v1207_v21  ;;  %v4868_v1 = vunpack.i.l.bf16 %v4867_v55  ;;  %v4869_v26 = vunpack.i.h.bf16 %v4867_v55 }
 0x2ff   : > { %v4842_v40 = vpop.permute.xlu1 %4841  ;;  %4583 = vmatpush3.bf16.xpose.msra.mxu1 %v1560_v29  ;;  %4586 = vmatprep.mubr.msk.bf16.mxu1 %vm1372_vm1, %v1210_v33 }
 0x300   : > { %v4843_v42 = vunpack.i.l.bf16 %v4842_v40  ;;  %4719 = vmatprep.subr.msk.bf16.mxu0 %vm1372_vm1, %v1285_v36  ;;  %4721 = vmatprep.subr.msk.bf16.mxu1 %vm1372_vm1, %v1287_v35  ;;  %v1503_v43 = vsel %vm1372_vm1, %v1285_v36, 0  ;;  %v4844_v44 = vunpack.i.h.bf16 %v4842_v40  ;;  %v1214_v9 = vpack.c.bf16 %v4868_v1, %v4859_v5 }
 0x301   : > { %4577 = vmatpush3.bf16.xpose.msra.mxu0 %v1503_v43  ;;  %v4877_v6 = vpop.permute.xlu0 %4876  ;;  %v1215_v35 = vpack.c.bf16 %v4869_v26, %v4869_v26 }
 0x302   : > { %v1208_v30 = vpack.c.bf16 %v4843_v42, %v4834_v41  ;;  %4722 = vmatprep.subr.msk.bf16.mxu0 %vm1372_vm1, %v5751_v54  ;;  %v1209_v62 = vpack.c.bf16 %v4844_v44, %v4844_v44  ;;  %v1291_v54 = vpack.c.bf16 %v4858_v4, %v4858_v4  ;;  %v4878_v18 = vunpack.i.l.bf16 %v4877_v6 }
 0x303   : > { %v4852_v47 = vpop.permute.xlu1 %4851  ;;  %v4879_v19 = vunpack.i.h.bf16 %v4877_v6  ;;  %v1856_v6 = vadd.s32 16, %v5688_v48 }
 0x304   : > { %v4854_v50 = vunpack.i.h.bf16 %v4852_v47  ;;  %v4853_v52 = vunpack.i.l.bf16 %v4852_v47  ;;  %4578 = vmatprep.mubr.msk.bf16.mxu0 %vm1372_vm1, %v1208_v30  ;;  %v1683_v24 = vsel %vm1372_vm1, %v1291_v54, 0  ;;  %v1293_v28 = vpack.c.bf16 %v4878_v18, %v4878_v18 }
 0x305   : > { %v4882_v34 = vpop.permute.xlu0 %4881 }
 0x306   : > { %v1290_v53 = vpack.c.bf16 %v4854_v50, %v4853_v52  ;;  %v4883_v17 = vunpack.i.l.bf16 %v4882_v34  ;;  %v1743_v41 = vsel %vm1372_vm1, %v1293_v28, 0  ;;  %v4884_v30 = vunpack.i.h.bf16 %v4882_v34 }
 0x307   : > { %v4862_v63 = vpop.permute.xlu1 %4861  ;;  %4585 = vmatpush3.bf16.xpose.msra.mxu1 %v1563_v61 }
 0x308   : > { %4724 = vmatprep.subr.msk.bf16.mxu1 %vm1372_vm1, %v1290_v53  ;;  %4579 = vmatmul.mubr.msk.bf16.vlgmr.msra.gmra.mrb[12].mxu0 %vm1372_vm1, %v1209_v62  ;;  %v4864_v11 = vunpack.i.h.bf16 %v4862_v63  ;;  %v4863_v12 = vunpack.i.l.bf16 %v4862_v63  ;;  %v1680_v46 = vsel %vm1372_vm1, %v1290_v53, 0  ;;  %v1216_v27 = vpack.c.bf16 %v4883_v17, %v4879_v19 }
 0x309   : > { %4591 = vmatpush3.bf16.xpose.msra.mxu0 %v1620_v2  ;;  %4594 = vmatprep.mubr.msk.bf16.mxu0 %vm1372_vm1, %v1212_v57  ;;  %v1200_v39 = vpop.permute.xlu0 %1199  ;;  %v1217_v55 = vpack.c.bf16 %v4884_v30, %v4884_v30  ;;  %v1357_v62 = vpack.c.bf16 %v5772_v56, %v5772_v56 }
 0x30a   : > { %4723 = vmatprep.subr.msk.bf16.mxu0 %vm1372_vm1, %v1289_v3  ;;  %v1292_v57 = vpack.c.bf16 %v4864_v11, %v4863_v12  ;;  %v1219_v0 = vpack.c.bf16 %v1200_v39, %v1200_v39 }
 0x30b   : > { %v4872_v7 = vpop.permute.xlu1 %4871  ;;  %v2181_v2 = vsel %vm2179_vm2, %v1357_v62, 0 }
 0x30c   : > { %v4874_v15 = vunpack.i.h.bf16 %v4872_v7  ;;  %v4873_v16 = vunpack.i.l.bf16 %v4872_v7  ;;  %v1740_v33 = vsel %vm1372_vm1, %v1292_v57, 0  ;;  %v1858_v7 = vand.u32 127, %v881_v38 }
 0x30d   : > { %v1304_v44 = vpop.permute.xlu0 %1303 }
 0x30e   : > { %4587 = vmatmul.mubr.msk.bf16.vlgmr.msra.gmra.mrb[20].mxu1 %vm1372_vm1, %v1211_v8  ;;  %v1294_v20 = vpack.c.bf16 %v4874_v15, %v4873_v16  ;;  %v1359_v3 = vpack.c.bf16 %v1304_v44, %v1304_v44  ;;  %v1855_v8 = vadd.s32 8, %v5688_v48  ;;  %vm5865_vm3 = vcmp.ge.s32.totalorder %v1856_v6, %v1858_v7 }
 0x30f   : > { %4599 = vmatpush3.bf16.xpose.msra.mxu1 %v1680_v46  ;;  %4602 = vmatprep.mubr.msk.bf16.mxu1 %vm1372_vm1, %v1214_v9  ;;  %v1276_v32 = vpop.permute.xlu1 %1275  ;;  %vm5870_vm4 = vcmp.ge.s32.totalorder %v5688_v48, %v1858_v7 }
 0x310   : > { %4725 = vmatprep.subr.msk.bf16.mxu1 %vm1372_vm1, %v1291_v54  ;;  %v1295_v22 = vpack.c.bf16 %v1276_v32, %v1276_v32  ;;  %v1800_v29 = vsel %vm1372_vm1, %v1294_v20, 0  ;;  %vm5878_vm6 = vcmp.ge.s32.totalorder %v1855_v8, %v1858_v7 }
 0x311   : > { %4593 = vmatpush3.bf16.xpose.msra.mxu0 %v1623_v13  ;;  %v4902_v63 = vpop.permute.xlu0 %4901 }
 0x312   : > { %4726 = vmatprep.subr.msk.bf16.mxu0 %vm1372_vm1, %v1292_v57  ;;  %v1803_v47 = vsel %vm1372_vm1, %v1295_v22, 0  ;;  %v4904_v4 = vunpack.i.h.bf16 %v4902_v63  ;;  %v4903_v5 = vunpack.i.l.bf16 %v4902_v63 }
 0x313   : > { %v4887_v23 = vpop.permute.xlu1 %4886 }
 0x314   : > { %v4889_v21 = vunpack.i.h.bf16 %v4887_v23  ;;  %v4888_v31 = vunpack.i.l.bf16 %v4887_v23  ;;  %v5859_v56 = vpack.c.bf16 %v4904_v4, %v4903_v5 }
 0x316   : > { %v1218_v36 = vpack.c.bf16 %v4889_v21, %v4888_v31 }
 0x317   : > { %4601 = vmatpush3.bf16.xpose.msra.mxu1 %v1683_v24  ;;  %v4892_v40 = vpop.permute.xlu1 %4891 }
 0x318   : > { %4728 = vmatprep.subr.msk.bf16.mxu1 %vm1372_vm1, %v1294_v20  ;;  %4595 = vmatmul.mubr.msk.bf16.vlgmr.msra.gmra.mrb[16].mxu0 %vm1372_vm1, %v1213_v25  ;;  %v4894_v42 = vunpack.i.h.bf16 %v4892_v40  ;;  %v4893_v43 = vunpack.i.l.bf16 %v4892_v40 }
 0x319   : > { %4607 = vmatpush3.bf16.xpose.msra.mxu0 %v1740_v33  ;;  %4610 = vmatprep.mubr.msk.bf16.mxu0 %vm1372_vm1, %v1216_v27 }
 0x31a   : > { %4727 = vmatprep.subr.msk.bf16.mxu0 %vm1372_vm1, %v1293_v28  ;;  %v1358_v50 = vpack.c.bf16 %v4894_v42, %v4893_v43 }
 0x31b   : > { %v4897_v52 = vpop.permute.xlu1 %4896 }
 0x31c   : > { %v4899_v53 = vunpack.i.h.bf16 %v4897_v52  ;;  %v4898_v61 = vunpack.i.l.bf16 %v4897_v52  ;;  %v5936_v52 = vpop.permute.xlu0 %1333 }
 0x31e   : > { %4603 = vmatmul.mubr.msk.bf16.vlgmr.msra.gmra.mrb[24].mxu1 %vm1372_vm1, %v1215_v35  ;;  %v5852_v1 = vpack.c.bf16 %v4899_v53, %v4898_v61 }
 0x31f   : > { %4615 = vmatpush3.bf16.xpose.msra.mxu1 %v1800_v29  ;;  %4618 = vmatprep.mubr.msk.bf16.mxu1 %vm1372_vm1, %v1218_v36 }
 0x320   : > { %4729 = vmatprep.subr.msk.bf16.mxu1 %vm1372_vm1, %v1295_v22 }
 0x321   : > { %4609 = vmatpush3.bf16.xpose.msra.mxu0 %v1743_v41 }
 0x322   : > { %4622 = vmatprep.subr.bf16.mxu0 %v5715_v10 }
 0x327   : > { %4617 = vmatpush3.bf16.xpose.msra.mxu1 %v1803_v47 }
 0x328   : > { %4630 = vmatprep.subr.bf16.mxu1 %v1358_v50  ;;  %4611 = vmatmul.mubr.msk.bf16.vlgmr.msra.gmra.mrb[20].mxu0 %vm1372_vm1, %v1217_v55  ;;  %v5938_v55 = vpop.permute.xlu1 %1312 }
 0x329   : > { %4623 = vmatpush3.bf16.msra.mxu0 %v5715_v10  ;;  %v2238_v10 = vsel %vm2179_vm2, %v1359_v3, 0 }
 0x32a   : > { %4730 = vmatprep.subr.msk.bf16.mxu0 %vm2179_vm2, %v1357_v62 }
 0x32d   : > { %4625 = vmatpush3.bf16.msra.mxu0 %v2181_v2 }
 0x32e   : > { %4619 = vmatmul.mubr.msk.bf16.vlgmr.msra.gmra.mrb[28].mxu1 %vm1372_vm1, %v1219_v0  ;;  %4638 = vmatprep.subr.bf16.mxu0 %v5852_v1  ;;  %v5948_v0 = vpop.permute.xlu1 %1321 }
 0x32f   : > { %4631 = vmatpush3.bf16.msra.mxu1 %v1358_v50 }
 0x330   : > { %4731 = vmatprep.subr.msk.bf16.mxu1 %vm2179_vm2, %v1359_v3 }
 0x333   : > { %4633 = vmatpush3.bf16.msra.mxu1 %v2238_v10 }
 0x334   : > { %4646 = vmatprep.subr.bf16.mxu1 %v5859_v56 }
 0x35a   : > { %v4564_v12 = vpop.f32.mrb[12].mxu1 }
 0x35b   : > { %v5876_v54 = vsel %vm5865_vm3, %v4564_v12, -1e+30  ;;  %v1419_v46 = vpop.f32.mrb[13].mxu1 }
 0x35c   : > { %v5884_v32 = vsel %vm5870_vm4, %v1419_v46, -1e+30  ;;  %v4565_v34 = vpop.f32.mrb[14].mxu1  ;;  %v1899_v57 = vsel %vm1892_vm5, %v5876_v54, -inf }
 0x35d   : > { %v1422_v13 = vpop.f32.mrb[15].mxu1  ;;  %1900 = vmax.xlane.f32.xlu0 %v1899_v57  ;;  %v1893_v15 = vsel %vm1892_vm5, %v5884_v32, -inf }
 0x35e   : > { %v5892_v16 = vsel %vm5878_vm6, %v1422_v13, -1e+30  ;;  %1894 = vmax.xlane.f32.xlu1 %v1893_v15  ;;  %v5967_v13 = vpop.permute.xlu1 %4906 }
 0x35f   : > { %v1896_v17 = vsel %vm1892_vm5, %v5892_v16, -inf }
 0x361   : > { %1897 = vmax.xlane.f32.xlu0 %v1896_v17 }
 0x3d1   : > { %v4572_v18 = vpop.f32.mrb[16].mxu1 }
 0x3d2   : > { %v5898_v19 = vsel %vm5865_vm3, %v4572_v18, -1e+30  ;;  %v1479_v20 = vpop.f32.mrb[17].mxu1 }
 0x3d3   : > { %v4573_v23 = vpop.f32.mrb[18].mxu1  ;;  %v1908_v24 = vsel %vm1892_vm5, %v5898_v19, -inf  ;;  %v5904_v25 = vsel %vm5870_vm4, %v1479_v20, -1e+30 }
 0x3d4   : > { %1909 = vmax.xlane.f32.xlu0 %v1908_v24  ;;  %v1482_v26 = vpop.f32.mrb[19].mxu1  ;;  %v1902_v27 = vsel %vm1892_vm5, %v5904_v25, -inf }
 0x3d5   : > { %v5932_v30 = vsel %vm5878_vm6, %v1482_v26, -1e+30 }
 0x3d6   : > { %v1905_v61 = vsel %vm1892_vm5, %v5932_v30, -inf }
 0x3d8   : > { %1903 = vmax.xlane.f32.xlu0 %v1902_v27 }
 0x3db   : > { %v4580_v28 = vpop.f32.mrb[12].mxu0 }
 0x3dc   : > { %v5910_v21 = vsel %vm5865_vm3, %v4580_v28, -1e+30  ;;  %v1539_v31 = vpop.f32.mrb[13].mxu0 }
 0x3dd   : > { %v4581_v33 = vpop.f32.mrb[14].mxu0  ;;  %v1917_v35 = vsel %vm1892_vm5, %v5910_v21, -inf  ;;  %v5916_v36 = vsel %vm5870_vm4, %v1539_v31, -1e+30 }
 0x3de   : > { %v1542_v22 = vpop.f32.mrb[15].mxu0  ;;  %1918 = vmax.xlane.f32.xlu1 %v1917_v35  ;;  %v1911_v42 = vsel %vm1892_vm5, %v5916_v36, -inf }
 0x3df   : > { %v5920_v29 = vsel %vm5878_vm6, %v1542_v22, -1e+30 }
 0x3e0   : > { %v1914_v39 = vsel %vm1892_vm5, %v5920_v29, -inf }
 0x3e1   : > { %v4588_v40 = vpop.f32.mrb[20].mxu1  ;;  %1915 = vmax.xlane.f32.xlu0 %v1914_v39 }
 0x3e2   : > { %v5926_v41 = vsel %vm5865_vm3, %v4588_v40, -1e+30  ;;  %v1599_v43 = vpop.f32.mrb[21].mxu1  ;;  %1912 = vmax.xlane.f32.xlu1 %v1911_v42 }
 0x3e3   : > { %v4589_v44 = vpop.f32.mrb[22].mxu1  ;;  %v1926_v47 = vsel %vm1892_vm5, %v5926_v41, -inf  ;;  %v5942_v53 = vsel %vm5870_vm4, %v1599_v43, -1e+30 }
 0x3e4   : > { %v1602_v50 = vpop.f32.mrb[23].mxu1  ;;  %v1920_v62 = vsel %vm1892_vm5, %v5942_v53, -inf }
 0x3e5   : > { %1927 = vmax.xlane.f32.xlu0 %v1926_v47  ;;  %v5977_v20 = vsel %vm5878_vm6, %v1602_v50, -1e+30 }
 0x3e6   : > { %1906 = vmax.xlane.f32.xlu1 %v1905_v61  ;;  %v1923_v33 = vsel %vm1892_vm5, %v5977_v20, -inf }
 0x3e9   : > { %1921 = vmax.xlane.f32.xlu0 %v1920_v62 }
 0x3ea   : > { %v1901_v63 = vpop.xlane.xlu0 %1900 }
 0x3eb   : > { %v4596_v2 = vpop.f32.mrb[16].mxu0  ;;  %v1967_v27 = vsub.f32 %v5876_v54, %v1901_v63  ;;  %v1895_v28 = vpop.xlane.xlu1 %1894 }
 0x3ec   : > { %v5952_v3 = vsel %vm5865_vm3, %v4596_v2, -1e+30  ;;  %v1659_v4 = vpop.f32.mrb[17].mxu0  ;;  %v1965_v22 = vsub.f32 %v5884_v32, %v1895_v28 }
 0x3ed   : > { %v4597_v5 = vpop.f32.mrb[18].mxu0  ;;  %v1935_v6 = vsel %vm1892_vm5, %v5952_v3, -inf  ;;  %v5958_v7 = vsel %vm5870_vm4, %v1659_v4, -1e+30  ;;  %v1993_v35 = vmul.f32 1.442695, %v1967_v27 }
 0x3ee   : > { %v1898_v10 = vpop.xlane.xlu0 %1897  ;;  %v1662_v8 = vpop.f32.mrb[19].mxu0  ;;  %1936 = vmax.xlane.f32.xlu1 %v1935_v6  ;;  %v1929_v17 = vsel %vm1892_vm5, %v5958_v7, -inf  ;;  %v1989_v54 = vmul.f32 1.442695, %v1965_v22 }
 0x3ef   : > { %v5962_v12 = vsel %vm5878_vm6, %v1662_v8, -1e+30  ;;  %v1966_v46 = vsub.f32 %v5892_v16, %v1898_v10 }
 0x3f0   : > { %v1932_v34 = vsel %vm1892_vm5, %v5962_v12, -inf }
 0x3f1   : > { %v4604_v57 = vpop.f32.mrb[24].mxu1  ;;  %1933 = vmax.xlane.f32.xlu0 %v1932_v34  ;;  %v1991_v24 = vmul.f32 1.442695, %v1966_v46 }
 0x3f2   : > { %v5971_v15 = vsel %vm5865_vm3, %v4604_v57, -1e+30  ;;  %v1719_v18 = vpop.f32.mrb[25].mxu1  ;;  %1930 = vmax.xlane.f32.xlu1 %v1929_v17 }
 0x3f3   : > { %v4605_v16 = vpop.f32.mrb[26].mxu1  ;;  %v1944_v23 = vsel %vm1892_vm5, %v5971_v15, -inf  ;;  %v5984_v31 = vsel %vm5870_vm4, %v1719_v18, -1e+30  ;;  %5052 = vpow2.f32 %v1991_v24 }
 0x3f4   : > { %v1722_v26 = vpop.f32.mrb[27].mxu1  ;;  %v1938_v39 = vsel %vm1892_vm5, %v5984_v31, -inf  ;;  %5054 = vpow2.f32 %v1993_v35 }
 0x3f5   : > { %1945 = vmax.xlane.f32.xlu0 %v1944_v23  ;;  %5056 = vpow2.f32 %v1989_v54  ;;  %v6013_v10 = vsel %vm5878_vm6, %v1722_v26, -1e+30 }
 0x3f6   : > { %1924 = vmax.xlane.f32.xlu1 %v1923_v33  ;;  %v1941_v57 = vsel %vm1892_vm5, %v6013_v10, -inf }
 0x3f9   : > { %1939 = vmax.xlane.f32.xlu0 %v1938_v39 }
 0x3fb   : > { %v4612_v40 = vpop.f32.mrb[20].mxu0 }
 0x3fc   : > { %v5993_v42 = vsel %vm5865_vm3, %v4612_v40, -1e+30  ;;  %v1779_v43 = vpop.f32.mrb[21].mxu0 }
 0x3fd   : > { %v4613_v44 = vpop.f32.mrb[22].mxu0  ;;  %v1953_v47 = vsel %vm1892_vm5, %v5993_v42, -inf  ;;  %v5999_v50 = vsel %vm5870_vm4, %v1779_v43, -1e+30  ;;  %v6007_v2 = vpop.eup %5052 }
 0x3fe   : > { %v1782_v32 = vpop.f32.mrb[23].mxu0  ;;  %1954 = vmax.xlane.f32.xlu1 %v1953_v47  ;;  %v1947_v4 = vsel %vm1892_vm5, %v5999_v50, -inf  ;;  %v2040_v46 = vsel %vm1892_vm5, %v6007_v2, 0.0  ;;  %v6023_v17 = vpop.eup %5054 }
 0x3ff   : > { %v6003_v61 = vsel %vm5878_vm6, %v1782_v32, -1e+30  ;;  %v2043_v9 = vsel %vm1892_vm5, %v6023_v17, 0.0  ;;  %v6033_v23 = vpop.eup %5056 }
 0x400   : > { %v1950_v62 = vsel %vm1892_vm5, %v6003_v61, -inf  ;;  %v2037_v26 = vsel %vm1892_vm5, %v6033_v23, 0.0 }
 0x401   : > { %v4620_v63 = vpop.f32.mrb[28].mxu1  ;;  %1951 = vmax.xlane.f32.xlu0 %v1950_v62 }
 0x402   : > { %v1839_v5 = vpop.f32.mrb[29].mxu1  ;;  %1948 = vmax.xlane.f32.xlu1 %v1947_v4  ;;  %v6019_v34 = vsel %vm5865_vm3, %v4620_v63, -1e+30 }
 0x403   : > { %v4621_v6 = vpop.f32.mrb[30].mxu1  ;;  %v1962_v18 = vsel %vm1892_vm5, %v6019_v34, -inf  ;;  %v6029_v16 = vsel %vm5870_vm4, %v1839_v5, -1e+30 }
 0x404   : > { %v1842_v8 = vpop.f32.mrb[31].mxu1  ;;  %v1956_v24 = vsel %vm1892_vm5, %v6029_v16, -inf }
 0x405   : > { %2041 = vadd.xlane.f32.xlu0 %v2040_v46  ;;  %v6041_v27 = vsel %vm5878_vm6, %v1842_v8, -1e+30 }
 0x406   : > { %1942 = vmax.xlane.f32.xlu1 %v1941_v57  ;;  %v1959_v11 = vsel %vm1892_vm5, %v6041_v27, -inf }
 0x409   : > { %1963 = vmax.xlane.f32.xlu0 %v1962_v18 }
 0x40a   : > { %2044 = vadd.xlane.f32.xlu1 %v2043_v9 }
 0x40d   : > { %1957 = vmax.xlane.f32.xlu0 %v1956_v24 }
 0x40e   : > { %2038 = vadd.xlane.f32.xlu1 %v2037_v26 }
 0x412   : > { %1960 = vmax.xlane.f32.xlu1 %v1959_v11 }
 0x423   : > { %4916 = vrot.lane.b32.xlu0 %v5743_v45, %s5315_s22  ;;  %4911 = vrot.lane.b32.xlu1 %v5743_v45, %s5316_s20 }
 0x461   : > { %v1910_v28 = vpop.xlane.xlu0 %1909 }
 0x462   : > { %v1970_v33 = vsub.f32 %v5898_v19, %v1910_v28 }
 0x464   : > { %v1999_v35 = vmul.f32 1.442695, %v1970_v33 }
 0x465   : > { %v1904_v22 = vpop.xlane.xlu0 %1903 }
 0x466   : > { %5058 = vpow2.f32 %v1999_v35  ;;  %v1968_v38 = vsub.f32 %v5904_v25, %v1904_v22 }
 0x468   : > { %v1995_v39 = vmul.f32 1.442695, %v1968_v38 }
 0x46a   : > { %5060 = vpow2.f32 %v1995_v39 }
 0x46b   : > { %v1919_v40 = vpop.xlane.xlu1 %1918 }
 0x46c   : > { %v1973_v54 = vsub.f32 %v5910_v21, %v1919_v40 }
 0x46e   : > { %v2005_v43 = vmul.f32 1.442695, %v1973_v54  ;;  %v1916_v44 = vpop.xlane.xlu0 %1915 }
 0x46f   : > { %v1972_v32 = vsub.f32 %v5920_v29, %v1916_v44  ;;  %v1913_v45 = vpop.xlane.xlu1 %1912 }
 0x470   : > { %v6052_v47 = vpop.eup %5058  ;;  %5062 = vpow2.f32 %v2005_v43  ;;  %v1971_v19 = vsub.f32 %v5916_v36, %v1913_v45 }
 0x471   : > { %v2052_v62 = vsel %vm1892_vm5, %v6052_v47, 0.0  ;;  %v2003_v63 = vmul.f32 1.442695, %v1972_v32 }
 0x472   : > { %2053 = vadd.xlane.f32.xlu0 %v2052_v62  ;;  %v2001_v25 = vmul.f32 1.442695, %v1971_v19  ;;  %v1928_v4 = vpop.xlane.xlu0 %1927 }
 0x473   : > { %5064 = vpow2.f32 %v2003_v63  ;;  %v1976_v21 = vsub.f32 %v5926_v41, %v1928_v4  ;;  %v1907_v6 = vpop.xlane.xlu1 %1906 }
 0x474   : > { %v6058_v5 = vpop.eup %5060  ;;  %5066 = vpow2.f32 %v2001_v25  ;;  %v1969_v29 = vsub.f32 %v5932_v30, %v1907_v6 }
 0x475   : > { %v2046_v8 = vsel %vm1892_vm5, %v6058_v5, 0.0  ;;  %v2011_v36 = vmul.f32 1.442695, %v1976_v21 }
 0x476   : > { %2047 = vadd.xlane.f32.xlu0 %v2046_v8  ;;  %v1997_v46 = vmul.f32 1.442695, %v1969_v29  ;;  %v1922_v57 = vpop.xlane.xlu0 %1921 }
 0x477   : > { %5068 = vpow2.f32 %v2011_v36  ;;  %v1974_v18 = vsub.f32 %v5942_v53, %v1922_v57 }
 0x478   : > { %5070 = vpow2.f32 %v1997_v46 }
 0x479   : > { %v2007_v9 = vmul.f32 1.442695, %v1974_v18 }
 0x47a   : > { %v6065_v24 = vpop.eup %5062 }
 0x47b   : > { %5072 = vpow2.f32 %v2007_v9  ;;  %v1937_v41 = vpop.xlane.xlu1 %1936  ;;  %v2061_v26 = vsel %vm1892_vm5, %v6065_v24, 0.0 }
 0x47c   : > { %v1979_v30 = vsub.f32 %v5952_v3, %v1937_v41  ;;  %2062 = vadd.xlane.f32.xlu1 %v2061_v26 }
 0x47d   : > { %v6070_v11 = vpop.eup %5064 }
 0x47e   : > { %v6072_v28 = vpop.eup %5066  ;;  %v2017_v33 = vmul.f32 1.442695, %v1979_v30  ;;  %v1934_v35 = vpop.xlane.xlu0 %1933  ;;  %v2058_v53 = vsel %vm1892_vm5, %v6070_v11, 0.0 }
 0x47f   : > { %v1978_v22 = vsub.f32 %v5962_v12, %v1934_v35  ;;  %v1931_v38 = vpop.xlane.xlu1 %1930  ;;  %2059 = vadd.xlane.f32.xlu0 %v2058_v53  ;;  %v2055_v39 = vsel %vm1892_vm5, %v6072_v28, 0.0 }
 0x480   : > { %5074 = vpow2.f32 %v2017_v33  ;;  %v1977_v3 = vsub.f32 %v5958_v7, %v1931_v38  ;;  %2056 = vadd.xlane.f32.xlu1 %v2055_v39 }
 0x481   : > { %v6080_v40 = vpop.eup %5068  ;;  %v2015_v54 = vmul.f32 1.442695, %v1978_v22 }
 0x482   : > { %v6082_v43 = vpop.eup %5070  ;;  %v2013_v44 = vmul.f32 1.442695, %v1977_v3  ;;  %v1946_v32 = vpop.xlane.xlu0 %1945  ;;  %v2070_v45 = vsel %vm1892_vm5, %v6080_v40, 0.0 }
 0x483   : > { %5076 = vpow2.f32 %v2015_v54  ;;  %v1982_v12 = vsub.f32 %v5971_v15, %v1946_v32  ;;  %v1925_v19 = vpop.xlane.xlu1 %1924  ;;  %2071 = vadd.xlane.f32.xlu0 %v2070_v45  ;;  %v2049_v62 = vsel %vm1892_vm5, %v6082_v43, 0.0 }
 0x484   : > { %5078 = vpow2.f32 %v2013_v44  ;;  %v1975_v7 = vsub.f32 %v5977_v20, %v1925_v19  ;;  %2050 = vadd.xlane.f32.xlu1 %v2049_v62 }
 0x485   : > { %v6090_v63 = vpop.eup %5072  ;;  %v2023_v25 = vmul.f32 1.442695, %v1982_v12 }
 0x486   : > { %v2009_v4 = vmul.f32 1.442695, %v1975_v7  ;;  %v1940_v21 = vpop.xlane.xlu0 %1939  ;;  %v2064_v6 = vsel %vm1892_vm5, %v6090_v63, 0.0 }
 0x487   : > { %5080 = vpow2.f32 %v2023_v25  ;;  %v1980_v15 = vsub.f32 %v5984_v31, %v1940_v21  ;;  %2065 = vadd.xlane.f32.xlu0 %v2064_v6 }
 0x488   : > { %5082 = vpow2.f32 %v2009_v4 }
 0x489   : > { %v2019_v29 = vmul.f32 1.442695, %v1980_v15 }
 0x48a   : > { %v6095_v8 = vpop.eup %5074 }
 0x48b   : > { %5084 = vpow2.f32 %v2019_v29  ;;  %v1955_v36 = vpop.xlane.xlu1 %1954  ;;  %v2079_v20 = vsel %vm1892_vm5, %v6095_v8, 0.0 }
 0x48c   : > { %v1985_v46 = vsub.f32 %v5993_v42, %v1955_v36  ;;  %2080 = vadd.xlane.f32.xlu1 %v2079_v20 }
 0x48d   : > { %v6100_v57 = vpop.eup %5076 }
 0x48e   : > { %v6102_v18 = vpop.eup %5078  ;;  %v2029_v9 = vmul.f32 1.442695, %v1985_v46  ;;  %v1952_v41 = vpop.xlane.xlu0 %1951  ;;  %v2076_v31 = vsel %vm1892_vm5, %v6100_v57, 0.0 }
 0x48f   : > { %v1984_v26 = vsub.f32 %v6003_v61, %v1952_v41  ;;  %v1949_v30 = vpop.xlane.xlu1 %1948  ;;  %2077 = vadd.xlane.f32.xlu0 %v2076_v31  ;;  %v2073_v33 = vsel %vm1892_vm5, %v6102_v18, 0.0 }
 0x490   : > { %5086 = vpow2.f32 %v2029_v9  ;;  %v1983_v42 = vsub.f32 %v5999_v50, %v1949_v30  ;;  %2074 = vadd.xlane.f32.xlu1 %v2073_v33 }
 0x491   : > { %v6110_v35 = vpop.eup %5080  ;;  %v2027_v22 = vmul.f32 1.442695, %v1984_v26 }
 0x492   : > { %v6112_v53 = vpop.eup %5082  ;;  %v2025_v38 = vmul.f32 1.442695, %v1983_v42  ;;  %v2042_v39 = vpop.xlane.xlu0 %2041  ;;  %v2088_v3 = vsel %vm1892_vm5, %v6110_v35, 0.0 }
 0x493   : > { %v1943_v61 = vpop.xlane.xlu1 %1942  ;;  %2089 = vadd.xlane.f32.xlu0 %v2088_v3  ;;  %v2067_v54 = vsel %vm1892_vm5, %v6112_v53, 0.0 }
 0x494   : > { %5088 = vpow2.f32 %v2025_v38  ;;  %v1981_v44 = vsub.f32 %v6013_v10, %v1943_v61  ;;  %2068 = vadd.xlane.f32.xlu1 %v2067_v54 }
 0x495   : > { %v6119_v50 = vpop.eup %5084  ;;  %5090 = vpow2.f32 %v2027_v22 }
 0x496   : > { %v2021_v32 = vmul.f32 1.442695, %v1981_v44  ;;  %v1964_v45 = vpop.xlane.xlu0 %1963  ;;  %v2082_v12 = vsel %vm1892_vm5, %v6119_v50, 0.0 }
 0x497   : > { %v1988_v19 = vsub.f32 %v6019_v34, %v1964_v45  ;;  %v2045_v62 = vpop.xlane.xlu1 %2044  ;;  %2083 = vadd.xlane.f32.xlu0 %v2082_v12 }
 0x498   : > { %5092 = vpow2.f32 %v2021_v32 }
 0x499   : > { %v2035_v7 = vmul.f32 1.442695, %v1988_v19  ;;  %5094 = vrcp.f32 %v2045_v62 }
 0x49a   : > { %v6124_v25 = vpop.eup %5086  ;;  %5096 = vrcp.f32 %v2042_v39  ;;  %v1958_v10 = vpop.xlane.xlu0 %1957 }
 0x49b   : > { %5098 = vpow2.f32 %v2035_v7  ;;  %v1986_v4 = vsub.f32 %v6029_v16, %v1958_v10  ;;  %v2039_v21 = vpop.xlane.xlu1 %2038  ;;  %v2097_v6 = vsel %vm1892_vm5, %v6124_v25, 0.0 }
 0x49c   : > { %5100 = vrcp.f32 %v2039_v21  ;;  %2098 = vadd.xlane.f32.xlu1 %v2097_v6 }
 0x49d   : > { %v2031_v15 = vmul.f32 1.442695, %v1986_v4 }
 0x49e   : > { %v6129_v34 = vpop.eup %5088 }
 0x49f   : > { %5102 = vpow2.f32 %v2031_v15  ;;  %v1961_v29 = vpop.xlane.xlu1 %1960  ;;  %v2091_v36 = vsel %vm1892_vm5, %v6129_v34, 0.0  ;;  %v6133_v20 = vpop.eup %5090 }
 0x4a0   : > { %v1987_v46 = vsub.f32 %v6041_v27, %v1961_v29  ;;  %2092 = vadd.xlane.f32.xlu0 %v2091_v36  ;;  %v2094_v31 = vsel %vm1892_vm5, %v6133_v20, 0.0 }
 0x4a2   : > { %v6136_v16 = vpop.eup %5092  ;;  %v2033_v9 = vmul.f32 1.442695, %v1987_v46 }
 0x4a3   : > { %v5095_v41 = vpop.eup %5094  ;;  %v2085_v26 = vsel %vm1892_vm5, %v6136_v16, 0.0  ;;  %v4912_v45 = vpop.permute.xlu1 %4911 }
 0x4a4   : > { %v5097_v30 = vpop.eup %5096  ;;  %5104 = vpow2.f32 %v2033_v9  ;;  %2095 = vadd.xlane.f32.xlu0 %v2094_v31  ;;  %2086 = vadd.xlane.f32.xlu1 %v2085_v26  ;;  %v2135_v27 = vmul.f32 %v5095_v41, %v6023_v17  ;;  %v1361_v17 = vpack.c.bf16 %v5938_v55, %v5938_v55 }
 0x4a5   : > { %v6142_v33 = vpop.eup %5098  ;;  %v2134_v39 = vmul.f32 %v5097_v30, %v6007_v2 }
 0x4a6   : > { %v5101_v42 = vpop.eup %5100  ;;  %v2106_v22 = vsel %vm1892_vm5, %v6142_v33, 0.0  ;;  %v2158_v44 = vpack.c.bf16 %v2135_v27, %v2135_v27  ;;  %v2295_v32 = vsel %vm2179_vm2, %v1361_v17, 0 }
 0x4a7   : > { %v2133_v38 = vmul.f32 %v5101_v42, %v6033_v23 }
 0x4a8   : > { %2107 = vadd.xlane.f32.xlu1 %v2106_v22 }
 0x4a9   : > { %v6149_v3 = vpop.eup %5102  ;;  %v2157_v61 = vpack.c.bf16 %v2134_v39, %v2133_v38 }
 0x4aa   : > { %v2100_v54 = vsel %vm1892_vm5, %v6149_v3, 0.0 }
 0x4ab   : > { %4626 = vmatprep.mubr.msk.bf16.mxu0 %vm1892_vm5, %v2157_v61  ;;  %2101 = vadd.xlane.f32.xlu0 %v2100_v54  ;;  %v4913_v54 = vunpack.i.l.bf16 %v4912_v45 }
 0x4ac   : > { %4627 = vmatmul.mubr.msk.bf16.vlgmr.msra.gmra.mrb[24].mxu0 %vm1892_vm5, %v2158_v44 }
 0x4ad   : > { %4639 = vmatpush3.bf16.msra.mxu0 %v5852_v1  ;;  %v6169_v1 = vpop.permute.xlu0 %4916 }
 0x4ae   : > { %v6158_v23 = vpop.eup %5104  ;;  %4732 = vmatprep.subr.msk.bf16.mxu0 %vm2179_vm2, %v1361_v17  ;;  %v4909_v17 = vunpack.i.h.bf16 %v5967_v13 }
 0x4af   : > { %v2103_v2 = vsel %vm1892_vm5, %v6158_v23, 0.0 }
 0x4b0   : > { %2104 = vadd.xlane.f32.xlu1 %v2103_v2  ;;  %v4908_v2 = vunpack.i.l.bf16 %v5967_v13 }
 0x4b1   : > { %4641 = vmatpush3.bf16.msra.mxu0 %v2295_v32 }
 0x4b2   : > { %4654 = vmatprep.subr.bf16.mxu0 %v5758_v58 }
 0x4c1   : > { %1351 = vrot.lane.b32.xlu0 %v5782_v60, %s5315_s22  ;;  %1342 = vrot.lane.b32.xlu1 %v5782_v60, %s5316_s20 }
 0x4ff   : > { %v2054_v55 = vpop.xlane.xlu0 %2053 }
 0x503   : > { %v2048_v12 = vpop.xlane.xlu0 %2047 }
 0x509   : > { %v2063_v19 = vpop.xlane.xlu1 %2062 }
 0x50a   : > { %5106 = vrcp.f32 %v2063_v19 }
 0x50c   : > { %v2060_v62 = vpop.xlane.xlu0 %2059 }
 0x50d   : > { %5108 = vrcp.f32 %v2060_v62  ;;  %v2057_v7 = vpop.xlane.xlu1 %2056 }
 0x50e   : > { %5110 = vrcp.f32 %v2057_v7 }
 0x50f   : > { %5112 = vrcp.f32 %v2054_v55 }
 0x510   : > { %5114 = vrcp.f32 %v2048_v12  ;;  %v2072_v4 = vpop.xlane.xlu0 %2071 }
 0x511   : > { %v2051_v10 = vpop.xlane.xlu1 %2050 }
 0x512   : > { %5116 = vrcp.f32 %v2051_v10 }
 0x514   : > { %v5107_v21 = vpop.eup %5106  ;;  %v2066_v36 = vpop.xlane.xlu0 %2065 }
 0x515   : > { %v2141_v29 = vmul.f32 %v5107_v21, %v6065_v24  ;;  %v1365_v24 = vpack.c.bf16 %v5782_v60, %v5782_v60  ;;  %v1363_v60 = vpack.c.bf16 %v5948_v0, %v5948_v0 }
 0x517   : > { %v5109_v6 = vpop.eup %5108  ;;  %v2162_v38 = vpack.c.bf16 %v2141_v29, %v2141_v29  ;;  %v2352_v55 = vsel %vm2179_vm2, %v1363_v60, 0 }
 0x518   : > { %v5111_v15 = vpop.eup %5110  ;;  %v2140_v46 = vmul.f32 %v5109_v6, %v6070_v11 }
 0x519   : > { %v5113_v9 = vpop.eup %5112  ;;  %v2081_v41 = vpop.xlane.xlu1 %2080  ;;  %v2139_v31 = vmul.f32 %v5111_v15, %v6072_v28  ;;  %v4914_v28 = vunpack.i.h.bf16 %v4912_v45  ;;  %v1366_v45 = vpack.c.bf16 %v4909_v17, %v4908_v2 }
 0x51a   : > { %v5115_v26 = vpop.eup %5114  ;;  %5118 = vrcp.f32 %v2081_v41  ;;  %v2138_v27 = vmul.f32 %v5113_v9, %v6052_v47 }
 0x51b   : > { %v2161_v30 = vpack.c.bf16 %v2140_v46, %v2139_v31  ;;  %v2136_v11 = vmul.f32 %v5115_v26, %v6058_v5  ;;  %v1368_v32 = vpack.c.bf16 %v4914_v28, %v4913_v54  ;;  %v1367_v31 = vpack.c.bf16 %v5936_v52, %v5936_v52 }
 0x51c   : > { %v5117_v42 = vpop.eup %5116  ;;  %v2078_v22 = vpop.xlane.xlu0 %2077  ;;  %v2160_v44 = vpack.c.bf16 %v2138_v27, %v2138_v27  ;;  %v4919_v26 = vunpack.i.h.bf16 %v6169_v1 }
 0x51d   : > { %5120 = vrcp.f32 %v2078_v22  ;;  %4642 = vmatprep.mubr.msk.bf16.mxu0 %vm1892_vm5, %v2161_v30  ;;  %v2075_v39 = vpop.xlane.xlu1 %2074  ;;  %v2137_v61 = vmul.f32 %v5117_v42, %v6082_v43  ;;  %v2409_v43 = vsel %vm2179_vm2, %v1365_v24, 0 }
 0x51e   : > { %5122 = vrcp.f32 %v2075_v39  ;;  %4643 = vmatmul.mubr.msk.bf16.vlgmr.msra.gmra.mrb[28].mxu0 %vm1892_vm5, %v2162_v38 }
 0x51f   : > { %5124 = vrcp.f32 %v2072_v4  ;;  %4655 = vmatpush3.bf16.msra.mxu0 %v5758_v58  ;;  %v2159_v47 = vpack.c.bf16 %v2137_v61, %v2136_v11 }
 0x520   : > { %5126 = vrcp.f32 %v2066_v36  ;;  %4734 = vmatprep.subr.msk.bf16.mxu0 %vm2179_vm2, %v1365_v24  ;;  %v2090_v58 = vpop.xlane.xlu0 %2089 }
 0x521   : > { %4634 = vmatprep.mubr.msk.bf16.mxu1 %vm1892_vm5, %v2159_v47  ;;  %v2069_v5 = vpop.xlane.xlu1 %2068 }
 0x522   : > { %5128 = vrcp.f32 %v2069_v5  ;;  %4635 = vmatmul.mubr.msk.bf16.vlgmr.msra.gmra.mrb[32].mxu1 %vm1892_vm5, %v2160_v44 }
 0x523   : > { %4647 = vmatpush3.bf16.msra.mxu1 %v5859_v56  ;;  %4657 = vmatpush3.bf16.msra.mxu0 %v2409_v43  ;;  %5130 = vrcp.f32 %v2090_v58 }
 0x524   : > { %4733 = vmatprep.subr.msk.bf16.mxu1 %vm2179_vm2, %v1363_v60  ;;  %4670 = vmatprep.subr.bf16.mxu0 %v1368_v32  ;;  %v5119_v0 = vpop.eup %5118  ;;  %v2084_v10 = vpop.xlane.xlu0 %2083 }
 0x525   : > { %v2147_v13 = vmul.f32 %v5119_v0, %v6095_v8 }
 0x527   : > { %v5121_v12 = vpop.eup %5120  ;;  %4649 = vmatpush3.bf16.msra.mxu1 %v2352_v55  ;;  %v2166_v29 = vpack.c.bf16 %v2147_v13, %v2147_v13 }
 0x528   : > { %v5123_v19 = vpop.eup %5122  ;;  %4662 = vmatprep.subr.bf16.mxu1 %v1366_v45  ;;  %v2146_v62 = vmul.f32 %v5121_v12, %v6100_v57 }
 0x529   : > { %v5125_v7 = vpop.eup %5124  ;;  %v2145_v56 = vmul.f32 %v5123_v19, %v6102_v18  ;;  %v2099_v36 = vpop.xlane.xlu1 %2098 }
 0x52a   : > { %v5127_v4 = vpop.eup %5126  ;;  %v2144_v15 = vmul.f32 %v5125_v7, %v6080_v40 }
 0x52b   : > { %v2165_v21 = vpack.c.bf16 %v2146_v62, %v2145_v56  ;;  %v2142_v9 = vmul.f32 %v5127_v4, %v6090_v63  ;;  %v4918_v63 = vunpack.i.l.bf16 %v6169_v1  ;;  %v4953_v56 = vld [vmem:[%s5511_s14 + $0x8] sm:$0xff]   ;;  %v4954_v4 = vld [vmem:[%s5511_s14 + $0x10] sm:$0xff]  }
 0x52c   : > { %v5129_v6 = vpop.eup %5128  ;;  %v2164_v18 = vpack.c.bf16 %v2144_v15, %v2144_v15 }
 0x52d   : > { %v2093_v46 = vpop.xlane.xlu0 %2092  ;;  %4658 = vmatprep.mubr.msk.bf16.mxu0 %vm1892_vm5, %v2165_v21  ;;  %v2143_v8 = vmul.f32 %v5129_v6, %v6112_v53  ;;  %v2466_v53 = vsel %vm2179_vm2, %v1367_v31, 0  ;;  %v1370_v30 = vpack.c.bf16 %v4919_v26, %v4918_v63  ;;  %v5131_v27 = vpop.eup %5130  ;;  %v4955_v21 = vld [vmem:[%s5511_s14 + $0x18] sm:$0xff]   ;;  %v4956_v6 = vld [vmem:[%s5511_s14 + $0x20] sm:$0xff]  }
 0x52e   : > { %4659 = vmatmul.mubr.msk.bf16.vlgmr.msra.gmra.mrb[32].mxu0 %vm1892_vm5, %v2166_v29  ;;  %5132 = vrcp.f32 %v2093_v46  ;;  %v2150_v24 = vmul.f32 %v5131_v27, %v6110_v35  ;;  %v4957_v29 = vld [vmem:[%s5511_s14 + $0x28] sm:$0xff]  }
 0x52f   : > { %4671 = vmatpush3.bf16.msra.mxu0 %v1368_v32  ;;  %v2163_v57 = vpack.c.bf16 %v2143_v8, %v2142_v9  ;;  %5134 = vrcp.f32 %v2084_v10  ;;  %v4952_v10 = vld [vmem:[%s5511_s14] sm:$0xff]  }
 0x530   : > { %v2168_v2 = vpack.c.bf16 %v2150_v24, %v2150_v24 }
 0x531   : > { %v2096_v41 = vpop.xlane.xlu0 %2095  ;;  %4650 = vmatprep.mubr.msk.bf16.mxu1 %vm1892_vm5, %v2163_v57  ;;  %v2087_v40 = vpop.xlane.xlu1 %2086 }
 0x532   : > { %5136 = vrcp.f32 %v2096_v41  ;;  %4651 = vmatmul.mubr.msk.bf16.vlgmr.msra.gmra.mrb[36].mxu1 %vm1892_vm5, %v2164_v18  ;;  %v4958_v18 = vld [vmem:[%s5511_s14 + $0x30] sm:$0xff]  }
 0x533   : > { %5138 = vrcp.f32 %v2087_v40  ;;  %4663 = vmatpush3.bf16.msra.mxu1 %v1366_v45 }
 0x534   : > { %4735 = vmatprep.subr.msk.bf16.mxu1 %vm2179_vm2, %v1367_v31  ;;  %5140 = vrcp.f32 %v2099_v36 }
 0x535   : > { %v2108_v42 = vpop.xlane.xlu1 %2107 }
 0x536   : > { %5142 = vrcp.f32 %v2108_v42 }
 0x537   : > { %4665 = vmatpush3.bf16.msra.mxu1 %v2466_v53  ;;  %v4959_v53 = vld [vmem:[%s5511_s14 + $0x38] sm:$0xff]   ;;  %s6780_s14 = scalar_lea.vmem %s6733_s7, %s5496_s15 }
 0x538   : > { %4678 = vmatprep.subr.bf16.mxu1 %v1370_v30  ;;  %v2102_v52 = vpop.xlane.xlu0 %2101  ;;  %v5133_v22 = vpop.eup %5132 }
 0x539   : > { %v5135_v38 = vpop.eup %5134  ;;  %5144 = vrcp.f32 %v2102_v52  ;;  %v2151_v61 = vmul.f32 %v5133_v22, %v6129_v34 }
 0x53a   : > { %v2148_v54 = vmul.f32 %v5135_v38, %v6119_v50 }
 0x53c   : > { %v5137_v1 = vpop.eup %5136  ;;  %v1352_v5 = vpop.permute.xlu0 %1351 }
 0x53d   : > { %v5139_v39 = vpop.eup %5138  ;;  %v2105_v11 = vpop.xlane.xlu1 %2104  ;;  %v2152_v28 = vmul.f32 %v5137_v1, %v6133_v20  ;;  %v1371_v32 = vpack.c.bf16 %v1352_v5, %v1352_v5 }
 0x53e   : > { %5146 = vrcp.f32 %v2105_v11  ;;  %v2149_v47 = vmul.f32 %v5139_v39, %v6136_v16  ;;  %v5141_v44 = vpop.eup %5140 }
 0x53f   : > { %v2169_v60 = vpack.c.bf16 %v2152_v28, %v2151_v61  ;;  %v2153_v35 = vmul.f32 %v5141_v44, %v6124_v25  ;;  %v2580_v25 = vsel %vm2179_vm2, %v1371_v32, 0 }
 0x540   : > { %v2167_v43 = vpack.c.bf16 %v2149_v47, %v2148_v54  ;;  %v5143_v20 = vpop.eup %5142 }
 0x541   : > { %4674 = vmatprep.mubr.msk.bf16.mxu0 %vm1892_vm5, %v2169_v60  ;;  %v1343_v17 = vpop.permute.xlu1 %1342  ;;  %v2170_v58 = vpack.c.bf16 %v2153_v35, %v2153_v35  ;;  %v2156_v55 = vmul.f32 %v5143_v20, %v6142_v33 }
 0x542   : > { %4666 = vmatprep.mubr.msk.bf16.mxu1 %vm1892_vm5, %v2167_v43  ;;  %v1369_v34 = vpack.c.bf16 %v1343_v17, %v1343_v17 }
 0x543   : > { %4667 = vmatmul.mubr.msk.bf16.vlgmr.msra.gmra.mrb[40].mxu1 %vm1892_vm5, %v2168_v2  ;;  %v5145_v16 = vpop.eup %5144  ;;  %v2172_v13 = vpack.c.bf16 %v2156_v55, %v2156_v55 }
 0x544   : > { %v2523_v50 = vsel %vm2179_vm2, %v1369_v34, 0  ;;  %4679 = vmatpush3.bf16.msra.mxu1 %v1370_v30  ;;  %4736 = vmatprep.subr.msk.bf16.mxu0 %vm2179_vm2, %v1369_v34  ;;  %v2154_v45 = vmul.f32 %v5145_v16, %v6149_v3 }
 0x545   : > { %4737 = vmatprep.subr.msk.bf16.mxu1 %vm2179_vm2, %v1371_v32  ;;  %4673 = vmatpush3.bf16.msra.mxu0 %v2523_v50 }
 0x546   : > { %4686 = vmatprep.subr.bf16.mxu0 %v5311_v14 }
 0x548   : > { %v5147_v0 = vpop.eup %5146  ;;  %4681 = vmatpush3.bf16.msra.mxu1 %v2580_v25  ;;  %4675 = vmatmul.mubr.msk.bf16.vlgmr.msra.gmra.mrb[36].mxu0 %vm1892_vm5, %v2170_v58 }
 0x549   : > { %v2155_v12 = vmul.f32 %v5147_v0, %v6158_v23  ;;  %4702 = vmatprep.mubr.msk.bf16.mxu0 %vm5313_vm0, %v5311_v14  ;;  %4687 = vmatpush3.bf16.msra.mxu0 %v4952_v10 }
 0x54a   : > { %4688 = vmatprep.subr.bf16.mxu0 %v5311_v14 }
 0x54b   : > { %v2171_v19 = vpack.c.bf16 %v2155_v12, %v2154_v45 }
 0x54d   : > { %4682 = vmatprep.mubr.msk.bf16.mxu1 %vm1892_vm5, %v2171_v19  ;;  %4689 = vmatpush3.bf16.msra.mxu0 %v4953_v56 }
 0x54e   : > { %4683 = vmatmul.mubr.msk.bf16.vlgmr.msra.gmra.mrb[44].mxu1 %vm1892_vm5, %v2172_v13  ;;  %4690 = vmatprep.subr.bf16.mxu0 %v5311_v14 }
 0x54f   : > { %3198 = vmatprep.mubr.bf16.mxu1 %v5312_v59 }
 0x551   : > { %4691 = vmatpush3.bf16.msra.mxu0 %v4954_v4 }
 0x552   : > { %4692 = vmatprep.subr.bf16.mxu0 %v5311_v14 }
 0x555   : > { %4693 = vmatpush3.bf16.msra.mxu0 %v4955_v21 }
 0x556   : > { %4694 = vmatprep.subr.bf16.mxu0 %v5311_v14 }
 0x559   : > { %4695 = vmatpush3.bf16.msra.mxu0 %v4956_v6 }
 0x55a   : > { %4696 = vmatprep.subr.bf16.mxu0 %v5311_v14 }
 0x55d   : > { %4697 = vmatpush3.bf16.msra.mxu0 %v4957_v29 }
 0x55e   : > { %4698 = vmatprep.subr.bf16.mxu0 %v5311_v14 }
 0x561   : > { %4699 = vmatpush3.bf16.msra.mxu0 %v4958_v18 }
 0x562   : > { %4700 = vmatprep.subr.bf16.mxu0 %v5311_v14 }
 0x565   : > { %4701 = vmatpush3.bf16.msra.mxu0 %v4959_v53 }
 0x57f   : > { %v6232_v33 = vpop.f32.mrb[24].mxu0 }
 0x580   : > { %v6234_v62 = vpop.f32.mrb[25].mxu0 }
 0x581   : > { %v4629_v3 = vpop.f32.mrb[26].mxu0 }
 0x582   : > { %v6236_v23 = vpop.f32.mrb[27].mxu0 }
 0x583   : > { %v2630_v7 = vpack.c.bf16 %v6236_v23, %v6234_v62 }
 0x5f1   : > { %v4644_v15 = vpop.f32.mrb[28].mxu0 }
 0x5f2   : > { %v2331_v36 = vpop.f32.mrb[29].mxu0  ;;  %v2635_v17 = vpack.c.bf16 %v4644_v15, %v4644_v15 }
 0x5f3   : > { %v4645_v46 = vpop.f32.mrb[30].mxu0 }
 0x5f4   : > { %v2334_v9 = vpop.f32.mrb[31].mxu0 }
 0x5f5   : > { %v2634_v8 = vpack.c.bf16 %v2334_v9, %v2331_v36  ;;  %v4636_v57 = vpop.f32.mrb[32].mxu1 }
 0x5f6   : > { %v2633_v41 = vpack.c.bf16 %v4636_v57, %v4636_v57  ;;  %v2274_v40 = vpop.f32.mrb[33].mxu1 }
 0x5f7   : > { %v4637_v31 = vpop.f32.mrb[34].mxu1 }
 0x5f8   : > { %2650 = vrot.lane.b32.xlu0 %v2633_v41, %s5315_s22  ;;  %v2277_v26 = vpop.f32.mrb[35].mxu1 }
 0x5f9   : > { %v2632_v63 = vpack.c.bf16 %v2277_v26, %v2274_v40 }
 0x5fb   : > { %2648 = vrot.lane.b32.xlu1 %v2632_v63, %s5315_s22 }
 0x5fc   : > { %2654 = vrot.lane.b32.xlu0 %v2634_v8, %s5316_s20 }
 0x601   : > { %v6258_v30 = vpop.f32.mrb[32].mxu0 }
 0x602   : > { %v2445_v42 = vpop.f32.mrb[33].mxu0  ;;  %v2639_v41 = vpack.c.bf16 %v6258_v30, %v6258_v30  ;;  %v4289_v30 = vld [vmem:[%s6779_s24] ss:$0 sm:$0xff] }
 0x603   : > { %v4661_v27 = vpop.f32.mrb[34].mxu0 }
 0x604   : > { %v2448_v52 = vpop.f32.mrb[35].mxu0 }
 0x605   : > { %v2638_v22 = vpack.c.bf16 %v2448_v52, %v2445_v42  ;;  %v4652_v38 = vpop.f32.mrb[36].mxu1 }
 0x606   : > { %v2388_v1 = vpop.f32.mrb[37].mxu1  ;;  %v2637_v0 = vpack.c.bf16 %v4652_v38, %v4652_v38 }
 0x607   : > { %v4653_v39 = vpop.f32.mrb[38].mxu1 }
 0x608   : > { %v2391_v24 = vpop.f32.mrb[39].mxu1 }
 0x609   : > { %v2636_v11 = vpack.c.bf16 %v2391_v24, %v2388_v1  ;;  %v5208_v1 = vld [vmem:[%s6769_s2] sm:$0xff] }
 0x60b   : > { %2660 = vrot.lane.b32.xlu1 %v2636_v11, %s5314_s19 }
 0x616   : > { %v4668_v61 = vpop.f32.mrb[40].mxu1 }
 0x617   : > { %v2502_v28 = vpop.f32.mrb[41].mxu1  ;;  %v2641_v32 = vpack.c.bf16 %v4668_v61, %v4668_v61  ;;  %v5209_v61 = vld [vmem:[%s6769_s2 + $0x8] sm:$0xff] }
 0x618   : > { %v4669_v54 = vpop.f32.mrb[42].mxu1 }
 0x619   : > { %v2505_v47 = vpop.f32.mrb[43].mxu1 }
 0x61a   : > { %v2640_v44 = vpack.c.bf16 %v2505_v47, %v2502_v28 }
 0x61b   : > { %v4676_v60 = vpop.f32.mrb[36].mxu0 }
 0x61c   : > { %2683 = vrot.lane.b32.xlu0 %v2640_v44, %s5315_s22  ;;  %v2559_v5 = vpop.f32.mrb[37].mxu0  ;;  %v2643_v55 = vpack.c.bf16 %v4676_v60, %v4676_v60 }
 0x61d   : > { %v4677_v43 = vpop.f32.mrb[38].mxu0 }
 0x61e   : > { %v2562_v2 = vpop.f32.mrb[39].mxu0 }
 0x61f   : > { %v2642_v35 = vpack.c.bf16 %v2562_v2, %v2559_v5  ;;  %v5210_v5 = vld [vmem:[%s6769_s2 + $0x10] sm:$0xff] }
 0x620   : > { %2656 = vrot.lane.b32.xlu0 %v2635_v17, %s5316_s20 }
 0x621   : > { %v4684_v34 = vpop.f32.mrb[44].mxu1  ;;  %2689 = vrot.lane.b32.xlu1 %v2642_v35, %s5316_s20  ;;  %v5211_v35 = vld [vmem:[%s6769_s2 + $0x18] sm:$0xff] }
 0x622   : > { %v2616_v50 = vpop.f32.mrb[45].mxu1  ;;  %v2645_v25 = vpack.c.bf16 %v4684_v34, %v4684_v34 }
 0x623   : > { %v4685_v20 = vpop.f32.mrb[46].mxu1 }
 0x624   : > { %2685 = vrot.lane.b32.xlu0 %v2641_v32, %s5315_s22  ;;  %v2619_v16 = vpop.f32.mrb[47].mxu1 }
 0x625   : > { %v2644_v58 = vpack.c.bf16 %v2619_v16, %v2616_v50 }
 0x627   : > { %2695 = vrot.lane.b32.xlu1 %v2644_v58, %s5314_s19  ;;  %v5212_v58 = vld [vmem:[%s6769_s2 + $0x20] sm:$0xff] }
 0x628   : > { %2697 = vrot.lane.b32.xlu0 %v2645_v25, %s5314_s19 }
 0x62b   : > { %2662 = vrot.lane.b32.xlu1 %v2637_v0, %s5314_s19 }
 0x62f   : > { %2691 = vrot.lane.b32.xlu1 %v2643_v55, %s5316_s20 }
 0x66a   : > { %v2651_v45 = vpop.permute.xlu0 %2650 }
 0x66d   : > { %v2649_v12 = vpop.permute.xlu1 %2648 }
 0x66e   : > { %v2666_v19 = vsel %vm1372_vm1, %v2630_v7, %v2649_v12  ;;  %v2655_v13 = vpop.permute.xlu0 %2654  ;;  %v2631_v7 = vpack.c.bf16 %v6232_v33, %v6232_v33 }
 0x66f   : > { %v2672_v3 = vsel %vm2670_vm7, %v2666_v19, %v2655_v13  ;;  %v4960_v19 = vld [vmem:[%s5534_s5] ss:$16 sps:$4 sm:$0xff]   ;;  %v4962_v13 = vld [vmem:[%s5534_s5 + $0x4] ss:$16 sps:$4 sm:$0xff]  }
 0x670   : > { %v2669_v36 = vsel %vm1372_vm1, %v2631_v7, %v2651_v45  ;;  %v5213_v45 = vld [vmem:[%s6769_s2 + $0x28] sm:$0xff]  ;;  %3166 = vmatprep.subr.bf16.mxu1 %v4962_v13 }
 0x671   : > { %3167 = vmatpush1.bf16.msra.mxu1 %v4960_v19 }
 0x67d   : > { %v2661_v10 = vpop.permute.xlu1 %2660 }
 0x67e   : > { %v2677_v56 = vsel %vm2675_vm8, %v2672_v3, %v2661_v10  ;;  %v4963_v3 = vld [vmem:[%s5534_s5 + $0x8] ss:$16 sps:$4 sm:$0xff]   ;;  %v4965_v10 = vld [vmem:[%s5534_s5 + $0xc] ss:$16 sps:$4 sm:$0xff]  }
 0x67f   : > { %4703 = vmatmul.mubr.bf16.vlgmr.msra.gmra.mrb[40].mxu0 %v2677_v56  ;;  %v4968_v56 = vld [vmem:[%s5534_s5 + $0x24] ss:$16 sps:$4 sm:$0xff]   ;;  %3229 = vmatprep.subr.bf16.mxu0 %v4965_v10 }
 0x680   : > { %4706 = vmatprep.mubr.msk.bf16.mxu0 %vm5313_vm0, %v5311_v14  ;;  %3230 = vmatpush1.bf16.msra.mxu0 %v4963_v3 }
 0x681   : > { %3168 = vmatprep.subr.bf16.mxu1 %v4968_v56 }
 0x68e   : > { %v2684_v4 = vpop.permute.xlu0 %2683 }
 0x68f   : > { %v2701_v15 = vsel %vm1372_vm1, %v2638_v22, %v2684_v4  ;;  %v4971_v4 = vld [vmem:[%s5534_s5 + $0x2c] ss:$16 sps:$4 sm:$0xff]  }
 0x690   : > { %3231 = vmatprep.subr.bf16.mxu0 %v4971_v4 }
 0x692   : > { %v2657_v6 = vpop.permute.xlu0 %2656 }
 0x693   : > { %v2690_v21 = vpop.permute.xlu1 %2689  ;;  %v2674_v9 = vsel %vm2670_vm7, %v2669_v36, %v2657_v6  ;;  %v4969_v6 = vld [vmem:[%s5534_s5 + $0x28] ss:$16 sps:$4 sm:$0xff]  }
 0x694   : > { %v2706_v62 = vsel %vm2670_vm7, %v2701_v15, %v2690_v21  ;;  %v4966_v21 = vld [vmem:[%s5534_s5 + $0x20] ss:$16 sps:$4 sm:$0xff]   ;;  %3232 = vmatpush1.bf16.msra.mxu0 %v4969_v6 }
 0x695   : > { %3169 = vmatpush1.bf16.msra.mxu1 %v4966_v21 }
 0x696   : > { %v2686_v46 = vpop.permute.xlu0 %2685 }
 0x697   : > { %v2704_v33 = vsel %vm1372_vm1, %v2639_v41, %v2686_v46  ;;  %v4975_v41 = vld [vmem:[%s5534_s5 + $0x48] ss:$16 sps:$4 sm:$0xff]  }
 0x699   : > { %v2696_v23 = vpop.permute.xlu1 %2695 }
 0x69a   : > { %v2710_v29 = vsel %vm2675_vm8, %v2706_v62, %v2696_v23  ;;  %v2698_v26 = vpop.permute.xlu0 %2697 }
 0x69b   : > { %v2716_v8 = vrot.slane %v2710_v29, 4 }
 0x69d   : > { %v2663_v57 = vpop.permute.xlu1 %2662 }
 0x69e   : > { %v2680_v18 = vsel %vm2675_vm8, %v2674_v9, %v2663_v57  ;;  %v4977_v57 = vld [vmem:[%s5534_s5 + $0x4c] ss:$16 sps:$4 sm:$0xff]  }
 0x69f   : > { %v2721_v40 = vsel %vm2179_vm2, %v2680_v18, %v2716_v8  ;;  %v4972_v18 = vld [vmem:[%s5534_s5 + $0x40] ss:$16 sps:$4 sm:$0xff]   ;;  %3233 = vmatprep.subr.bf16.mxu0 %v4977_v57 }
 0x6a0   : > { %4707 = vmatmul.mubr.bf16.gmra.mrb[44].mxu0 %v2721_v40  ;;  %v4980_v40 = vld [vmem:[%s5534_s5 + $0x64] ss:$16 sps:$4 sm:$0xff]   ;;  %v4299_v57 = vld [vmem:[%s6781_s27] ss:$0 sm:$0xff] }
 0x6a1   : > { %v2692_v31 = vpop.permute.xlu1 %2691  ;;  %4710 = vmatprep.mubr.msk.bf16.mxu0 %vm5313_vm0, %v5311_v14  ;;  %3234 = vmatpush1.bf16.msra.mxu0 %v4975_v41 }
 0x6a2   : > { %v2708_v63 = vsel %vm2670_vm7, %v2704_v33, %v2692_v31  ;;  %v4983_v33 = vld [vmem:[%s5534_s5 + $0x6c] ss:$16 sps:$4 sm:$0xff]   ;;  %v4978_v31 = vld [vmem:[%s5534_s5 + $0x60] ss:$16 sps:$4 sm:$0xff]  }
 0x6a3   : > { %v2712_v53 = vsel %vm2675_vm8, %v2708_v63, %v2698_v26  ;;  %v4981_v26 = vld [vmem:[%s5534_s5 + $0x68] ss:$16 sps:$4 sm:$0xff]   ;;  %3235 = vmatprep.subr.bf16.mxu0 %v4983_v33  ;;  %v4986_v63 = vld [vmem:[%s5534_s5 + $0x84] ss:$16 sps:$4 sm:$0xff]  }
 0x6a4   : > { %v2717_v42 = vrot.slane %v2712_v53, 4  ;;  %v4989_v53 = vld [vmem:[%s5534_s5 + $0x8c] ss:$16 sps:$4 sm:$0xff]  }
 0x6a5   : > { %3236 = vmatpush1.bf16.msra.mxu0 %v4981_v26 }
 0x6a6   : > { %v2718_v27 = vsel %vm2179_vm2, %v2716_v8, %v2717_v42  ;;  %v4974_v8 = vld [vmem:[%s5534_s5 + $0x44] ss:$16 sps:$4 sm:$0xff]   ;;  %v4984_v42 = vld [vmem:[%s5534_s5 + $0x80] ss:$16 sps:$4 sm:$0xff]   ;;  %3237 = vmatprep.subr.bf16.mxu0 %v4989_v53 }
 0x6a7   : > { %3170 = vmatprep.subr.bf16.mxu1 %v4974_v8 }
 0x6a8   : > { %4711 = vmatmul.mubr.bf16.gmra.mrb[48].mxu0 %v2718_v27  ;;  %3171 = vmatpush1.bf16.msra.mxu1 %v4972_v18  ;;  %v4987_v27 = vld [vmem:[%s5534_s5 + $0x88] ss:$16 sps:$4 sm:$0xff]  }
 0x6a9   : > { %3261 = vmatprep.mubr.bf16.mxu0 %v5312_v59  ;;  %3172 = vmatprep.subr.bf16.mxu1 %v4980_v40 }
 0x6aa   : > { %3238 = vmatpush1.bf16.msra.mxu0 %v4987_v27 }
 0x6ac   : > { %3173 = vmatpush1.bf16.msra.mxu1 %v4978_v31 }
 0x6ad   : > { %3174 = vmatprep.subr.bf16.mxu1 %v4986_v63 }
 0x6b0   : > { %3175 = vmatpush1.bf16.msra.mxu1 %v4984_v42 }
 0x752   : > { %v2828_v52 = vpop.f32.mrb[40].mxu0 }
 0x753   : > { %v2829_v22 = vadd.f32 %v4289_v30, %v2828_v52  ;;  %v4704_v38 = vpop.f32.mrb[41].mxu0 }
 0x754   : > { %v2831_v14 = vpop.f32.mrb[42].mxu0  ;;  %v4995_v38 = vld [vmem:[%s5534_s5 + $0xac] ss:$16 sps:$4 sm:$0xff]  }
 0x755   : > { %v6303_v39 = vadd.f32 %v5208_v1, %v2829_v22  ;;  %v2832_v24 = vadd.f32 %v4289_v30, %v2831_v14  ;;  %v4705_v11 = vpop.f32.mrb[43].mxu0  ;;  %v4992_v22 = vld [vmem:[%s5534_s5 + $0xa4] ss:$16 sps:$4 sm:$0xff]   ;;  %v4990_v1 = vld [vmem:[%s5534_s5 + $0xa0] ss:$16 sps:$4 sm:$0xff]   ;;  %3239 = vmatprep.subr.bf16.mxu0 %v4995_v38 }
 0x756   : > { %3176 = vmatprep.subr.bf16.mxu1 %v4992_v22 }
 0x757   : > { %v6308_v28 = vadd.f32 %v5209_v61, %v2832_v24  ;;  %2859 = vadd.xlane.f32.xlu1 %v6303_v39  ;;  %v4993_v24 = vld [vmem:[%s5534_s5 + $0xa8] ss:$16 sps:$4 sm:$0xff]   ;;  %3177 = vmatpush1.bf16.msra.mxu1 %v4990_v1 }
 0x758   : > { %3240 = vmatpush1.bf16.msra.mxu0 %v4993_v24 }
 0x759   : > { %2861 = vadd.xlane.f32.xlu0 %v6308_v28 }
 0x773   : > { %v2836_v54 = vpop.f32.mrb[44].mxu0 }
 0x774   : > { %v2837_v47 = vadd.f32 %v4289_v30, %v2836_v54  ;;  %v4708_v44 = vpop.f32.mrb[45].mxu0 }
 0x775   : > { %v2839_v60 = vpop.f32.mrb[46].mxu0  ;;  %v4998_v44 = vld [vmem:[%s5534_s5 + $0xc4] ss:$16 sps:$4 sm:$0xff]  }
 0x776   : > { %v6315_v43 = vadd.f32 %v5210_v5, %v2837_v47  ;;  %v2840_v17 = vadd.f32 %v4289_v30, %v2839_v60  ;;  %v4709_v2 = vpop.f32.mrb[47].mxu0  ;;  %v4996_v47 = vld [vmem:[%s5534_s5 + $0xc0] ss:$16 sps:$4 sm:$0xff]   ;;  %v4999_v60 = vld [vmem:[%s5534_s5 + $0xc8] ss:$16 sps:$4 sm:$0xff]   ;;  %3178 = vmatprep.subr.bf16.mxu1 %v4998_v44 }
 0x777   : > { %v5001_v5 = vld [vmem:[%s5534_s5 + $0xcc] ss:$16 sps:$4 sm:$0xff]   ;;  %v5004_v2 = vld [vmem:[%s5534_s5 + $0xe4] ss:$16 sps:$4 sm:$0xff]   ;;  %3179 = vmatpush1.bf16.msra.mxu1 %v4996_v47 }
 0x778   : > { %2863 = vadd.xlane.f32.xlu0 %v6315_v43  ;;  %v6321_v34 = vadd.f32 %v5211_v35, %v2840_v17  ;;  %v5007_v35 = vld [vmem:[%s5534_s5 + $0xec] ss:$16 sps:$4 sm:$0xff]   ;;  %3241 = vmatprep.subr.bf16.mxu0 %v5001_v5 }
 0x779   : > { %3242 = vmatpush1.bf16.msra.mxu0 %v4999_v60  ;;  %3180 = vmatprep.subr.bf16.mxu1 %v5004_v2 }
 0x77a   : > { %3243 = vmatprep.subr.bf16.mxu0 %v5007_v35 }
 0x77b   : > { %v2844_v32 = vpop.f32.mrb[48].mxu0 }
 0x77c   : > { %v2845_v50 = vadd.f32 %v4289_v30, %v2844_v32  ;;  %2865 = vadd.xlane.f32.xlu0 %v6321_v34  ;;  %v4712_v20 = vpop.f32.mrb[49].mxu0 }
 0x77d   : > { %v2847_v16 = vpop.f32.mrb[50].mxu0 }
 0x77e   : > { %v6327_v25 = vadd.f32 %v5212_v58, %v2845_v50  ;;  %v2848_v0 = vadd.f32 %v4289_v30, %v2847_v16  ;;  %v4713_v55 = vpop.f32.mrb[51].mxu0  ;;  %v5002_v16 = vld [vmem:[%s5534_s5 + $0xe0] ss:$16 sps:$4 sm:$0xff]   ;;  %v5005_v58 = vld [vmem:[%s5534_s5 + $0xe8] ss:$16 sps:$4 sm:$0xff]  }
 0x77f   : > { %3181 = vmatpush1.bf16.msra.mxu1 %v5002_v16  ;;  %3244 = vmatpush1.bf16.msra.mxu0 %v5005_v58 }
 0x780   : > { %v6332_v12 = vadd.f32 %v5213_v45, %v2848_v0  ;;  %2867 = vadd.xlane.f32.xlu1 %v6327_v25 }
 0x782   : > { %2869 = vadd.xlane.f32.xlu0 %v6332_v12 }
 0x7e4   : > { %v2860_v15 = vpop.xlane.xlu1 %2859 }
 0x7e5   : > { %v2871_v62 = vmul.f32 0.0078125, %v2860_v15 }
 0x7e6   : > { %v2862_v23 = vpop.xlane.xlu0 %2861 }
 0x7e7   : > { %v6345_v7 = vsub.f32 %v6303_v39, %v2871_v62  ;;  %v2872_v29 = vmul.f32 0.0078125, %v2862_v23  ;;  %v4298_v23 = vld [vmem:[%s6780_s14] ss:$0 sm:$0xff] }
 0x7e9   : > { %v6348_v36 = vsub.f32 %v6308_v28, %v2872_v29  ;;  %v2883_v46 = vmul.f32 %v6345_v7, %v6345_v7 }
 0x7eb   : > { %2889 = vadd.xlane.f32.xlu1 %v2883_v46  ;;  %v2884_v9 = vmul.f32 %v6348_v36, %v6348_v36 }
 0x7ed   : > { %2891 = vadd.xlane.f32.xlu0 %v2884_v9 }
 0x805   : > { %v2864_v30 = vpop.xlane.xlu0 %2863 }
 0x806   : > { %v2873_v52 = vmul.f32 0.0078125, %v2864_v30 }
 0x808   : > { %v6369_v14 = vsub.f32 %v6315_v43, %v2873_v52 }
 0x809   : > { %v2866_v11 = vpop.xlane.xlu0 %2865 }
 0x80a   : > { %v2874_v61 = vmul.f32 0.0078125, %v2866_v11  ;;  %v2885_v54 = vmul.f32 %v6369_v14, %v6369_v14 }
 0x80c   : > { %v6380_v17 = vsub.f32 %v6321_v34, %v2874_v61  ;;  %2893 = vadd.xlane.f32.xlu1 %v2885_v54 }
 0x80d   : > { %v2868_v32 = vpop.xlane.xlu1 %2867 }
 0x80e   : > { %v2875_v50 = vmul.f32 0.0078125, %v2868_v32  ;;  %v2886_v20 = vmul.f32 %v6380_v17, %v6380_v17 }
 0x80f   : > { %v2870_v0 = vpop.xlane.xlu0 %2869 }
 0x810   : > { %v2881_v55 = vsub.f32 %v6327_v25, %v2875_v50  ;;  %v2876_v45 = vmul.f32 0.0078125, %v2870_v0  ;;  %2895 = vadd.xlane.f32.xlu0 %v2886_v20  ;;  %v5008_v0 = vld [vmem:[%s5545_s23 + $0x40] sm:$0xff]  }
 0x811   : > { %4462 = vmatprep.subr.bf16.mxu1 %v5008_v0 }
 0x812   : > { %v2882_v19 = vsub.f32 %v6332_v12, %v2876_v45  ;;  %v2887_v13 = vmul.f32 %v2881_v55, %v2881_v55  ;;  %v5010_v45 = vld [vmem:[%s5545_s23] sm:$0xff]  }
 0x814   : > { %2897 = vadd.xlane.f32.xlu1 %v2887_v13  ;;  %v2888_v3 = vmul.f32 %v2882_v19, %v2882_v19  ;;  %v5013_v13 = vld [vmem:[%s5545_s23 + $0xc8] sm:$0xff]  }
 0x816   : > { %2899 = vadd.xlane.f32.xlu0 %v2888_v3  ;;  %v5014_v3 = vld [vmem:[%s5545_s23 + $0x8] sm:$0xff]  }
 0x878   : > { %v2890_v10 = vpop.xlane.xlu1 %2889 }
 0x879   : > { %v2901_v56 = vmul.f32 0.0078125, %v2890_v10  ;;  %v5015_v10 = vld [vmem:[%s5545_s23 + $0x88] sm:$0xff]  }
 0x87a   : > { %v2892_v4 = vpop.xlane.xlu0 %2891 }
 0x87b   : > { %v2907_v21 = vadd.f32 1e-05, %v2901_v56  ;;  %v2902_v6 = vmul.f32 0.0078125, %v2892_v4  ;;  %v5016_v56 = vld [vmem:[%s5545_s23 + $0x50] sm:$0xff]  }
 0x87c   : > { %v5017_v4 = vld [vmem:[%s5545_s23 + $0xd0] sm:$0xff]  }
 0x87d   : > { %5148 = vrsqrt.f32 %v2907_v21  ;;  %v2908_v15 = vadd.f32 1e-05, %v2902_v6  ;;  %v5018_v21 = vld [vmem:[%s5545_s23 + $0x10] sm:$0xff]  }
 0x87e   : > { %v5019_v6 = vld [vmem:[%s5545_s23 + $0x90] sm:$0xff]  }
 0x87f   : > { %5150 = vrsqrt.f32 %v2908_v15  ;;  %v5020_v15 = vld [vmem:[%s5545_s23 + $0x58] sm:$0xff]  }
 0x887   : > { %v5149_v62 = vpop.eup %5148 }
 0x888   : > { %v2919_v29 = vmul.f32 %v5149_v62, %v6345_v7  ;;  %v5021_v62 = vld [vmem:[%s5545_s23 + $0xd8] sm:$0xff]  }
 0x889   : > { %v5151_v46 = vpop.eup %5150 }
 0x88a   : > { %v2920_v9 = vmul.f32 %v5151_v46, %v6348_v36  ;;  %v2931_v8 = vmul.f32 %v4298_v23, %v2919_v29  ;;  %v5023_v29 = vld [vmem:[%s5545_s23 + $0x98] sm:$0xff]   ;;  %v5024_v46 = vld [vmem:[%s5545_s23 + $0x60] sm:$0xff]  }
 0x88c   : > { %v2932_v18 = vmul.f32 %v4298_v23, %v2920_v9  ;;  %v2943_v41 = vadd.f32 %v4299_v57, %v2931_v8  ;;  %v5025_v9 = vld [vmem:[%s5545_s23 + $0xe0] sm:$0xff]  }
 0x88d   : > { %v5026_v8 = vld [vmem:[%s5545_s23 + $0x20] sm:$0xff]  }
 0x88e   : > { %v2944_v40 = vadd.f32 %v4299_v57, %v2932_v18  ;;  %v5028_v18 = vld [vmem:[%s5545_s23 + $0x68] sm:$0xff]  }
 0x890   : > { %v2949_v33 = vpack.c.bf16 %v2944_v40, %v2943_v41  ;;  %v5029_v41 = vld [vmem:[%s5545_s23 + $0xe8] sm:$0xff]  }
 0x891   : > { %v5030_v40 = vld [vmem:[%s5545_s23 + $0x28] sm:$0xff]  }
 0x892   : > { %3199 = vmatmul.mubr.bf16.vlgmr.msra.gmra.mrb[48].mxu1 %v2949_v33  ;;  %3262 = vmatmul.mubr.bf16.vlgmr.msra.gmra.mrb[52].mxu0 %v2949_v33  ;;  %v5031_v33 = vld [vmem:[%s5545_s23 + $0xa8] sm:$0xff]  }
 0x893   : > { %3208 = vmatprep.mubr.bf16.mxu1 %v5312_v59  ;;  %3271 = vmatprep.mubr.bf16.mxu0 %v5312_v59 }
 0x894   : > { %4463 = vmatpush3.bf16.msra.mxu1 %v5010_v45 }
 0x899   : > { %v2894_v7 = vpop.xlane.xlu1 %2893 }
 0x89a   : > { %v2903_v31 = vmul.f32 0.0078125, %v2894_v7  ;;  %v5032_v7 = vld [vmem:[%s5545_s23 + $0x70] sm:$0xff]  }
 0x89c   : > { %v2909_v26 = vadd.f32 1e-05, %v2903_v31  ;;  %v5033_v31 = vld [vmem:[%s5545_s23 + $0xf0] sm:$0xff]  }
 0x89d   : > { %v2896_v36 = vpop.xlane.xlu0 %2895 }
 0x89e   : > { %5152 = vrsqrt.f32 %v2909_v26  ;;  %v2904_v63 = vmul.f32 0.0078125, %v2896_v36  ;;  %v5034_v26 = vld [vmem:[%s5545_s23 + $0x30] sm:$0xff]  }
 0x89f   : > { %v5035_v36 = vld [vmem:[%s5545_s23 + $0xb0] sm:$0xff]  }
 0x8a0   : > { %v2910_v53 = vadd.f32 1e-05, %v2904_v63  ;;  %v5036_v63 = vld [vmem:[%s5545_s23 + $0x78] sm:$0xff]  }
 0x8a1   : > { %v2898_v42 = vpop.xlane.xlu1 %2897 }
 0x8a2   : > { %5154 = vrsqrt.f32 %v2910_v53  ;;  %v2905_v27 = vmul.f32 0.0078125, %v2898_v42  ;;  %v5037_v53 = vld [vmem:[%s5545_s23 + $0xf8] sm:$0xff]  }
 0x8a3   : > { %v2900_v30 = vpop.xlane.xlu0 %2899  ;;  %v5038_v42 = vld [vmem:[%s5545_s23 + $0x38] sm:$0xff]  }
 0x8a4   : > { %v2911_v52 = vadd.f32 1e-05, %v2905_v27  ;;  %v2906_v22 = vmul.f32 0.0078125, %v2900_v30  ;;  %v5039_v27 = vld [vmem:[%s5545_s23 + $0xb8] sm:$0xff]   ;;  %v2984_v30 = vld [vmem:[%s5540_s3] sm:$0xf] }
 0x8a6   : > { %5156 = vrsqrt.f32 %v2911_v52  ;;  %v2912_v38 = vadd.f32 1e-05, %v2906_v22  ;;  %v3000_v52 = vsub.s32 3, %v5688_v48  ;;  %v6444_v22 = vrot.slane %v2984_v30, %v883_v37 }
 0x8a8   : > { %v5153_v1 = vpop.eup %5152  ;;  %5158 = vrsqrt.f32 %v2912_v38  ;;  %v6448_v38 = vrot.slane %v2984_v30, %v891_v49 }
 0x8a9   : > { %v2921_v24 = vmul.f32 %v5153_v1, %v6369_v14  ;;  %v6452_v1 = vrot.slane %v2984_v30, %v887_v51 }
 0x8ab   : > { %v2933_v54 = vmul.f32 %v4298_v23, %v2921_v24  ;;  %v6454_v24 = vrot.slane %v2984_v30, %v3000_v52 }
 0x8ac   : > { %v5155_v11 = vpop.eup %5154 }
 0x8ad   : > { %v2922_v61 = vmul.f32 %v5155_v11, %v6380_v17  ;;  %v2945_v60 = vadd.f32 %v4299_v57, %v2933_v54 }
 0x8af   : > { %v2934_v47 = vmul.f32 %v4298_v23, %v2922_v61 }
 0x8b0   : > { %v5157_v44 = vpop.eup %5156 }
 0x8b1   : > { %v2946_v5 = vadd.f32 %v4299_v57, %v2934_v47  ;;  %v2923_v2 = vmul.f32 %v5157_v44, %v2881_v55  ;;  %v5009_v55 = vld [vmem:[%s5545_s23 + $0xc0] sm:$0xff]  }
 0x8b2   : > { %v5159_v35 = vpop.eup %5158  ;;  %4496 = vmatprep.subr.bf16.mxu0 %v5009_v55 }
 0x8b3   : > { %v2950_v32 = vpack.c.bf16 %v2946_v5, %v2945_v60  ;;  %v2924_v50 = vmul.f32 %v5159_v35, %v2882_v19  ;;  %v2935_v20 = vmul.f32 %v4298_v23, %v2923_v2  ;;  %v5011_v19 = vld [vmem:[%s5545_s23 + $0x80] sm:$0xff]  }
 0x8b4   : > { %4497 = vmatpush3.bf16.msra.mxu0 %v5011_v19 }
 0x8b5   : > { %3209 = vmatmul.mubr.bf16.gmra.mrb[52].mxu1 %v2950_v32  ;;  %3272 = vmatmul.mubr.bf16.gmra.mrb[56].mxu0 %v2950_v32  ;;  %v2936_v14 = vmul.f32 %v4298_v23, %v2924_v50  ;;  %v2947_v16 = vadd.f32 %v4299_v57, %v2935_v20  ;;  %v5022_v23 = vld [vmem:[%s5545_s23 + $0x18] sm:$0xff]  }
 0x8b6   : > { %3218 = vmatprep.mubr.bf16.mxu1 %v5312_v59  ;;  %3281 = vmatprep.mubr.bf16.mxu0 %v5312_v59  ;;  %v5012_v59 = vld [vmem:[%s5545_s23 + $0x48] sm:$0xff]  }
 0x8b7   : > { %v2948_v17 = vadd.f32 %v4299_v57, %v2936_v14  ;;  %4464 = vmatprep.subr.bf16.mxu1 %v5012_v59  ;;  %4498 = vmatprep.subr.bf16.mxu0 %v5013_v13  ;;  %v5027_v57 = vld [vmem:[%s5545_s23 + $0xa0] sm:$0xff]  }
 0x8b8   : > { %4465 = vmatpush3.bf16.msra.mxu1 %v5014_v3  ;;  %4499 = vmatpush3.bf16.msra.mxu0 %v5015_v10 }
 0x8b9   : > { %v2951_v58 = vpack.c.bf16 %v2948_v17, %v2947_v16  ;;  %4466 = vmatprep.subr.bf16.mxu1 %v5016_v56  ;;  %4500 = vmatprep.subr.bf16.mxu0 %v5017_v4 }
 0x8bc   : > { %4467 = vmatpush3.bf16.msra.mxu1 %v5018_v21  ;;  %4501 = vmatpush3.bf16.msra.mxu0 %v5019_v6 }
 0x8bd   : > { %3219 = vmatmul.mubr.bf16.gmra.mrb[56].mxu1 %v2951_v58  ;;  %3282 = vmatmul.mubr.bf16.gmra.mrb[60].mxu0 %v2951_v58 }
 0x8be   : > { %4468 = vmatprep.subr.bf16.mxu1 %v5020_v15  ;;  %4502 = vmatprep.subr.bf16.mxu0 %v5021_v62 }
 0x8c0   : > { %4469 = vmatpush3.bf16.msra.mxu1 %v5022_v23  ;;  %4503 = vmatpush3.bf16.msra.mxu0 %v5023_v29 }
 0x8c1   : > { %4470 = vmatprep.subr.bf16.mxu1 %v5024_v46  ;;  %4504 = vmatprep.subr.bf16.mxu0 %v5025_v9 }
 0x8c4   : > { %4471 = vmatpush3.bf16.msra.mxu1 %v5026_v8  ;;  %4505 = vmatpush3.bf16.msra.mxu0 %v5027_v57 }
 0x8c5   : > { %4472 = vmatprep.subr.bf16.mxu1 %v5028_v18  ;;  %4506 = vmatprep.subr.bf16.mxu0 %v5029_v41 }
 0x8c8   : > { %4473 = vmatpush3.bf16.msra.mxu1 %v5030_v40  ;;  %4507 = vmatpush3.bf16.msra.mxu0 %v5031_v33 }
 0x8c9   : > { %4474 = vmatprep.subr.bf16.mxu1 %v5032_v7  ;;  %4508 = vmatprep.subr.bf16.mxu0 %v5033_v31 }
 0x8cc   : > { %4475 = vmatpush3.bf16.msra.mxu1 %v5034_v26  ;;  %4509 = vmatpush3.bf16.msra.mxu0 %v5035_v36 }
 0x8cd   : > { %4476 = vmatprep.subr.bf16.mxu1 %v5036_v63  ;;  %4510 = vmatprep.subr.bf16.mxu0 %v5037_v53 }
 0x8d0   : > { %4477 = vmatpush3.bf16.msra.mxu1 %v5038_v42  ;;  %4511 = vmatpush3.bf16.msra.mxu0 %v5039_v27 }
 0x965   : > { %v3200_v11 = vpop.f32.mrb[48].mxu1  ;;  %v3263_v61 = vpop.f32.mrb[52].mxu0 }
 0x966   : > { %v6457_v54 = vadd.f32 %v3200_v11, %v6444_v22  ;;  %v6460_v47 = vadd.f32 %v3263_v61, %v6448_v38  ;;  %v3202_v37 = vpop.f32.mrb[49].mxu1  ;;  %v3265_v44 = vpop.f32.mrb[53].mxu0 }
 0x967   : > { %v6463_v60 = vadd.f32 %v3202_v37, %v6452_v1  ;;  %v6466_v49 = vadd.f32 %v3265_v44, %v6454_v24  ;;  %v3204_v48 = vpop.f32.mrb[50].mxu1  ;;  %v3267_v51 = vpop.f32.mrb[54].mxu0 }
 0x968   : > { %v3292_v5 = vmul.f32 %v6457_v54, %v6457_v54  ;;  %v3294_v2 = vmul.f32 %v6460_v47, %v6460_v47  ;;  %v6473_v35 = vadd.f32 %v3204_v48, %v6444_v22  ;;  %v6476_v32 = vadd.f32 %v3267_v51, %v6448_v38  ;;  %v3206_v50 = vpop.f32.mrb[51].mxu1  ;;  %v3269_v20 = vpop.f32.mrb[55].mxu0 }
 0x969   : > { %v3293_v14 = vmul.f32 %v6463_v60, %v6463_v60  ;;  %v3295_v17 = vmul.f32 %v6466_v49, %v6466_v49  ;;  %v6483_v16 = vadd.f32 %v3206_v50, %v6452_v1  ;;  %v6486_v58 = vadd.f32 %v3269_v20, %v6454_v24 }
 0x96a   : > { %v3316_v0 = vmul.f32 %v3292_v5, %v6457_v54  ;;  %v3318_v55 = vmul.f32 %v3294_v2, %v6460_v47  ;;  %v3296_v45 = vmul.f32 %v6473_v35, %v6473_v35  ;;  %v3298_v19 = vmul.f32 %v6476_v32, %v6476_v32 }
 0x96b   : > { %v3317_v59 = vmul.f32 %v3293_v14, %v6463_v60  ;;  %v3319_v13 = vmul.f32 %v3295_v17, %v6466_v49  ;;  %v3297_v3 = vmul.f32 %v6483_v16, %v6483_v16  ;;  %v3299_v10 = vmul.f32 %v6486_v58, %v6486_v58 }
 0x96c   : > { %v3340_v56 = vmul.f32 0.044715, %v3316_v0  ;;  %v3342_v4 = vmul.f32 0.044715, %v3318_v55  ;;  %v3320_v21 = vmul.f32 %v3296_v45, %v6473_v35  ;;  %v3322_v6 = vmul.f32 %v3298_v19, %v6476_v32 }
 0x96d   : > { %v3341_v15 = vmul.f32 0.044715, %v3317_v59  ;;  %v3343_v62 = vmul.f32 0.044715, %v3319_v13  ;;  %v3321_v23 = vmul.f32 %v3297_v3, %v6483_v16  ;;  %v3323_v29 = vmul.f32 %v3299_v10, %v6486_v58 }
 0x96e   : > { %v3364_v46 = vadd.f32 %v3340_v56, %v6457_v54  ;;  %v3366_v9 = vadd.f32 %v3342_v4, %v6460_v47  ;;  %v3344_v8 = vmul.f32 0.044715, %v3320_v21  ;;  %v3346_v57 = vmul.f32 0.044715, %v3322_v6 }
 0x96f   : > { %v3365_v18 = vadd.f32 %v3341_v15, %v6463_v60  ;;  %v3367_v41 = vadd.f32 %v3343_v62, %v6466_v49  ;;  %v3345_v40 = vmul.f32 0.044715, %v3321_v23  ;;  %v3347_v33 = vmul.f32 0.044715, %v3323_v29 }
 0x970   : > { %v3388_v7 = vmul.f32 0.7978846, %v3364_v46  ;;  %v3390_v31 = vmul.f32 0.7978846, %v3366_v9  ;;  %v3368_v26 = vadd.f32 %v3344_v8, %v6473_v35  ;;  %v3370_v36 = vadd.f32 %v3346_v57, %v6476_v32 }
 0x971   : > { %v3389_v63 = vmul.f32 0.7978846, %v3365_v18  ;;  %v3391_v53 = vmul.f32 0.7978846, %v3367_v41  ;;  %v3369_v42 = vadd.f32 %v3345_v40, %v6483_v16  ;;  %v3371_v27 = vadd.f32 %v3347_v33, %v6486_v58 }
 0x972   : > { %5160 = vtanh.f32 %v3388_v7  ;;  %v3392_v30 = vmul.f32 0.7978846, %v3368_v26  ;;  %v3394_v52 = vmul.f32 0.7978846, %v3370_v36 }
 0x973   : > { %5162 = vtanh.f32 %v3390_v31  ;;  %v3393_v11 = vmul.f32 0.7978846, %v3369_v42  ;;  %v3395_v61 = vmul.f32 0.7978846, %v3371_v27 }
 0x974   : > { %5164 = vtanh.f32 %v3389_v63 }
 0x975   : > { %5166 = vtanh.f32 %v3391_v53 }
 0x976   : > { %5168 = vtanh.f32 %v3392_v30 }
 0x977   : > { %5170 = vtanh.f32 %v3394_v52 }
 0x978   : > { %5172 = vtanh.f32 %v3393_v11 }
 0x979   : > { %5174 = vtanh.f32 %v3395_v61 }
 0x97c   : > { %v5161_v37 = vpop.eup %5160 }
 0x97d   : > { %v5163_v44 = vpop.eup %5162  ;;  %v3436_v48 = vadd.f32 1.0, %v5161_v37 }
 0x97e   : > { %v5165_v51 = vpop.eup %5164  ;;  %v3438_v5 = vadd.f32 1.0, %v5163_v44 }
 0x97f   : > { %v5167_v2 = vpop.eup %5166  ;;  %v3437_v50 = vadd.f32 1.0, %v5165_v51  ;;  %v3460_v0 = vmul.f32 0.5, %v3436_v48 }
 0x980   : > { %v5169_v20 = vpop.eup %5168  ;;  %v3439_v14 = vadd.f32 1.0, %v5167_v2  ;;  %v3462_v19 = vmul.f32 0.5, %v3438_v5 }
 0x981   : > { %v5171_v17 = vpop.eup %5170  ;;  %v3440_v55 = vadd.f32 1.0, %v5169_v20  ;;  %v3461_v56 = vmul.f32 0.5, %v3437_v50  ;;  %v3484_v15 = vmul.f32 %v3460_v0, %v6457_v54 }
 0x982   : > { %v5173_v45 = vpop.eup %5172  ;;  %v3442_v59 = vadd.f32 1.0, %v5171_v17  ;;  %v3463_v6 = vmul.f32 0.5, %v3439_v14  ;;  %v3486_v29 = vmul.f32 %v3462_v19, %v6460_v47 }
 0x983   : > { %v5175_v13 = vpop.eup %5174  ;;  %v3464_v3 = vmul.f32 0.5, %v3440_v55  ;;  %v3441_v10 = vadd.f32 1.0, %v5173_v45  ;;  %v3485_v57 = vmul.f32 %v3461_v56, %v6463_v60 }
 0x984   : > { %v3466_v4 = vmul.f32 0.5, %v3442_v59  ;;  %v3443_v21 = vadd.f32 1.0, %v5175_v13  ;;  %v3487_v7 = vmul.f32 %v3463_v6, %v6466_v49 }
 0x985   : > { %v3488_v62 = vmul.f32 %v3464_v3, %v6473_v35  ;;  %v3465_v23 = vmul.f32 0.5, %v3441_v10 }
 0x986   : > { %v3490_v46 = vmul.f32 %v3466_v4, %v6476_v32  ;;  %v3467_v9 = vmul.f32 0.5, %v3443_v21 }
 0x987   : > { %v3508_v8 = vpack.c.bf16 %v3488_v62, %v3484_v15  ;;  %v3489_v18 = vmul.f32 %v3465_v23, %v6483_v16 }
 0x988   : > { %v3510_v41 = vpack.c.bf16 %v3490_v46, %v3486_v29  ;;  %v3210_v40 = vpop.f32.mrb[52].mxu1  ;;  %v3273_v33 = vpop.f32.mrb[56].mxu0  ;;  %v3491_v54 = vmul.f32 %v3467_v9, %v6486_v58 }
 0x989   : > { %v6521_v35 = vadd.f32 %v3210_v40, %v6444_v22  ;;  %v6524_v47 = vadd.f32 %v3273_v33, %v6448_v38  ;;  %v3509_v32 = vpack.c.bf16 %v3489_v18, %v3485_v57  ;;  %v3212_v31 = vpop.f32.mrb[53].mxu1  ;;  %v3275_v26 = vpop.f32.mrb[57].mxu0 }
 0x98a   : > { %v3511_v36 = vpack.c.bf16 %v3491_v54, %v3487_v7  ;;  %v6527_v60 = vadd.f32 %v3212_v31, %v6452_v1  ;;  %v6530_v16 = vadd.f32 %v3275_v26, %v6454_v24  ;;  %v3214_v63 = vpop.f32.mrb[54].mxu1  ;;  %v3277_v49 = vpop.f32.mrb[58].mxu0 }
 0x98b   : > { %v3300_v58 = vmul.f32 %v6521_v35, %v6521_v35  ;;  %v3302_v53 = vmul.f32 %v6524_v47, %v6524_v47  ;;  %3815 = vmatprep.mubr.bf16.mxu1 %v3509_v32  ;;  %v6537_v42 = vadd.f32 %v3214_v63, %v6444_v22  ;;  %v6540_v27 = vadd.f32 %v3277_v49, %v6448_v38  ;;  %v3216_v30 = vpop.f32.mrb[55].mxu1  ;;  %v3279_v52 = vpop.f32.mrb[59].mxu0 }
 0x98c   : > { %3872 = vmatprep.mubr.bf16.mxu0 %v3511_v36  ;;  %v3301_v11 = vmul.f32 %v6527_v60, %v6527_v60  ;;  %v3303_v61 = vmul.f32 %v6530_v16, %v6530_v16  ;;  %3816 = vmatmul.mubr.bf16.vlgmr.msra.gmra.mrb[60].mxu1 %v3508_v8  ;;  %v6547_v37 = vadd.f32 %v3216_v30, %v6452_v1 }
 0x98d   : > { %v3324_v44 = vmul.f32 %v3300_v58, %v6521_v35  ;;  %v3326_v48 = vmul.f32 %v3302_v53, %v6524_v47  ;;  %3873 = vmatmul.mubr.bf16.vlgmr.msra.gmra.mrb[64].mxu0 %v3510_v41  ;;  %v3304_v51 = vmul.f32 %v6537_v42, %v6537_v42  ;;  %v3306_v5 = vmul.f32 %v6540_v27, %v6540_v27 }
 0x98e   : > { %v3325_v2 = vmul.f32 %v3301_v11, %v6527_v60  ;;  %v3327_v50 = vmul.f32 %v3303_v61, %v6530_v16  ;;  %v3305_v20 = vmul.f32 %v6547_v37, %v6547_v37  ;;  %v6560_v14 = vadd.f32 %v3279_v52, %v6454_v24 }
 0x98f   : > { %v3348_v17 = vmul.f32 0.044715, %v3324_v44  ;;  %v3350_v0 = vmul.f32 0.044715, %v3326_v48  ;;  %v3328_v55 = vmul.f32 %v3304_v51, %v6537_v42  ;;  %v3330_v45 = vmul.f32 %v3306_v5, %v6540_v27 }
 0x990   : > { %v3349_v19 = vmul.f32 0.044715, %v3325_v2  ;;  %v3351_v59 = vmul.f32 0.044715, %v3327_v50  ;;  %v3329_v13 = vmul.f32 %v3305_v20, %v6547_v37  ;;  %v3307_v3 = vmul.f32 %v6560_v14, %v6560_v14  ;;  %v3220_v10 = vpop.f32.mrb[56].mxu1  ;;  %v3283_v56 = vpop.f32.mrb[60].mxu0 }
 0x991   : > { %v3372_v4 = vadd.f32 %v3348_v17, %v6521_v35  ;;  %v3374_v21 = vadd.f32 %v3350_v0, %v6524_v47  ;;  %v3352_v6 = vmul.f32 0.044715, %v3328_v55  ;;  %v3354_v15 = vmul.f32 0.044715, %v3330_v45  ;;  %v3222_v62 = vpop.f32.mrb[57].mxu1  ;;  %v3285_v23 = vpop.f32.mrb[61].mxu0 }
 0x992   : > { %v3373_v29 = vadd.f32 %v3349_v19, %v6527_v60  ;;  %v3375_v46 = vadd.f32 %v3351_v59, %v6530_v16  ;;  %v3353_v9 = vmul.f32 0.044715, %v3329_v13  ;;  %v3331_v8 = vmul.f32 %v3307_v3, %v6560_v14  ;;  %v3224_v57 = vpop.f32.mrb[58].mxu1  ;;  %v3287_v18 = vpop.f32.mrb[62].mxu0 }
 0x993   : > { %v3396_v41 = vmul.f32 0.7978846, %v3372_v4  ;;  %v3398_v40 = vmul.f32 0.7978846, %v3374_v21  ;;  %v3376_v33 = vadd.f32 %v3352_v6, %v6537_v42  ;;  %v3378_v7 = vadd.f32 %v3354_v15, %v6540_v27  ;;  %v3226_v54 = vpop.f32.mrb[59].mxu1  ;;  %v3289_v32 = vpop.f32.mrb[63].mxu0 }
 0x994   : > { %v3397_v31 = vmul.f32 0.7978846, %v3373_v29  ;;  %v3399_v26 = vmul.f32 0.7978846, %v3375_v46  ;;  %v3377_v36 = vadd.f32 %v3353_v9, %v6547_v37  ;;  %v3355_v63 = vmul.f32 0.044715, %v3331_v8 }
 0x995   : > { %5176 = vtanh.f32 %v3396_v41  ;;  %v3400_v49 = vmul.f32 0.7978846, %v3376_v33  ;;  %v3402_v58 = vmul.f32 0.7978846, %v3378_v7  ;;  %v6576_v53 = vadd.f32 %v3220_v10, %v6444_v22 }
 0x996   : > { %5178 = vtanh.f32 %v3398_v40  ;;  %v3401_v30 = vmul.f32 0.7978846, %v3377_v36  ;;  %v3379_v52 = vadd.f32 %v3355_v63, %v6560_v14  ;;  %v6580_v11 = vadd.f32 %v3283_v56, %v6448_v38 }
 0x997   : > { %5180 = vtanh.f32 %v3397_v31  ;;  %v3308_v61 = vmul.f32 %v6576_v53, %v6576_v53  ;;  %v6585_v44 = vadd.f32 %v3222_v62, %v6452_v1  ;;  %v6588_v48 = vadd.f32 %v3285_v23, %v6454_v24 }
 0x998   : > { %5182 = vtanh.f32 %v3399_v26  ;;  %v3403_v51 = vmul.f32 0.7978846, %v3379_v52  ;;  %v3310_v5 = vmul.f32 %v6580_v11, %v6580_v11  ;;  %v6593_v2 = vadd.f32 %v3224_v57, %v6444_v22 }
 0x999   : > { %5184 = vtanh.f32 %v3400_v49  ;;  %v3332_v50 = vmul.f32 %v3308_v61, %v6576_v53  ;;  %v3309_v20 = vmul.f32 %v6585_v44, %v6585_v44  ;;  %v3311_v17 = vmul.f32 %v6588_v48, %v6588_v48 }
 0x99a   : > { %5186 = vtanh.f32 %v3402_v58  ;;  %v3334_v0 = vmul.f32 %v3310_v5, %v6580_v11  ;;  %v3312_v55 = vmul.f32 %v6593_v2, %v6593_v2  ;;  %v6604_v45 = vadd.f32 %v3287_v18, %v6448_v38 }
 0x99b   : > { %5188 = vtanh.f32 %v3401_v30  ;;  %v3356_v22 = vmul.f32 0.044715, %v3332_v50  ;;  %v3333_v19 = vmul.f32 %v3309_v20, %v6585_v44  ;;  %v3335_v59 = vmul.f32 %v3311_v17, %v6588_v48 }
 0x99c   : > { %5190 = vtanh.f32 %v3403_v51  ;;  %v3358_v13 = vmul.f32 0.044715, %v3334_v0  ;;  %v3336_v3 = vmul.f32 %v3312_v55, %v6593_v2  ;;  %v3314_v10 = vmul.f32 %v6604_v45, %v6604_v45 }
 0x99d   : > { %v3380_v56 = vadd.f32 %v3356_v22, %v6576_v53  ;;  %v3357_v4 = vmul.f32 0.044715, %v3333_v19  ;;  %v3359_v21 = vmul.f32 0.044715, %v3335_v59  ;;  %v6613_v38 = vadd.f32 %v3226_v54, %v6452_v1 }
 0x99e   : > { %v3382_v6 = vadd.f32 %v3358_v13, %v6580_v11  ;;  %v3360_v15 = vmul.f32 0.044715, %v3336_v3  ;;  %v3338_v62 = vmul.f32 %v3314_v10, %v6604_v45  ;;  %v6618_v23 = vadd.f32 %v3289_v32, %v6454_v24 }
 0x99f   : > { %v5177_v29 = vpop.eup %5176  ;;  %v3404_v46 = vmul.f32 0.7978846, %v3380_v56  ;;  %v3381_v9 = vadd.f32 %v3357_v4, %v6585_v44  ;;  %v3383_v8 = vadd.f32 %v3359_v21, %v6588_v48  ;;  %v3313_v57 = vmul.f32 %v6613_v38, %v6613_v38 }
 0x9a0   : > { %v5179_v18 = vpop.eup %5178  ;;  %v3406_v1 = vmul.f32 0.7978846, %v3382_v6  ;;  %v3384_v41 = vadd.f32 %v3360_v15, %v6593_v2  ;;  %v3362_v40 = vmul.f32 0.044715, %v3338_v62  ;;  %v3315_v33 = vmul.f32 %v6618_v23, %v6618_v23 }
 0x9a1   : > { %v5181_v7 = vpop.eup %5180  ;;  %5192 = vtanh.f32 %v3404_v46  ;;  %v3405_v24 = vmul.f32 0.7978846, %v3381_v9  ;;  %v3407_v54 = vmul.f32 0.7978846, %v3383_v8  ;;  %v3337_v32 = vmul.f32 %v3313_v57, %v6613_v38 }
 0x9a2   : > { %v5183_v31 = vpop.eup %5182  ;;  %5194 = vtanh.f32 %v3406_v1  ;;  %v3408_v26 = vmul.f32 0.7978846, %v3384_v41  ;;  %v3386_v36 = vadd.f32 %v3362_v40, %v6604_v45  ;;  %v3339_v63 = vmul.f32 %v3315_v33, %v6618_v23 }
 0x9a3   : > { %v5185_v49 = vpop.eup %5184  ;;  %5196 = vtanh.f32 %v3405_v24  ;;  %v3361_v58 = vmul.f32 0.044715, %v3337_v32  ;;  %v3445_v30 = vadd.f32 1.0, %v5181_v7  ;;  %v3447_v52 = vadd.f32 1.0, %v5183_v31 }
 0x9a4   : > { %v5187_v61 = vpop.eup %5186  ;;  %5198 = vtanh.f32 %v3407_v54  ;;  %v3410_v51 = vmul.f32 0.7978846, %v3386_v36  ;;  %v3363_v5 = vmul.f32 0.044715, %v3339_v63  ;;  %v3444_v50 = vadd.f32 1.0, %v5177_v29 }
 0x9a5   : > { %v5189_v20 = vpop.eup %5188  ;;  %5200 = vtanh.f32 %v3408_v26  ;;  %v3385_v17 = vadd.f32 %v3361_v58, %v6613_v38  ;;  %v3469_v0 = vmul.f32 0.5, %v3445_v30  ;;  %v3448_v59 = vadd.f32 1.0, %v5185_v49 }
 0x9a6   : > { %v5191_v55 = vpop.eup %5190  ;;  %5202 = vtanh.f32 %v3410_v51  ;;  %v3387_v22 = vadd.f32 %v3363_v5, %v6618_v23  ;;  %v3449_v19 = vadd.f32 1.0, %v5189_v20  ;;  %v3471_v56 = vmul.f32 0.5, %v3447_v52 }
 0x9a7   : > { %v3409_v13 = vmul.f32 0.7978846, %v3385_v17  ;;  %v3493_v3 = vmul.f32 %v3469_v0, %v6527_v60  ;;  %v3451_v10 = vadd.f32 1.0, %v5191_v55  ;;  %v3468_v6 = vmul.f32 0.5, %v3444_v50 }
 0x9a8   : > { %v3411_v4 = vmul.f32 0.7978846, %v3387_v22  ;;  %v3473_v21 = vmul.f32 0.5, %v3449_v19  ;;  %v3472_v15 = vmul.f32 0.5, %v3448_v59  ;;  %v3446_v29 = vadd.f32 1.0, %v5179_v18 }
 0x9a9   : > { %5204 = vtanh.f32 %v3409_v13  ;;  %v3475_v62 = vmul.f32 0.5, %v3451_v10  ;;  %v3450_v46 = vadd.f32 1.0, %v5187_v61  ;;  %v3492_v8 = vmul.f32 %v3468_v6, %v6521_v35 }
 0x9aa   : > { %5206 = vtanh.f32 %v3411_v4  ;;  %v3497_v9 = vmul.f32 %v3473_v21, %v6547_v37  ;;  %v3496_v57 = vmul.f32 %v3472_v15, %v6537_v42  ;;  %v3495_v60 = vmul.f32 %v3471_v56, %v6530_v16 }
 0x9ab   : > { %v5193_v1 = vpop.eup %5192  ;;  %v3499_v41 = vmul.f32 %v3475_v62, %v6560_v14  ;;  %v3470_v40 = vmul.f32 0.5, %v3446_v29  ;;  %v3474_v33 = vmul.f32 0.5, %v3450_v46  ;;  %v4332_v62 = vld [vmem:[%s6782_s17] ss:$0 sm:$0xff] }
 0x9ac   : > { %v5195_v7 = vpop.eup %5194  ;;  %v3513_v24 = vpack.c.bf16 %v3497_v9, %v3493_v3  ;;  %v3512_v54 = vpack.c.bf16 %v3496_v57, %v3492_v8  ;;  %v3452_v32 = vadd.f32 1.0, %v5193_v1 }
 0x9ad   : > { %v5197_v18 = vpop.eup %5196  ;;  %v3515_v31 = vpack.c.bf16 %v3499_v41, %v3495_v60  ;;  %v3494_v26 = vmul.f32 %v3470_v40, %v6524_v47  ;;  %v3498_v37 = vmul.f32 %v3474_v33, %v6540_v27  ;;  %v3454_v35 = vadd.f32 1.0, %v5195_v7 }
 0x9ae   : > { %v5199_v36 = vpop.eup %5198  ;;  %3823 = vmatprep.mubr.bf16.mxu1 %v3513_v24  ;;  %v3453_v63 = vadd.f32 1.0, %v5197_v18  ;;  %v3476_v58 = vmul.f32 0.5, %v3452_v32 }
 0x9af   : > { %v5201_v42 = vpop.eup %5200  ;;  %3880 = vmatprep.mubr.bf16.mxu0 %v3515_v31  ;;  %3824 = vmatmul.mubr.bf16.gmra.mrb[64].mxu1 %v3512_v54  ;;  %v3514_v16 = vpack.c.bf16 %v3498_v37, %v3494_v26  ;;  %v3455_v30 = vadd.f32 1.0, %v5199_v36  ;;  %v3478_v61 = vmul.f32 0.5, %v3454_v35 }
 0x9b0   : > { %v5203_v14 = vpop.eup %5202  ;;  %v3456_v49 = vadd.f32 1.0, %v5201_v42  ;;  %v3477_v20 = vmul.f32 0.5, %v3453_v63  ;;  %v3500_v17 = vmul.f32 %v3476_v58, %v6576_v53 }
 0x9b1   : > { %3881 = vmatmul.mubr.bf16.gmra.mrb[68].mxu0 %v3514_v16  ;;  %v3458_v52 = vadd.f32 1.0, %v5203_v14  ;;  %v3479_v22 = vmul.f32 0.5, %v3455_v30  ;;  %v3502_v19 = vmul.f32 %v3478_v61, %v6580_v11 }
 0x9b2   : > { %v3480_v51 = vmul.f32 0.5, %v3456_v49  ;;  %v3501_v4 = vmul.f32 %v3477_v20, %v6585_v44 }
 0x9b3   : > { %v5205_v5 = vpop.eup %5204  ;;  %v3482_v47 = vmul.f32 0.5, %v3458_v52  ;;  %v3503_v6 = vmul.f32 %v3479_v22, %v6588_v48 }
 0x9b4   : > { %v5207_v50 = vpop.eup %5206  ;;  %v3457_v27 = vadd.f32 1.0, %v5205_v5  ;;  %v3504_v0 = vmul.f32 %v3480_v51, %v6593_v2 }
 0x9b5   : > { %v3459_v55 = vadd.f32 1.0, %v5207_v50  ;;  %v3506_v59 = vmul.f32 %v3482_v47, %v6604_v45 }
 0x9b6   : > { %v3481_v13 = vmul.f32 0.5, %v3457_v27  ;;  %v3516_v3 = vpack.c.bf16 %v3504_v0, %v3500_v17 }
 0x9b7   : > { %v3483_v10 = vmul.f32 0.5, %v3459_v55  ;;  %v3518_v56 = vpack.c.bf16 %v3506_v59, %v3502_v19 }
 0x9b8   : > { %v3505_v21 = vmul.f32 %v3481_v13, %v6613_v38 }
 0x9b9   : > { %v3507_v53 = vmul.f32 %v3483_v10, %v6618_v23 }
 0x9ba   : > { %v3517_v2 = vpack.c.bf16 %v3505_v21, %v3501_v4 }
 0x9bb   : > { %v3519_v15 = vpack.c.bf16 %v3507_v53, %v3503_v6 }
 0x9bc   : > { %3831 = vmatprep.mubr.bf16.mxu1 %v3517_v2 }
 0x9bd   : > { %3888 = vmatprep.mubr.bf16.mxu0 %v3519_v15  ;;  %3832 = vmatmul.mubr.bf16.gmra.mrb[68].mxu1 %v3516_v3 }
 0x9be   : > { %3889 = vmatmul.mubr.bf16.gmra.mrb[72].mxu0 %v3518_v56 }
 0xa5f   : > { %v4478_v11 = vpop.f32.mrb[60].mxu1 }
 0xa60   : > { %v4512_v45 = vpop.f32.mrb[64].mxu0  ;;  %v4479_v44 = vpop.f32.mrb[61].mxu1 }
 0xa61   : > { %v4480_v29 = vadd.f32 %v4479_v44, %v4478_v11  ;;  %v4513_v38 = vpop.f32.mrb[65].mxu0  ;;  %v4481_v46 = vpop.f32.mrb[62].mxu1 }
 0xa62   : > { %v4514_v48 = vadd.f32 %v4513_v38, %v4512_v45  ;;  %v4515_v9 = vpop.f32.mrb[66].mxu0  ;;  %v4482_v23 = vpop.f32.mrb[63].mxu1 }
 0xa63   : > { %v3818_v8 = vadd.f32 %v4480_v29, %v4332_v62  ;;  %v4483_v57 = vadd.f32 %v4482_v23, %v4481_v46  ;;  %v4516_v1 = vpop.f32.mrb[67].mxu0 }
 0xa64   : > { %v4517_v60 = vadd.f32 %v4516_v1, %v4515_v9 }
 0xa65   : > { %v3875_v41 = vadd.f32 %v4514_v48, %v3818_v8  ;;  %v3821_v40 = vadd.f32 %v4483_v57, %v4332_v62 }
 0xa67   : > { %v3897_v33 = vadd.f32 %v3875_v41, %v6303_v39  ;;  %v3878_v7 = vadd.f32 %v4517_v60, %v3821_v40 }
 0xa69   : > { %v6655_v24 = vadd.f32 %v3878_v7, %v6308_v28  ;;  %3907 = vst [vmem:[%s6783_s25] sm:$0xff] (!%p4365_p9), %v3897_v33 }
 0xa6b   : > { %3908 = vst [vmem:[%s6783_s25 + $0x8] sm:$0xff] (!%p4365_p9), %v6655_v24 }
 0xa82   : > { %v4484_v54 = vpop.f32.mrb[64].mxu1 }
 0xa83   : > { %v4485_v32 = vpop.f32.mrb[65].mxu1 }
 0xa84   : > { %v4518_v18 = vpop.f32.mrb[68].mxu0  ;;  %v4486_v31 = vadd.f32 %v4485_v32, %v4484_v54  ;;  %v4487_v26 = vpop.f32.mrb[66].mxu1 }
 0xa85   : > { %v4519_v37 = vpop.f32.mrb[69].mxu0  ;;  %v4488_v35 = vpop.f32.mrb[67].mxu1 }
 0xa86   : > { %v3826_v36 = vadd.f32 %v4486_v31, %v4332_v62  ;;  %v4520_v42 = vadd.f32 %v4519_v37, %v4518_v18  ;;  %v4521_v16 = vpop.f32.mrb[70].mxu0  ;;  %v4489_v14 = vadd.f32 %v4488_v35, %v4487_v26 }
 0xa87   : > { %v4522_v63 = vpop.f32.mrb[71].mxu0 }
 0xa88   : > { %v3883_v49 = vadd.f32 %v4520_v42, %v3826_v36  ;;  %v3829_v58 = vadd.f32 %v4489_v14, %v4332_v62  ;;  %v4523_v30 = vadd.f32 %v4522_v63, %v4521_v16 }
 0xa8a   : > { %v3899_v39 = vadd.f32 %v3883_v49, %v6315_v43  ;;  %v3886_v52 = vadd.f32 %v4523_v30, %v3829_v58 }
 0xa8c   : > { %v3900_v28 = vadd.f32 %v3886_v52, %v6321_v34  ;;  %3909 = vst [vmem:[%s6783_s25 + $0x10] sm:$0xff] (!%p4365_p9), %v3899_v39 }
 0xa8e   : > { %3910 = vst [vmem:[%s6783_s25 + $0x18] sm:$0xff] (!%p4365_p9), %v3900_v28 }
 0xa90   : > { %v4490_v61 = vpop.f32.mrb[68].mxu1 }
 0xa91   : > { %v4524_v51 = vpop.f32.mrb[72].mxu0  ;;  %v4491_v5 = vpop.f32.mrb[69].mxu1 }
 0xa92   : > { %v4492_v47 = vadd.f32 %v4491_v5, %v4490_v61  ;;  %v4525_v50 = vpop.f32.mrb[73].mxu0  ;;  %v4493_v27 = vpop.f32.mrb[70].mxu1 }
 0xa93   : > { %v4526_v20 = vadd.f32 %v4525_v50, %v4524_v51  ;;  %v4527_v17 = vpop.f32.mrb[74].mxu0  ;;  %v4494_v0 = vpop.f32.mrb[71].mxu1 }
 0xa94   : > { %v3834_v55 = vadd.f32 %v4492_v47, %v4332_v62  ;;  %v4495_v22 = vadd.f32 %v4494_v0, %v4493_v27  ;;  %v4528_v19 = vpop.f32.mrb[75].mxu0  ;;  %3906 = sbr.rel (%p4365_p9) target bundleno = 2717 (0xa9d), region = 92 }
 0xa95   : > { %v4529_v59 = vadd.f32 %v4528_v19, %v4527_v17 }
 0xa96   : > { %v3891_v13 = vadd.f32 %v4526_v20, %v3834_v55  ;;  %v3837_v3 = vadd.f32 %v4495_v22, %v4332_v62 }
 0xa98   : > { %v3901_v43 = vadd.f32 %v3891_v13, %v6327_v25  ;;  %v3894_v10 = vadd.f32 %v4529_v59, %v3837_v3 }
 0xa9a   : > { %v3902_v34 = vadd.f32 %v3894_v10, %v6332_v12  ;;  %3911 = vst [vmem:[%s6783_s25 + $0x20] sm:$0xff] (!%p4365_p9), %v3901_v43 }
 0xa9c   : > { %3912 = vst [vmem:[%s6783_s25 + $0x28] sm:$0xff] %v3902_v34 }
 0xa9d PF: > { %p4366_p5 = scmp.ne.s32.totalorder %s5298_s21, 1 }
 0xa9e   : > { %3919 = vadd.xlane.f32.xlu0 (!%p4366_p5), %v3897_v33  ;;  %3923 = vadd.xlane.f32.xlu1 (!%p4366_p5), %v3899_v39  ;;  %s6784_s28 = sld [smem:[#allocation14_spill]] (!%p4366_p5)  ;;  %s6785_s3 = sld [smem:[#allocation15_spill]] (!%p4366_p5) }
 0xa9f   : > { %3916 = sbr.rel (%p4366_p5) target bundleno = 3042 (0xbe2), region = 96  ;;  %s6786_s15 = sld [smem:[#allocation16_spill]] (!%p4366_p5) }
 0xaa2   : > { %3921 = vadd.xlane.f32.xlu0 (!%p4366_p5), %v6655_v24  ;;  %3925 = vadd.xlane.f32.xlu1 (!%p4366_p5), %v3900_v28 }
 0xaa4   : > { %v4367_v30 = vld [vmem:[%s6784_s28] ss:$0 sm:$0xff] (!%p4366_p5) }
 0xaa6   : > { %3927 = vadd.xlane.f32.xlu0 %v3901_v43  ;;  %3929 = vadd.xlane.f32.xlu1 %v3902_v34 }
 0xb2b   : > { %v3920_v25 = vpop.xlane.xlu0 %3919  ;;  %v3924_v12 = vpop.xlane.xlu1 %3923 }
 0xb2c   : > { %v3931_v56 = vmul.f32 0.0078125, %v3920_v25  ;;  %v3933_v4 = vmul.f32 0.0078125, %v3924_v12 }
 0xb2e   : > { %v3937_v21 = vsub.f32 %v3897_v33, %v3931_v56  ;;  %v3939_v6 = vsub.f32 %v3899_v39, %v3933_v4 }
 0xb2f   : > { %v3922_v53 = vpop.xlane.xlu0 %3921  ;;  %v3926_v2 = vpop.xlane.xlu1 %3925 }
 0xb30   : > { %v3932_v15 = vmul.f32 0.0078125, %v3922_v53  ;;  %v3943_v11 = vmul.f32 %v3937_v21, %v3937_v21  ;;  %v3934_v45 = vmul.f32 0.0078125, %v3926_v2  ;;  %v3945_v29 = vmul.f32 %v3939_v6, %v3939_v6 }
 0xb32   : > { %v3938_v62 = vsub.f32 %v6655_v24, %v3932_v15  ;;  %3949 = vadd.xlane.f32.xlu0 %v3943_v11  ;;  %v3940_v44 = vsub.f32 %v3900_v28, %v3934_v45  ;;  %v4368_v28 = vld [vmem:[%s6785_s3] ss:$0 sm:$0xff] }
 0xb33   : > { %v3928_v38 = vpop.xlane.xlu0 %3927  ;;  %v3930_v46 = vpop.xlane.xlu1 %3929 }
 0xb34   : > { %v3935_v48 = vmul.f32 0.0078125, %v3928_v38  ;;  %v3944_v9 = vmul.f32 %v3938_v62, %v3938_v62  ;;  %v3936_v23 = vmul.f32 0.0078125, %v3930_v46  ;;  %v3946_v1 = vmul.f32 %v3940_v44, %v3940_v44 }
 0xb36   : > { %v3941_v8 = vsub.f32 %v3901_v43, %v3935_v48  ;;  %3953 = vadd.xlane.f32.xlu0 %v3945_v29  ;;  %3951 = vadd.xlane.f32.xlu1 %v3944_v9  ;;  %v3942_v57 = vsub.f32 %v3902_v34, %v3936_v23 }
 0xb38   : > { %v3947_v60 = vmul.f32 %v3941_v8, %v3941_v8  ;;  %v3948_v41 = vmul.f32 %v3942_v57, %v3942_v57 }
 0xb3a   : > { %3955 = vadd.xlane.f32.xlu1 %v3946_v1  ;;  %3957 = vadd.xlane.f32.xlu0 %v3947_v60 }
 0xb3e   : > { %3959 = vadd.xlane.f32.xlu1 %v3948_v41 }
 0xbbf   : > { %v3950_v40 = vpop.xlane.xlu0 %3949 }
 0xbc0   : > { %v3961_v33 = vmul.f32 0.0078125, %v3950_v40 }
 0xbc2   : > { %v3967_v7 = vadd.f32 1e-05, %v3961_v33 }
 0xbc3   : > { %v3952_v24 = vpop.xlane.xlu1 %3951  ;;  %v3954_v54 = vpop.xlane.xlu0 %3953 }
 0xbc4   : > { %5214 = vrsqrt.f32 %v3967_v7  ;;  %v3962_v32 = vmul.f32 0.0078125, %v3952_v24  ;;  %v3963_v18 = vmul.f32 0.0078125, %v3954_v54 }
 0xbc6   : > { %v3968_v31 = vadd.f32 1e-05, %v3962_v32  ;;  %v3969_v26 = vadd.f32 1e-05, %v3963_v18 }
 0xbc7   : > { %v3956_v37 = vpop.xlane.xlu1 %3955  ;;  %v3958_v35 = vpop.xlane.xlu0 %3957 }
 0xbc8   : > { %5216 = vrsqrt.f32 %v3968_v31  ;;  %v3964_v36 = vmul.f32 0.0078125, %v3956_v37  ;;  %v3965_v42 = vmul.f32 0.0078125, %v3958_v35 }
 0xbc9   : > { %5218 = vrsqrt.f32 %v3969_v26 }
 0xbca   : > { %v3970_v16 = vadd.f32 1e-05, %v3964_v36  ;;  %v3971_v14 = vadd.f32 1e-05, %v3965_v42 }
 0xbcb   : > { %v3960_v63 = vpop.xlane.xlu1 %3959 }
 0xbcc   : > { %5220 = vrsqrt.f32 %v3970_v16  ;;  %v3966_v49 = vmul.f32 0.0078125, %v3960_v63 }
 0xbcd   : > { %5222 = vrsqrt.f32 %v3971_v14 }
 0xbce   : > { %v5215_v58 = vpop.eup %5214  ;;  %v3972_v39 = vadd.f32 1e-05, %v3966_v49 }
 0xbcf   : > { %v3979_v52 = vmul.f32 %v5215_v58, %v3937_v21 }
 0xbd0   : > { %5224 = vrsqrt.f32 %v3972_v39 }
 0xbd1   : > { %v3991_v61 = vmul.f32 %v4367_v30, %v3979_v52 }
 0xbd2   : > { %v5217_v51 = vpop.eup %5216 }
 0xbd3   : > { %v5219_v5 = vpop.eup %5218  ;;  %v4003_v47 = vadd.f32 %v4368_v28, %v3991_v61  ;;  %v3980_v50 = vmul.f32 %v5217_v51, %v3938_v62 }
 0xbd4   : > { %v3981_v27 = vmul.f32 %v5219_v5, %v3939_v6 }
 0xbd5   : > { %4009 = vst [vmem:[%s6786_s15] sm:$0xff] %v4003_v47  ;;  %v3992_v20 = vmul.f32 %v4367_v30, %v3980_v50 }
 0xbd6   : > { %v5221_v17 = vpop.eup %5220  ;;  %v3993_v0 = vmul.f32 %v4367_v30, %v3981_v27 }
 0xbd7   : > { %v5223_v55 = vpop.eup %5222  ;;  %v4004_v22 = vadd.f32 %v4368_v28, %v3992_v20  ;;  %v3982_v19 = vmul.f32 %v5221_v17, %v3940_v44 }
 0xbd8   : > { %v4005_v59 = vadd.f32 %v4368_v28, %v3993_v0  ;;  %v3983_v13 = vmul.f32 %v5223_v55, %v3941_v8 }
 0xbd9   : > { %4010 = vst [vmem:[%s6786_s15 + $0x8] sm:$0xff] %v4004_v22  ;;  %v3994_v3 = vmul.f32 %v4367_v30, %v3982_v19 }
 0xbda   : > { %v5225_v43 = vpop.eup %5224  ;;  %4011 = vst [vmem:[%s6786_s15 + $0x10] sm:$0xff] %v4005_v59  ;;  %v3995_v10 = vmul.f32 %v4367_v30, %v3983_v13 }
 0xbdb   : > { %v4006_v34 = vadd.f32 %v4368_v28, %v3994_v3  ;;  %v3984_v25 = vmul.f32 %v5225_v43, %v3942_v57 }
 0xbdc   : > { %v4007_v12 = vadd.f32 %v4368_v28, %v3995_v10 }
 0xbdd   : > { %4012 = vst [vmem:[%s6786_s15 + $0x18] sm:$0xff] %v4006_v34  ;;  %v3996_v56 = vmul.f32 %v4367_v30, %v3984_v25 }
 0xbde   : > { %4013 = vst [vmem:[%s6786_s15 + $0x20] sm:$0xff] %v4007_v12 }
 0xbdf   : > { %v4008_v4 = vadd.f32 %v4368_v28, %v3996_v56 }
 0xbe1   : > { %4014 = vst [vmem:[%s6786_s15 + $0x28] sm:$0xff] %v4008_v4 }
 0xbe2 PF: > { %s6787_s5 = sld [smem:[#allocation8_spill]]  ;;  %s6788_s18 = sld [smem:[#allocation5_spill]] }
 0xbe3   : > { %s6789_s19 = sld [smem:[#allocation6_spill]]  ;;  %s6790_s20 = sld [smem:[#allocation10_spill]] }
 0xbe4   : > { %s6791_s21 = sld [smem:[#allocation7_spill]]  ;;  %s6792_s22 = sld [smem:[#allocation9_spill]] }
 0xbe8   : > { %s28_s23 = sadd.s32 1, %s6787_s5  }
 0xbe9   : > { %p25_p6 = scmp.ge.s32.totalorder %s28_s23, 4  }
 0xbeb   :  { %27 = sbr.rel (!%p25_p6) target bundleno = 11 (0xb), region = 168 }
 0xbf2   :  { %4037 = vsyncpa [#allocation3], 1 }
 0xbf3   :  { %4039 = vsyncpa [#allocation3 + $0x1], 1 }

</bundles_post_ra>
